<compile_context>
chip_gen: v7x
topology: tpu7x:2x2x1
jax: 0.10.0
libtpu: 0.0.40
codegen_flags: <defaults>
</compile_context>

<pallas_src>
import functools

import jax
import jax.numpy as jnp
from jax import lax
from jax.experimental import pallas as pl
from jax.experimental.pallas import tpu as pltpu


def _aspp_kernel(*refs, offs, tl):
    """One grid step = one (batch, lane-tile) of the width-padded output plane.

    refs = (x_ref_0 .. x_ref_nhalo, w_ref, b_ref, o_ref)
      x_ref_j: (1, Cin_p, TL)        consecutive lane tiles t+j of the flat image
      w_ref:   (B*9, Cout_p, Cin_p)  per-tap weights (constant, single-buffered)
      b_ref:   (Cout_p, 1)           bias summed over branches (f32)
      o_ref:   (1, Cout_p, TL)       lane-dense output tile
    """
    *x_refs, w_ref, b_ref, o_ref = refs

    # Halo'd flat window: (Cin_p, (n_halo+1)*TL); pieces are 128-lane aligned.
    win = jnp.concatenate([r[0] for r in x_refs], axis=-1)

    cout_p = o_ref.shape[1]
    acc = jnp.zeros((cout_p, tl), jnp.float32)

    # Per-tap MXU matmuls accumulated in f32.  Each tap's input is a contiguous
    # lane-shifted slice (static offset) of the window -- no (K, TL) im2col
    # buffer is ever materialized, so VMEM is independent of B*rates*Cin.
    for tap, o in enumerate(offs):
        acc = acc + jnp.dot(w_ref[tap], win[:, o:o + tl],
                            preferred_element_type=jnp.float32)

    acc = acc + b_ref[...]
    o_ref[0] = acc.astype(o_ref.dtype)


def aspp_forward(x_nchw, weights, biases, rates, *,
                 lane_tile=512, compute_dtype=jnp.bfloat16):
    """x_nchw: (N, Cin, H, W); weights: (B, Cout, Cin, 3, 3); biases: (B, Cout).

    Returns (N, Cout, H, W) = sum over branches of dilated 3x3 convs (+bias).
    """
    N, Cin, H, W = x_nchw.shape
    B, Cout, Cin_w, KH, KW = weights.shape
    assert (KH, KW) == (3, 3) and Cin_w == Cin
    rates = tuple(int(r) for r in rates)
    assert len(rates) == B
    cdt = jnp.dtype(compute_dtype)

    P = max(rates)
    Wp = W + 2 * P                       # padded width (valid cols are [P, P+W))
    Ptop = P + 1                         # extra row keeps all flat offsets >= 0

    sub = 8 * (4 // cdt.itemsize)        # sublane pack: 8 for f32, 16 for bf16
    Cin_p = -(-Cin // sub) * sub
    Cout_p = -(-Cout // 8) * 8           # output stays in the input dtype (f32)

    TL = int(lane_tile)
    assert TL % 128 == 0, "lane_tile must be a multiple of 128 (256+ preferred)"
    n_tiles = -(-(H * Wp) // TL)         # output tiles over flattened (H, Wp)
    l_out = n_tiles * TL

    # Flat tap offsets for the row-major (row, col) -> row*Wp + col plane.
    offs = tuple((r * ky + Ptop) * Wp + r * kx
                 for r in rates for ky in (-1, 0, 1) for kx in (-1, 0, 1))
    off_max = max(offs)
    n_halo = -(-off_max // TL)           # extra TL blocks to the right of a tile
    n_taps = B * 9

    # Zero-pad channels -> Cin_p, rows by (P+1, P+1), cols by (P, P); flatten
    # row-major so H*Wp sits on the 128-wide lane axis; cast to compute dtype.
    x_pad = jnp.pad(x_nchw, ((0, 0), (0, Cin_p - Cin), (Ptop, Ptop), (P, P)))
    x_flat = x_pad.reshape(N, Cin_p, -1)
    natural = x_flat.shape[-1]
    l_in = TL * max(n_tiles + n_halo, -(-natural // TL))
    x_flat = jnp.pad(x_flat, ((0, 0), (0, 0), (0, l_in - natural))).astype(cdt)

    # Per-tap weights (B*9, Cout_p, Cin_p); tap index (b*3 + kh)*3 + kw matches
    # the `offs` ordering above.  Bias summed over branches, kept in f32.
    w_pad = jnp.pad(weights, ((0, 0), (0, Cout_p - Cout),
                              (0, Cin_p - Cin), (0, 0), (0, 0)))
    w_taps = jnp.transpose(w_pad, (0, 3, 4, 1, 2)).reshape(
        n_taps, Cout_p, Cin_p).astype(cdt)
    b_sum = jnp.pad(jnp.sum(biases, axis=0), (0, Cout_p - Cout))
    b_sum = b_sum.reshape(Cout_p, 1).astype(jnp.float32)

    kernel = functools.partial(_aspp_kernel, offs=offs, tl=TL)

    # VMEM budget + cost estimate (advisory).
    in_tile_bytes = Cin_p * TL * cdt.itemsize
    out_tile_bytes = Cout_p * TL * x_nchw.dtype.itemsize
    w_bytes = n_taps * Cout_p * Cin_p * cdt.itemsize
    vmem_est = (2 * (n_halo + 1) * in_tile_bytes       # pipelined input views
                + 2 * w_bytes + 2 * 8 * 128 * 4        # weights + bias
                + 2 * out_tile_bytes                   # pipelined output
                + (n_halo + 1) * in_tile_bytes         # halo'd window copy
                + Cout_p * TL * 4                      # f32 accumulator
                + 4 * in_tile_bytes)                   # tap-slice temporaries
    vmem_limit = int(min(64 * 2**20, max(32 * 2**20, 2 * vmem_est)))

    cost = pl.CostEstimate(
        flops=int(2 * N * l_out * Cout_p * n_taps * Cin_p),
        transcendentals=0,
        bytes_accessed=int(N * n_tiles * (n_halo + 1) * in_tile_bytes
                           + w_bytes + N * n_tiles * out_tile_bytes),
    )

    def build(single_buffer_consts):
        const_kw = (dict(pipeline_mode=pl.Buffered(1))
                    if single_buffer_consts else {})
        # Overlapping halo window via (n_halo + 1) blocked views of x_flat.
        x_specs = [pl.BlockSpec((1, Cin_p, TL), lambda n, t, j=j: (n, 0, t + j))
                   for j in range(n_halo + 1)]
        return pl.pallas_call(
            kernel,
            out_shape=jax.ShapeDtypeStruct((N, Cout_p, l_out), x_nchw.dtype),
            grid_spec=pltpu.PrefetchScalarGridSpec(
                num_scalar_prefetch=0,
                grid=(N, n_tiles),
                in_specs=x_specs + [
                    pl.BlockSpec((n_taps, Cout_p, Cin_p),
                                 lambda n, t: (0, 0, 0), **const_kw),
                    pl.BlockSpec((Cout_p, 1), lambda n, t: (0, 0), **const_kw),
                ],
                out_specs=pl.BlockSpec((1, Cout_p, TL), lambda n, t: (n, 0, t)),
            ),
            compiler_params=pltpu.CompilerParams(
                dimension_semantics=("parallel", "parallel"),
                vmem_limit_bytes=vmem_limit),
            cost_estimate=cost,
        )

    args = [x_flat] * (n_halo + 1) + [w_taps, b_sum]
    try:
        out_flat = build(True)(*args)
    except Exception:
        # Fallback for jax versions without pl.Buffered / buffer_count=1
        # support: default double-buffered constants (identical numerics).
        out_flat = build(False)(*args)

    # Crop padded channels / padded-width plane back to the valid output.
    out = out_flat[:, :Cout, :H * Wp].reshape(N, Cout, H, Wp)[:, :, :, P:P + W]
    return out


def aspp_reference(x_nchw, weights, biases, rates):
    """Plain-JAX reference (lax.conv_general_dilated) for verification."""
    out = None
    for bi, rate in enumerate(rates):
        y = lax.conv_general_dilated(
            x_nchw, weights[bi],
            window_strides=(1, 1),
            padding=((rate, rate), (rate, rate)),
            rhs_dilation=(rate, rate),
            dimension_numbers=("NCHW", "OIHW", "NCHW"),
        ) + biases[bi][None, :, None, None]
        out = y if out is None else out + y
    return out


if __name__ == "__main__":
    # Module config: ASPP(in_planes=4, out_planes=8, atrous_rates=(1, 2, 3))
    in_planes, out_planes = 4, 8
    atrous_rates = (1, 2, 3)
    N, H, W = 2, 16, 16

    key = jax.random.PRNGKey(0)
    k_x, k_w, k_b = jax.random.split(key, 3)

    x = jax.random.normal(k_x, (N, in_planes, H, W), dtype=jnp.float32)
    # PyTorch _init_weights: weight ~ N(0, 0.01), bias = 0; use small random
    # biases so the bias path is actually exercised.
    weights = 0.01 * jax.random.normal(
        k_w, (len(atrous_rates), out_planes, in_planes, 3, 3), dtype=jnp.float32)
    biases = 0.1 * jax.random.normal(
        k_b, (len(atrous_rates), out_planes), dtype=jnp.float32)

    ref = aspp_reference(x, weights, biases, atrous_rates)

    # 1) f32 compute path: exact-semantics check against the conv reference.
    out_f32 = jax.block_until_ready(
        aspp_forward(x, weights, biases, atrous_rates,
                     compute_dtype=jnp.float32))
    assert out_f32.shape == (N, out_planes, H, W), out_f32.shape
    assert jnp.allclose(out_f32, ref, atol=1e-4, rtol=1e-4), (
        float(jnp.max(jnp.abs(out_f32 - ref))))

    # 2) Default bf16 compute path (f32 MXU accumulation): compare against the
    #    reference evaluated on bf16-rounded inputs/weights so the only
    #    remaining difference is f32 accumulation order.
    ref_bf16 = aspp_reference(
        x.astype(jnp.bfloat16).astype(jnp.float32),
        weights.astype(jnp.bfloat16).astype(jnp.float32),
        biases, atrous_rates)
    out_bf16 = jax.block_until_ready(
        aspp_forward(x, weights, biases, atrous_rates))
    assert out_bf16.shape == (N, out_planes, H, W), out_bf16.shape
    assert jnp.allclose(out_bf16, ref_bf16, atol=2e-4, rtol=2e-4), (
        float(jnp.max(jnp.abs(out_bf16 - ref_bf16))))

    print("KERNEL_OK")
</pallas_src>

<mosaic_0001>
module attributes {stable_mosaic.version = 11 : i64} {
  func.func @_aspp_kernel(%arg0: i32, %arg1: i32, %arg2: memref<1x8x512xf32, #tpu.memory_space<vmem>>, %arg3: memref<1x8x512xf32, #tpu.memory_space<vmem>>, %arg4: memref<27x8x8xf32, #tpu.memory_space<vmem>>, %arg5: memref<8x1xf32, #tpu.memory_space<vmem>>, %arg6: memref<1x8x512xf32, #tpu.memory_space<vmem>>) attributes {dimension_semantics = [#tpu.dimension_semantics<parallel>, #tpu.dimension_semantics<parallel>], iteration_bounds = array<i64: 2, 1>, scalar_prefetch = 0 : i64, scratch_operands = 0 : i64, tpu.core_type = #tpu.core_type<tc>, window_params = [{transform_indices = @transform_0, window_bounds = array<i64: 1, 8, 512>}, {transform_indices = @transform_1, window_bounds = array<i64: 1, 8, 512>}, {pipeline_mode = #tpu.pipeline_mode<synchronous>, transform_indices = @transform_2, window_bounds = array<i64: 27, 8, 8>}, {pipeline_mode = #tpu.pipeline_mode<synchronous>, transform_indices = @transform_3, window_bounds = array<i64: 8, 1>}, {transform_indices = @transform_4, window_bounds = array<i64: 1, 8, 512>}]} {
    %c0 = arith.constant 0 : index
    %c0_0 = arith.constant 0 : index
    %c0_1 = arith.constant 0 : index
    %0 = vector.load %arg2[%c0, %c0_0, %c0_1] : memref<1x8x512xf32, #tpu.memory_space<vmem>>, vector<1x8x512xf32>
    %1 = vector.shape_cast %0 : vector<1x8x512xf32> to vector<8x512xf32>
    %c0_2 = arith.constant 0 : index
    %c0_3 = arith.constant 0 : index
    %c0_4 = arith.constant 0 : index
    %2 = vector.load %arg3[%c0_2, %c0_3, %c0_4] : memref<1x8x512xf32, #tpu.memory_space<vmem>>, vector<1x8x512xf32>
    %3 = vector.shape_cast %2 : vector<1x8x512xf32> to vector<8x512xf32>
    %4 = tpu.concatenate %1, %3 in 1 : vector<8x512xf32>, vector<8x512xf32> -> vector<8x1024xf32>
    %cst = arith.constant 0.000000e+00 : f32
    %5 = vector.broadcast %cst : f32 to vector<8x512xf32>
    %c0_5 = arith.constant 0 : index
    %c0_6 = arith.constant 0 : index
    %c0_7 = arith.constant 0 : index
    %6 = vector.load %arg4[%c0_5, %c0_6, %c0_7] : memref<27x8x8xf32, #tpu.memory_space<vmem>>, vector<1x8x8xf32>
    %7 = vector.shape_cast %6 : vector<1x8x8xf32> to vector<8x8xf32>
    %8 = vector.extract_strided_slice %4 {offsets = [0, 65], sizes = [8, 512], strides = [1, 1]} : vector<8x1024xf32> to vector<8x512xf32>
    %cst_8 = arith.constant dense<0.000000e+00> : vector<8x512xf32>
    %9 = tpu.matmul %7, %8, %cst_8 {dimension_numbers = #tpu.dot_dimension_numbers<[1], [0], [0], [1], [0, 0, 1, 1], [], []>} : vector<8x8xf32>, vector<8x512xf32>, vector<8x512xf32> -> vector<8x512xf32>
    %10 = arith.addf %5, %9 : vector<8x512xf32>
    %c1 = arith.constant 1 : index
    %c0_9 = arith.constant 0 : index
    %c0_10 = arith.constant 0 : index
    %11 = vector.load %arg4[%c1, %c0_9, %c0_10] : memref<27x8x8xf32, #tpu.memory_space<vmem>>, vector<1x8x8xf32>
    %12 = vector.shape_cast %11 : vector<1x8x8xf32> to vector<8x8xf32>
    %13 = vector.extract_strided_slice %4 {offsets = [0, 66], sizes = [8, 512], strides = [1, 1]} : vector<8x1024xf32> to vector<8x512xf32>
    %cst_11 = arith.constant dense<0.000000e+00> : vector<8x512xf32>
    %14 = tpu.matmul %12, %13, %cst_11 {dimension_numbers = #tpu.dot_dimension_numbers<[1], [0], [0], [1], [0, 0, 1, 1], [], []>} : vector<8x8xf32>, vector<8x512xf32>, vector<8x512xf32> -> vector<8x512xf32>
    %15 = arith.addf %10, %14 : vector<8x512xf32>
    %c2 = arith.constant 2 : index
    %c0_12 = arith.constant 0 : index
    %c0_13 = arith.constant 0 : index
    %16 = vector.load %arg4[%c2, %c0_12, %c0_13] : memref<27x8x8xf32, #tpu.memory_space<vmem>>, vector<1x8x8xf32>
    %17 = vector.shape_cast %16 : vector<1x8x8xf32> to vector<8x8xf32>
    %18 = vector.extract_strided_slice %4 {offsets = [0, 67], sizes = [8, 512], strides = [1, 1]} : vector<8x1024xf32> to vector<8x512xf32>
    %cst_14 = arith.constant dense<0.000000e+00> : vector<8x512xf32>
    %19 = tpu.matmul %17, %18, %cst_14 {dimension_numbers = #tpu.dot_dimension_numbers<[1], [0], [0], [1], [0, 0, 1, 1], [], []>} : vector<8x8xf32>, vector<8x512xf32>, vector<8x512xf32> -> vector<8x512xf32>
    %20 = arith.addf %15, %19 : vector<8x512xf32>
    %c3 = arith.constant 3 : index
    %c0_15 = arith.constant 0 : index
    %c0_16 = arith.constant 0 : index
    %21 = vector.load %arg4[%c3, %c0_15, %c0_16] : memref<27x8x8xf32, #tpu.memory_space<vmem>>, vector<1x8x8xf32>
    %22 = vector.shape_cast %21 : vector<1x8x8xf32> to vector<8x8xf32>
    %23 = vector.extract_strided_slice %4 {offsets = [0, 87], sizes = [8, 512], strides = [1, 1]} : vector<8x1024xf32> to vector<8x512xf32>
    %cst_17 = arith.constant dense<0.000000e+00> : vector<8x512xf32>
    %24 = tpu.matmul %22, %23, %cst_17 {dimension_numbers = #tpu.dot_dimension_numbers<[1], [0], [0], [1], [0, 0, 1, 1], [], []>} : vector<8x8xf32>, vector<8x512xf32>, vector<8x512xf32> -> vector<8x512xf32>
    %25 = arith.addf %20, %24 : vector<8x512xf32>
    %c4 = arith.constant 4 : index
    %c0_18 = arith.constant 0 : index
    %c0_19 = arith.constant 0 : index
    %26 = vector.load %arg4[%c4, %c0_18, %c0_19] : memref<27x8x8xf32, #tpu.memory_space<vmem>>, vector<1x8x8xf32>
    %27 = vector.shape_cast %26 : vector<1x8x8xf32> to vector<8x8xf32>
    %28 = vector.extract_strided_slice %4 {offsets = [0, 88], sizes = [8, 512], strides = [1, 1]} : vector<8x1024xf32> to vector<8x512xf32>
    %cst_20 = arith.constant dense<0.000000e+00> : vector<8x512xf32>
    %29 = tpu.matmul %27, %28, %cst_20 {dimension_numbers = #tpu.dot_dimension_numbers<[1], [0], [0], [1], [0, 0, 1, 1], [], []>} : vector<8x8xf32>, vector<8x512xf32>, vector<8x512xf32> -> vector<8x512xf32>
    %30 = arith.addf %25, %29 : vector<8x512xf32>
    %c5 = arith.constant 5 : index
    %c0_21 = arith.constant 0 : index
    %c0_22 = arith.constant 0 : index
    %31 = vector.load %arg4[%c5, %c0_21, %c0_22] : memref<27x8x8xf32, #tpu.memory_space<vmem>>, vector<1x8x8xf32>
    %32 = vector.shape_cast %31 : vector<1x8x8xf32> to vector<8x8xf32>
    %33 = vector.extract_strided_slice %4 {offsets = [0, 89], sizes = [8, 512], strides = [1, 1]} : vector<8x1024xf32> to vector<8x512xf32>
    %cst_23 = arith.constant dense<0.000000e+00> : vector<8x512xf32>
    %34 = tpu.matmul %32, %33, %cst_23 {dimension_numbers = #tpu.dot_dimension_numbers<[1], [0], [0], [1], [0, 0, 1, 1], [], []>} : vector<8x8xf32>, vector<8x512xf32>, vector<8x512xf32> -> vector<8x512xf32>
    %35 = arith.addf %30, %34 : vector<8x512xf32>
    %c6 = arith.constant 6 : index
    %c0_24 = arith.constant 0 : index
    %c0_25 = arith.constant 0 : index
    %36 = vector.load %arg4[%c6, %c0_24, %c0_25] : memref<27x8x8xf32, #tpu.memory_space<vmem>>, vector<1x8x8xf32>
    %37 = vector.shape_cast %36 : vector<1x8x8xf32> to vector<8x8xf32>
    %38 = vector.extract_strided_slice %4 {offsets = [0, 109], sizes = [8, 512], strides = [1, 1]} : vector<8x1024xf32> to vector<8x512xf32>
    %cst_26 = arith.constant dense<0.000000e+00> : vector<8x512xf32>
    %39 = tpu.matmul %37, %38, %cst_26 {dimension_numbers = #tpu.dot_dimension_numbers<[1], [0], [0], [1], [0, 0, 1, 1], [], []>} : vector<8x8xf32>, vector<8x512xf32>, vector<8x512xf32> -> vector<8x512xf32>
    %40 = arith.addf %35, %39 : vector<8x512xf32>
    %c7 = arith.constant 7 : index
    %c0_27 = arith.constant 0 : index
    %c0_28 = arith.constant 0 : index
    %41 = vector.load %arg4[%c7, %c0_27, %c0_28] : memref<27x8x8xf32, #tpu.memory_space<vmem>>, vector<1x8x8xf32>
    %42 = vector.shape_cast %41 : vector<1x8x8xf32> to vector<8x8xf32>
    %43 = vector.extract_strided_slice %4 {offsets = [0, 110], sizes = [8, 512], strides = [1, 1]} : vector<8x1024xf32> to vector<8x512xf32>
    %cst_29 = arith.constant dense<0.000000e+00> : vector<8x512xf32>
    %44 = tpu.matmul %42, %43, %cst_29 {dimension_numbers = #tpu.dot_dimension_numbers<[1], [0], [0], [1], [0, 0, 1, 1], [], []>} : vector<8x8xf32>, vector<8x512xf32>, vector<8x512xf32> -> vector<8x512xf32>
    %45 = arith.addf %40, %44 : vector<8x512xf32>
    %c8 = arith.constant 8 : index
    %c0_30 = arith.constant 0 : index
    %c0_31 = arith.constant 0 : index
    %46 = vector.load %arg4[%c8, %c0_30, %c0_31] : memref<27x8x8xf32, #tpu.memory_space<vmem>>, vector<1x8x8xf32>
    %47 = vector.shape_cast %46 : vector<1x8x8xf32> to vector<8x8xf32>
    %48 = vector.extract_strided_slice %4 {offsets = [0, 111], sizes = [8, 512], strides = [1, 1]} : vector<8x1024xf32> to vector<8x512xf32>
    %cst_32 = arith.constant dense<0.000000e+00> : vector<8x512xf32>
    %49 = tpu.matmul %47, %48, %cst_32 {dimension_numbers = #tpu.dot_dimension_numbers<[1], [0], [0], [1], [0, 0, 1, 1], [], []>} : vector<8x8xf32>, vector<8x512xf32>, vector<8x512xf32> -> vector<8x512xf32>
    %50 = arith.addf %45, %49 : vector<8x512xf32>
    %c9 = arith.constant 9 : index
    %c0_33 = arith.constant 0 : index
    %c0_34 = arith.constant 0 : index
    %51 = vector.load %arg4[%c9, %c0_33, %c0_34] : memref<27x8x8xf32, #tpu.memory_space<vmem>>, vector<1x8x8xf32>
    %52 = vector.shape_cast %51 : vector<1x8x8xf32> to vector<8x8xf32>
    %53 = vector.extract_strided_slice %4 {offsets = [0, 42], sizes = [8, 512], strides = [1, 1]} : vector<8x1024xf32> to vector<8x512xf32>
    %cst_35 = arith.constant dense<0.000000e+00> : vector<8x512xf32>
    %54 = tpu.matmul %52, %53, %cst_35 {dimension_numbers = #tpu.dot_dimension_numbers<[1], [0], [0], [1], [0, 0, 1, 1], [], []>} : vector<8x8xf32>, vector<8x512xf32>, vector<8x512xf32> -> vector<8x512xf32>
    %55 = arith.addf %50, %54 : vector<8x512xf32>
    %c10 = arith.constant 10 : index
    %c0_36 = arith.constant 0 : index
    %c0_37 = arith.constant 0 : index
    %56 = vector.load %arg4[%c10, %c0_36, %c0_37] : memref<27x8x8xf32, #tpu.memory_space<vmem>>, vector<1x8x8xf32>
    %57 = vector.shape_cast %56 : vector<1x8x8xf32> to vector<8x8xf32>
    %58 = vector.extract_strided_slice %4 {offsets = [0, 44], sizes = [8, 512], strides = [1, 1]} : vector<8x1024xf32> to vector<8x512xf32>
    %cst_38 = arith.constant dense<0.000000e+00> : vector<8x512xf32>
    %59 = tpu.matmul %57, %58, %cst_38 {dimension_numbers = #tpu.dot_dimension_numbers<[1], [0], [0], [1], [0, 0, 1, 1], [], []>} : vector<8x8xf32>, vector<8x512xf32>, vector<8x512xf32> -> vector<8x512xf32>
    %60 = arith.addf %55, %59 : vector<8x512xf32>
    %c11 = arith.constant 11 : index
    %c0_39 = arith.constant 0 : index
    %c0_40 = arith.constant 0 : index
    %61 = vector.load %arg4[%c11, %c0_39, %c0_40] : memref<27x8x8xf32, #tpu.memory_space<vmem>>, vector<1x8x8xf32>
    %62 = vector.shape_cast %61 : vector<1x8x8xf32> to vector<8x8xf32>
    %63 = vector.extract_strided_slice %4 {offsets = [0, 46], sizes = [8, 512], strides = [1, 1]} : vector<8x1024xf32> to vector<8x512xf32>
    %cst_41 = arith.constant dense<0.000000e+00> : vector<8x512xf32>
    %64 = tpu.matmul %62, %63, %cst_41 {dimension_numbers = #tpu.dot_dimension_numbers<[1], [0], [0], [1], [0, 0, 1, 1], [], []>} : vector<8x8xf32>, vector<8x512xf32>, vector<8x512xf32> -> vector<8x512xf32>
    %65 = arith.addf %60, %64 : vector<8x512xf32>
    %c12 = arith.constant 12 : index
    %c0_42 = arith.constant 0 : index
    %c0_43 = arith.constant 0 : index
    %66 = vector.load %arg4[%c12, %c0_42, %c0_43] : memref<27x8x8xf32, #tpu.memory_space<vmem>>, vector<1x8x8xf32>
    %67 = vector.shape_cast %66 : vector<1x8x8xf32> to vector<8x8xf32>
    %68 = vector.extract_strided_slice %4 {offsets = [0, 86], sizes = [8, 512], strides = [1, 1]} : vector<8x1024xf32> to vector<8x512xf32>
    %cst_44 = arith.constant dense<0.000000e+00> : vector<8x512xf32>
    %69 = tpu.matmul %67, %68, %cst_44 {dimension_numbers = #tpu.dot_dimension_numbers<[1], [0], [0], [1], [0, 0, 1, 1], [], []>} : vector<8x8xf32>, vector<8x512xf32>, vector<8x512xf32> -> vector<8x512xf32>
    %70 = arith.addf %65, %69 : vector<8x512xf32>
    %c13 = arith.constant 13 : index
    %c0_45 = arith.constant 0 : index
    %c0_46 = arith.constant 0 : index
    %71 = vector.load %arg4[%c13, %c0_45, %c0_46] : memref<27x8x8xf32, #tpu.memory_space<vmem>>, vector<1x8x8xf32>
    %72 = vector.shape_cast %71 : vector<1x8x8xf32> to vector<8x8xf32>
    %73 = vector.extract_strided_slice %4 {offsets = [0, 88], sizes = [8, 512], strides = [1, 1]} : vector<8x1024xf32> to vector<8x512xf32>
    %cst_47 = arith.constant dense<0.000000e+00> : vector<8x512xf32>
    %74 = tpu.matmul %72, %73, %cst_47 {dimension_numbers = #tpu.dot_dimension_numbers<[1], [0], [0], [1], [0, 0, 1, 1], [], []>} : vector<8x8xf32>, vector<8x512xf32>, vector<8x512xf32> -> vector<8x512xf32>
    %75 = arith.addf %70, %74 : vector<8x512xf32>
    %c14 = arith.constant 14 : index
    %c0_48 = arith.constant 0 : index
    %c0_49 = arith.constant 0 : index
    %76 = vector.load %arg4[%c14, %c0_48, %c0_49] : memref<27x8x8xf32, #tpu.memory_space<vmem>>, vector<1x8x8xf32>
    %77 = vector.shape_cast %76 : vector<1x8x8xf32> to vector<8x8xf32>
    %78 = vector.extract_strided_slice %4 {offsets = [0, 90], sizes = [8, 512], strides = [1, 1]} : vector<8x1024xf32> to vector<8x512xf32>
    %cst_50 = arith.constant dense<0.000000e+00> : vector<8x512xf32>
    %79 = tpu.matmul %77, %78, %cst_50 {dimension_numbers = #tpu.dot_dimension_numbers<[1], [0], [0], [1], [0, 0, 1, 1], [], []>} : vector<8x8xf32>, vector<8x512xf32>, vector<8x512xf32> -> vector<8x512xf32>
    %80 = arith.addf %75, %79 : vector<8x512xf32>
    %c15 = arith.constant 15 : index
    %c0_51 = arith.constant 0 : index
    %c0_52 = arith.constant 0 : index
    %81 = vector.load %arg4[%c15, %c0_51, %c0_52] : memref<27x8x8xf32, #tpu.memory_space<vmem>>, vector<1x8x8xf32>
    %82 = vector.shape_cast %81 : vector<1x8x8xf32> to vector<8x8xf32>
    %83 = vector.extract_strided_slice %4 {offsets = [0, 130], sizes = [8, 512], strides = [1, 1]} : vector<8x1024xf32> to vector<8x512xf32>
    %cst_53 = arith.constant dense<0.000000e+00> : vector<8x512xf32>
    %84 = tpu.matmul %82, %83, %cst_53 {dimension_numbers = #tpu.dot_dimension_numbers<[1], [0], [0], [1], [0, 0, 1, 1], [], []>} : vector<8x8xf32>, vector<8x512xf32>, vector<8x512xf32> -> vector<8x512xf32>
    %85 = arith.addf %80, %84 : vector<8x512xf32>
    %c16 = arith.constant 16 : index
    %c0_54 = arith.constant 0 : index
    %c0_55 = arith.constant 0 : index
    %86 = vector.load %arg4[%c16, %c0_54, %c0_55] : memref<27x8x8xf32, #tpu.memory_space<vmem>>, vector<1x8x8xf32>
    %87 = vector.shape_cast %86 : vector<1x8x8xf32> to vector<8x8xf32>
    %88 = vector.extract_strided_slice %4 {offsets = [0, 132], sizes = [8, 512], strides = [1, 1]} : vector<8x1024xf32> to vector<8x512xf32>
    %cst_56 = arith.constant dense<0.000000e+00> : vector<8x512xf32>
    %89 = tpu.matmul %87, %88, %cst_56 {dimension_numbers = #tpu.dot_dimension_numbers<[1], [0], [0], [1], [0, 0, 1, 1], [], []>} : vector<8x8xf32>, vector<8x512xf32>, vector<8x512xf32> -> vector<8x512xf32>
    %90 = arith.addf %85, %89 : vector<8x512xf32>
    %c17 = arith.constant 17 : index
    %c0_57 = arith.constant 0 : index
    %c0_58 = arith.constant 0 : index
    %91 = vector.load %arg4[%c17, %c0_57, %c0_58] : memref<27x8x8xf32, #tpu.memory_space<vmem>>, vector<1x8x8xf32>
    %92 = vector.shape_cast %91 : vector<1x8x8xf32> to vector<8x8xf32>
    %93 = vector.extract_strided_slice %4 {offsets = [0, 134], sizes = [8, 512], strides = [1, 1]} : vector<8x1024xf32> to vector<8x512xf32>
    %cst_59 = arith.constant dense<0.000000e+00> : vector<8x512xf32>
    %94 = tpu.matmul %92, %93, %cst_59 {dimension_numbers = #tpu.dot_dimension_numbers<[1], [0], [0], [1], [0, 0, 1, 1], [], []>} : vector<8x8xf32>, vector<8x512xf32>, vector<8x512xf32> -> vector<8x512xf32>
    %95 = arith.addf %90, %94 : vector<8x512xf32>
    %c18 = arith.constant 18 : index
    %c0_60 = arith.constant 0 : index
    %c0_61 = arith.constant 0 : index
    %96 = vector.load %arg4[%c18, %c0_60, %c0_61] : memref<27x8x8xf32, #tpu.memory_space<vmem>>, vector<1x8x8xf32>
    %97 = vector.shape_cast %96 : vector<1x8x8xf32> to vector<8x8xf32>
    %98 = vector.extract_strided_slice %4 {offsets = [0, 19], sizes = [8, 512], strides = [1, 1]} : vector<8x1024xf32> to vector<8x512xf32>
    %cst_62 = arith.constant dense<0.000000e+00> : vector<8x512xf32>
    %99 = tpu.matmul %97, %98, %cst_62 {dimension_numbers = #tpu.dot_dimension_numbers<[1], [0], [0], [1], [0, 0, 1, 1], [], []>} : vector<8x8xf32>, vector<8x512xf32>, vector<8x512xf32> -> vector<8x512xf32>
    %100 = arith.addf %95, %99 : vector<8x512xf32>
    %c19 = arith.constant 19 : index
    %c0_63 = arith.constant 0 : index
    %c0_64 = arith.constant 0 : index
    %101 = vector.load %arg4[%c19, %c0_63, %c0_64] : memref<27x8x8xf32, #tpu.memory_space<vmem>>, vector<1x8x8xf32>
    %102 = vector.shape_cast %101 : vector<1x8x8xf32> to vector<8x8xf32>
    %103 = vector.extract_strided_slice %4 {offsets = [0, 22], sizes = [8, 512], strides = [1, 1]} : vector<8x1024xf32> to vector<8x512xf32>
    %cst_65 = arith.constant dense<0.000000e+00> : vector<8x512xf32>
    %104 = tpu.matmul %102, %103, %cst_65 {dimension_numbers = #tpu.dot_dimension_numbers<[1], [0], [0], [1], [0, 0, 1, 1], [], []>} : vector<8x8xf32>, vector<8x512xf32>, vector<8x512xf32> -> vector<8x512xf32>
    %105 = arith.addf %100, %104 : vector<8x512xf32>
    %c20 = arith.constant 20 : index
    %c0_66 = arith.constant 0 : index
    %c0_67 = arith.constant 0 : index
    %106 = vector.load %arg4[%c20, %c0_66, %c0_67] : memref<27x8x8xf32, #tpu.memory_space<vmem>>, vector<1x8x8xf32>
    %107 = vector.shape_cast %106 : vector<1x8x8xf32> to vector<8x8xf32>
    %108 = vector.extract_strided_slice %4 {offsets = [0, 25], sizes = [8, 512], strides = [1, 1]} : vector<8x1024xf32> to vector<8x512xf32>
    %cst_68 = arith.constant dense<0.000000e+00> : vector<8x512xf32>
    %109 = tpu.matmul %107, %108, %cst_68 {dimension_numbers = #tpu.dot_dimension_numbers<[1], [0], [0], [1], [0, 0, 1, 1], [], []>} : vector<8x8xf32>, vector<8x512xf32>, vector<8x512xf32> -> vector<8x512xf32>
    %110 = arith.addf %105, %109 : vector<8x512xf32>
    %c21 = arith.constant 21 : index
    %c0_69 = arith.constant 0 : index
    %c0_70 = arith.constant 0 : index
    %111 = vector.load %arg4[%c21, %c0_69, %c0_70] : memref<27x8x8xf32, #tpu.memory_space<vmem>>, vector<1x8x8xf32>
    %112 = vector.shape_cast %111 : vector<1x8x8xf32> to vector<8x8xf32>
    %113 = vector.extract_strided_slice %4 {offsets = [0, 85], sizes = [8, 512], strides = [1, 1]} : vector<8x1024xf32> to vector<8x512xf32>
    %cst_71 = arith.constant dense<0.000000e+00> : vector<8x512xf32>
    %114 = tpu.matmul %112, %113, %cst_71 {dimension_numbers = #tpu.dot_dimension_numbers<[1], [0], [0], [1], [0, 0, 1, 1], [], []>} : vector<8x8xf32>, vector<8x512xf32>, vector<8x512xf32> -> vector<8x512xf32>
    %115 = arith.addf %110, %114 : vector<8x512xf32>
    %c22 = arith.constant 22 : index
    %c0_72 = arith.constant 0 : index
    %c0_73 = arith.constant 0 : index
    %116 = vector.load %arg4[%c22, %c0_72, %c0_73] : memref<27x8x8xf32, #tpu.memory_space<vmem>>, vector<1x8x8xf32>
    %117 = vector.shape_cast %116 : vector<1x8x8xf32> to vector<8x8xf32>
    %118 = vector.extract_strided_slice %4 {offsets = [0, 88], sizes = [8, 512], strides = [1, 1]} : vector<8x1024xf32> to vector<8x512xf32>
    %cst_74 = arith.constant dense<0.000000e+00> : vector<8x512xf32>
    %119 = tpu.matmul %117, %118, %cst_74 {dimension_numbers = #tpu.dot_dimension_numbers<[1], [0], [0], [1], [0, 0, 1, 1], [], []>} : vector<8x8xf32>, vector<8x512xf32>, vector<8x512xf32> -> vector<8x512xf32>
    %120 = arith.addf %115, %119 : vector<8x512xf32>
    %c23 = arith.constant 23 : index
    %c0_75 = arith.constant 0 : index
    %c0_76 = arith.constant 0 : index
    %121 = vector.load %arg4[%c23, %c0_75, %c0_76] : memref<27x8x8xf32, #tpu.memory_space<vmem>>, vector<1x8x8xf32>
    %122 = vector.shape_cast %121 : vector<1x8x8xf32> to vector<8x8xf32>
    %123 = vector.extract_strided_slice %4 {offsets = [0, 91], sizes = [8, 512], strides = [1, 1]} : vector<8x1024xf32> to vector<8x512xf32>
    %cst_77 = arith.constant dense<0.000000e+00> : vector<8x512xf32>
    %124 = tpu.matmul %122, %123, %cst_77 {dimension_numbers = #tpu.dot_dimension_numbers<[1], [0], [0], [1], [0, 0, 1, 1], [], []>} : vector<8x8xf32>, vector<8x512xf32>, vector<8x512xf32> -> vector<8x512xf32>
    %125 = arith.addf %120, %124 : vector<8x512xf32>
    %c24 = arith.constant 24 : index
    %c0_78 = arith.constant 0 : index
    %c0_79 = arith.constant 0 : index
    %126 = vector.load %arg4[%c24, %c0_78, %c0_79] : memref<27x8x8xf32, #tpu.memory_space<vmem>>, vector<1x8x8xf32>
    %127 = vector.shape_cast %126 : vector<1x8x8xf32> to vector<8x8xf32>
    %128 = vector.extract_strided_slice %4 {offsets = [0, 151], sizes = [8, 512], strides = [1, 1]} : vector<8x1024xf32> to vector<8x512xf32>
    %cst_80 = arith.constant dense<0.000000e+00> : vector<8x512xf32>
    %129 = tpu.matmul %127, %128, %cst_80 {dimension_numbers = #tpu.dot_dimension_numbers<[1], [0], [0], [1], [0, 0, 1, 1], [], []>} : vector<8x8xf32>, vector<8x512xf32>, vector<8x512xf32> -> vector<8x512xf32>
    %130 = arith.addf %125, %129 : vector<8x512xf32>
    %c25 = arith.constant 25 : index
    %c0_81 = arith.constant 0 : index
    %c0_82 = arith.constant 0 : index
    %131 = vector.load %arg4[%c25, %c0_81, %c0_82] : memref<27x8x8xf32, #tpu.memory_space<vmem>>, vector<1x8x8xf32>
    %132 = vector.shape_cast %131 : vector<1x8x8xf32> to vector<8x8xf32>
    %133 = vector.extract_strided_slice %4 {offsets = [0, 154], sizes = [8, 512], strides = [1, 1]} : vector<8x1024xf32> to vector<8x512xf32>
    %cst_83 = arith.constant dense<0.000000e+00> : vector<8x512xf32>
    %134 = tpu.matmul %132, %133, %cst_83 {dimension_numbers = #tpu.dot_dimension_numbers<[1], [0], [0], [1], [0, 0, 1, 1], [], []>} : vector<8x8xf32>, vector<8x512xf32>, vector<8x512xf32> -> vector<8x512xf32>
    %135 = arith.addf %130, %134 : vector<8x512xf32>
    %c26 = arith.constant 26 : index
    %c0_84 = arith.constant 0 : index
    %c0_85 = arith.constant 0 : index
    %136 = vector.load %arg4[%c26, %c0_84, %c0_85] : memref<27x8x8xf32, #tpu.memory_space<vmem>>, vector<1x8x8xf32>
    %137 = vector.shape_cast %136 : vector<1x8x8xf32> to vector<8x8xf32>
    %138 = vector.extract_strided_slice %4 {offsets = [0, 157], sizes = [8, 512], strides = [1, 1]} : vector<8x1024xf32> to vector<8x512xf32>
    %cst_86 = arith.constant dense<0.000000e+00> : vector<8x512xf32>
    %139 = tpu.matmul %137, %138, %cst_86 {dimension_numbers = #tpu.dot_dimension_numbers<[1], [0], [0], [1], [0, 0, 1, 1], [], []>} : vector<8x8xf32>, vector<8x512xf32>, vector<8x512xf32> -> vector<8x512xf32>
    %140 = arith.addf %135, %139 : vector<8x512xf32>
    %c0_87 = arith.constant 0 : index
    %c0_88 = arith.constant 0 : index
    %141 = vector.load %arg5[%c0_87, %c0_88] : memref<8x1xf32, #tpu.memory_space<vmem>>, vector<8x1xf32>
    %142 = vector.broadcast %141 : vector<8x1xf32> to vector<8x512xf32>
    %143 = arith.addf %140, %142 : vector<8x512xf32>
    %c0_89 = arith.constant 0 : index
    %c0_90 = arith.constant 0 : index
    %c0_91 = arith.constant 0 : index
    %144 = vector.load %arg6[%c0_89, %c0_90, %c0_91] : memref<1x8x512xf32, #tpu.memory_space<vmem>>, vector<1x8x512xf32>
    %145 = vector.shape_cast %144 : vector<1x8x512xf32> to vector<8x512xf32>
    %146 = vector.shape_cast %143 : vector<8x512xf32> to vector<1x8x512xf32>
    tpu.vector_store %arg6[%c0_89, %c0_90, %c0_91], %146 {strides = array<i32>} : memref<1x8x512xf32, #tpu.memory_space<vmem>>, vector<1x8x512xf32>,
    return
  }
  func.func @transform_0(%arg0: i32, %arg1: i32) -> (i32, i32, i32) {
    %c0_i32 = arith.constant 0 : i32
    %0 = arith.addi %arg1, %c0_i32 : i32
    %c0_i32_0 = arith.constant 0 : i32
    %c0_i32_1 = arith.constant 0 : i32
    return %arg0, %c0_i32_0, %0 : i32, i32, i32
  }
  func.func @transform_1(%arg0: i32, %arg1: i32) -> (i32, i32, i32) {
    %c1_i32 = arith.constant 1 : i32
    %0 = arith.addi %arg1, %c1_i32 : i32
    %c0_i32 = arith.constant 0 : i32
    %c0_i32_0 = arith.constant 0 : i32
    return %arg0, %c0_i32, %0 : i32, i32, i32
  }
  func.func @transform_2(%arg0: i32, %arg1: i32) -> (i32, i32, i32) {
    %c0_i32 = arith.constant 0 : i32
    %c0_i32_0 = arith.constant 0 : i32
    %c0_i32_1 = arith.constant 0 : i32
    %c0_i32_2 = arith.constant 0 : i32
    return %c0_i32, %c0_i32_0, %c0_i32_1 : i32, i32, i32
  }
  func.func @transform_3(%arg0: i32, %arg1: i32) -> (i32, i32) {
    %c0_i32 = arith.constant 0 : i32
    %c0_i32_0 = arith.constant 0 : i32
    %c0_i32_1 = arith.constant 0 : i32
    return %c0_i32, %c0_i32_0 : i32, i32
  }
  func.func @transform_4(%arg0: i32, %arg1: i32) -> (i32, i32, i32) {
    %c0_i32 = arith.constant 0 : i32
    %c0_i32_0 = arith.constant 0 : i32
    return %arg0, %c0_i32, %arg1 : i32, i32, i32
  }
}

module attributes {stable_mosaic.version = 11 : i64} {
  func.func @_aspp_kernel(%arg0: i32, %arg1: i32, %arg2: memref<1x8x512xf32, #tpu.memory_space<vmem>>, %arg3: memref<1x8x512xf32, #tpu.memory_space<vmem>>, %arg4: memref<27x8x8xf32, #tpu.memory_space<vmem>>, %arg5: memref<8x1xf32, #tpu.memory_space<vmem>>, %arg6: memref<1x8x512xf32, #tpu.memory_space<vmem>>) attributes {dimension_semantics = [#tpu.dimension_semantics<parallel>, #tpu.dimension_semantics<parallel>], iteration_bounds = array<i64: 2, 1>, scalar_prefetch = 0 : i64, scratch_operands = 0 : i64, tpu.core_type = #tpu.core_type<tc>, window_params = [{transform_indices = @transform_0, window_bounds = array<i64: 1, 8, 512>}, {transform_indices = @transform_1, window_bounds = array<i64: 1, 8, 512>}, {pipeline_mode = #tpu.pipeline_mode<synchronous>, transform_indices = @transform_2, window_bounds = array<i64: 27, 8, 8>}, {pipeline_mode = #tpu.pipeline_mode<synchronous>, transform_indices = @transform_3, window_bounds = array<i64: 8, 1>}, {transform_indices = @transform_4, window_bounds = array<i64: 1, 8, 512>}]} {
    %c0 = arith.constant 0 : index
    %c0_0 = arith.constant 0 : index
    %c0_1 = arith.constant 0 : index
    %0 = vector.load %arg2[%c0, %c0_0, %c0_1] : memref<1x8x512xf32, #tpu.memory_space<vmem>>, vector<1x8x512xf32>
    %1 = vector.shape_cast %0 : vector<1x8x512xf32> to vector<8x512xf32>
    %c0_2 = arith.constant 0 : index
    %c0_3 = arith.constant 0 : index
    %c0_4 = arith.constant 0 : index
    %2 = vector.load %arg3[%c0_2, %c0_3, %c0_4] : memref<1x8x512xf32, #tpu.memory_space<vmem>>, vector<1x8x512xf32>
    %3 = vector.shape_cast %2 : vector<1x8x512xf32> to vector<8x512xf32>
    %4 = tpu.concatenate %1, %3 in 1 : vector<8x512xf32>, vector<8x512xf32> -> vector<8x1024xf32>
    %cst = arith.constant 0.000000e+00 : f32
    %5 = vector.broadcast %cst : f32 to vector<8x512xf32>
    %c0_5 = arith.constant 0 : index
    %c0_6 = arith.constant 0 : index
    %c0_7 = arith.constant 0 : index
    %6 = vector.load %arg4[%c0_5, %c0_6, %c0_7] : memref<27x8x8xf32, #tpu.memory_space<vmem>>, vector<1x8x8xf32>
    %7 = vector.shape_cast %6 : vector<1x8x8xf32> to vector<8x8xf32>
    %8 = vector.extract_strided_slice %4 {offsets = [0, 65], sizes = [8, 512], strides = [1, 1]} : vector<8x1024xf32> to vector<8x512xf32>
    %cst_8 = arith.constant dense<0.000000e+00> : vector<8x512xf32>
    %9 = tpu.matmul %7, %8, %cst_8 {dimension_numbers = #tpu.dot_dimension_numbers<[1], [0], [0], [1], [0, 0, 1, 1], [], []>} : vector<8x8xf32>, vector<8x512xf32>, vector<8x512xf32> -> vector<8x512xf32>
    %10 = arith.addf %5, %9 : vector<8x512xf32>
    %c1 = arith.constant 1 : index
    %c0_9 = arith.constant 0 : index
    %c0_10 = arith.constant 0 : index
    %11 = vector.load %arg4[%c1, %c0_9, %c0_10] : memref<27x8x8xf32, #tpu.memory_space<vmem>>, vector<1x8x8xf32>
    %12 = vector.shape_cast %11 : vector<1x8x8xf32> to vector<8x8xf32>
    %13 = vector.extract_strided_slice %4 {offsets = [0, 66], sizes = [8, 512], strides = [1, 1]} : vector<8x1024xf32> to vector<8x512xf32>
    %cst_11 = arith.constant dense<0.000000e+00> : vector<8x512xf32>
    %14 = tpu.matmul %12, %13, %cst_11 {dimension_numbers = #tpu.dot_dimension_numbers<[1], [0], [0], [1], [0, 0, 1, 1], [], []>} : vector<8x8xf32>, vector<8x512xf32>, vector<8x512xf32> -> vector<8x512xf32>
    %15 = arith.addf %10, %14 : vector<8x512xf32>
    %c2 = arith.constant 2 : index
    %c0_12 = arith.constant 0 : index
    %c0_13 = arith.constant 0 : index
    %16 = vector.load %arg4[%c2, %c0_12, %c0_13] : memref<27x8x8xf32, #tpu.memory_space<vmem>>, vector<1x8x8xf32>
    %17 = vector.shape_cast %16 : vector<1x8x8xf32> to vector<8x8xf32>
    %18 = vector.extract_strided_slice %4 {offsets = [0, 67], sizes = [8, 512], strides = [1, 1]} : vector<8x1024xf32> to vector<8x512xf32>
    %cst_14 = arith.constant dense<0.000000e+00> : vector<8x512xf32>
    %19 = tpu.matmul %17, %18, %cst_14 {dimension_numbers = #tpu.dot_dimension_numbers<[1], [0], [0], [1], [0, 0, 1, 1], [], []>} : vector<8x8xf32>, vector<8x512xf32>, vector<8x512xf32> -> vector<8x512xf32>
    %20 = arith.addf %15, %19 : vector<8x512xf32>
    %c3 = arith.constant 3 : index
    %c0_15 = arith.constant 0 : index
    %c0_16 = arith.constant 0 : index
    %21 = vector.load %arg4[%c3, %c0_15, %c0_16] : memref<27x8x8xf32, #tpu.memory_space<vmem>>, vector<1x8x8xf32>
    %22 = vector.shape_cast %21 : vector<1x8x8xf32> to vector<8x8xf32>
    %23 = vector.extract_strided_slice %4 {offsets = [0, 87], sizes = [8, 512], strides = [1, 1]} : vector<8x1024xf32> to vector<8x512xf32>
    %cst_17 = arith.constant dense<0.000000e+00> : vector<8x512xf32>
    %24 = tpu.matmul %22, %23, %cst_17 {dimension_numbers = #tpu.dot_dimension_numbers<[1], [0], [0], [1], [0, 0, 1, 1], [], []>} : vector<8x8xf32>, vector<8x512xf32>, vector<8x512xf32> -> vector<8x512xf32>
    %25 = arith.addf %20, %24 : vector<8x512xf32>
    %c4 = arith.constant 4 : index
    %c0_18 = arith.constant 0 : index
    %c0_19 = arith.constant 0 : index
    %26 = vector.load %arg4[%c4, %c0_18, %c0_19] : memref<27x8x8xf32, #tpu.memory_space<vmem>>, vector<1x8x8xf32>
    %27 = vector.shape_cast %26 : vector<1x8x8xf32> to vector<8x8xf32>
    %28 = vector.extract_strided_slice %4 {offsets = [0, 88], sizes = [8, 512], strides = [1, 1]} : vector<8x1024xf32> to vector<8x512xf32>
    %cst_20 = arith.constant dense<0.000000e+00> : vector<8x512xf32>
    %29 = tpu.matmul %27, %28, %cst_20 {dimension_numbers = #tpu.dot_dimension_numbers<[1], [0], [0], [1], [0, 0, 1, 1], [], []>} : vector<8x8xf32>, vector<8x512xf32>, vector<8x512xf32> -> vector<8x512xf32>
    %30 = arith.addf %25, %29 : vector<8x512xf32>
    %c5 = arith.constant 5 : index
    %c0_21 = arith.constant 0 : index
    %c0_22 = arith.constant 0 : index
    %31 = vector.load %arg4[%c5, %c0_21, %c0_22] : memref<27x8x8xf32, #tpu.memory_space<vmem>>, vector<1x8x8xf32>
    %32 = vector.shape_cast %31 : vector<1x8x8xf32> to vector<8x8xf32>
    %33 = vector.extract_strided_slice %4 {offsets = [0, 89], sizes = [8, 512], strides = [1, 1]} : vector<8x1024xf32> to vector<8x512xf32>
    %cst_23 = arith.constant dense<0.000000e+00> : vector<8x512xf32>
    %34 = tpu.matmul %32, %33, %cst_23 {dimension_numbers = #tpu.dot_dimension_numbers<[1], [0], [0], [1], [0, 0, 1, 1], [], []>} : vector<8x8xf32>, vector<8x512xf32>, vector<8x512xf32> -> vector<8x512xf32>
    %35 = arith.addf %30, %34 : vector<8x512xf32>
    %c6 = arith.constant 6 : index
    %c0_24 = arith.constant 0 : index
    %c0_25 = arith.constant 0 : index
    %36 = vector.load %arg4[%c6, %c0_24, %c0_25] : memref<27x8x8xf32, #tpu.memory_space<vmem>>, vector<1x8x8xf32>
    %37 = vector.shape_cast %36 : vector<1x8x8xf32> to vector<8x8xf32>
    %38 = vector.extract_strided_slice %4 {offsets = [0, 109], sizes = [8, 512], strides = [1, 1]} : vector<8x1024xf32> to vector<8x512xf32>
    %cst_26 = arith.constant dense<0.000000e+00> : vector<8x512xf32>
    %39 = tpu.matmul %37, %38, %cst_26 {dimension_numbers = #tpu.dot_dimension_numbers<[1], [0], [0], [1], [0, 0, 1, 1], [], []>} : vector<8x8xf32>, vector<8x512xf32>, vector<8x512xf32> -> vector<8x512xf32>
    %40 = arith.addf %35, %39 : vector<8x512xf32>
    %c7 = arith.constant 7 : index
    %c0_27 = arith.constant 0 : index
    %c0_28 = arith.constant 0 : index
    %41 = vector.load %arg4[%c7, %c0_27, %c0_28] : memref<27x8x8xf32, #tpu.memory_space<vmem>>, vector<1x8x8xf32>
    %42 = vector.shape_cast %41 : vector<1x8x8xf32> to vector<8x8xf32>
    %43 = vector.extract_strided_slice %4 {offsets = [0, 110], sizes = [8, 512], strides = [1, 1]} : vector<8x1024xf32> to vector<8x512xf32>
    %cst_29 = arith.constant dense<0.000000e+00> : vector<8x512xf32>
    %44 = tpu.matmul %42, %43, %cst_29 {dimension_numbers = #tpu.dot_dimension_numbers<[1], [0], [0], [1], [0, 0, 1, 1], [], []>} : vector<8x8xf32>, vector<8x512xf32>, vector<8x512xf32> -> vector<8x512xf32>
    %45 = arith.addf %40, %44 : vector<8x512xf32>
    %c8 = arith.constant 8 : index
    %c0_30 = arith.constant 0 : index
    %c0_31 = arith.constant 0 : index
    %46 = vector.load %arg4[%c8, %c0_30, %c0_31] : memref<27x8x8xf32, #tpu.memory_space<vmem>>, vector<1x8x8xf32>
    %47 = vector.shape_cast %46 : vector<1x8x8xf32> to vector<8x8xf32>
    %48 = vector.extract_strided_slice %4 {offsets = [0, 111], sizes = [8, 512], strides = [1, 1]} : vector<8x1024xf32> to vector<8x512xf32>
    %cst_32 = arith.constant dense<0.000000e+00> : vector<8x512xf32>
    %49 = tpu.matmul %47, %48, %cst_32 {dimension_numbers = #tpu.dot_dimension_numbers<[1], [0], [0], [1], [0, 0, 1, 1], [], []>} : vector<8x8xf32>, vector<8x512xf32>, vector<8x512xf32> -> vector<8x512xf32>
    %50 = arith.addf %45, %49 : vector<8x512xf32>
    %c9 = arith.constant 9 : index
    %c0_33 = arith.constant 0 : index
    %c0_34 = arith.constant 0 : index
    %51 = vector.load %arg4[%c9, %c0_33, %c0_34] : memref<27x8x8xf32, #tpu.memory_space<vmem>>, vector<1x8x8xf32>
    %52 = vector.shape_cast %51 : vector<1x8x8xf32> to vector<8x8xf32>
    %53 = vector.extract_strided_slice %4 {offsets = [0, 42], sizes = [8, 512], strides = [1, 1]} : vector<8x1024xf32> to vector<8x512xf32>
    %cst_35 = arith.constant dense<0.000000e+00> : vector<8x512xf32>
    %54 = tpu.matmul %52, %53, %cst_35 {dimension_numbers = #tpu.dot_dimension_numbers<[1], [0], [0], [1], [0, 0, 1, 1], [], []>} : vector<8x8xf32>, vector<8x512xf32>, vector<8x512xf32> -> vector<8x512xf32>
    %55 = arith.addf %50, %54 : vector<8x512xf32>
    %c10 = arith.constant 10 : index
    %c0_36 = arith.constant 0 : index
    %c0_37 = arith.constant 0 : index
    %56 = vector.load %arg4[%c10, %c0_36, %c0_37] : memref<27x8x8xf32, #tpu.memory_space<vmem>>, vector<1x8x8xf32>
    %57 = vector.shape_cast %56 : vector<1x8x8xf32> to vector<8x8xf32>
    %58 = vector.extract_strided_slice %4 {offsets = [0, 44], sizes = [8, 512], strides = [1, 1]} : vector<8x1024xf32> to vector<8x512xf32>
    %cst_38 = arith.constant dense<0.000000e+00> : vector<8x512xf32>
    %59 = tpu.matmul %57, %58, %cst_38 {dimension_numbers = #tpu.dot_dimension_numbers<[1], [0], [0], [1], [0, 0, 1, 1], [], []>} : vector<8x8xf32>, vector<8x512xf32>, vector<8x512xf32> -> vector<8x512xf32>
    %60 = arith.addf %55, %59 : vector<8x512xf32>
    %c11 = arith.constant 11 : index
    %c0_39 = arith.constant 0 : index
    %c0_40 = arith.constant 0 : index
    %61 = vector.load %arg4[%c11, %c0_39, %c0_40] : memref<27x8x8xf32, #tpu.memory_space<vmem>>, vector<1x8x8xf32>
    %62 = vector.shape_cast %61 : vector<1x8x8xf32> to vector<8x8xf32>
    %63 = vector.extract_strided_slice %4 {offsets = [0, 46], sizes = [8, 512], strides = [1, 1]} : vector<8x1024xf32> to vector<8x512xf32>
    %cst_41 = arith.constant dense<0.000000e+00> : vector<8x512xf32>
    %64 = tpu.matmul %62, %63, %cst_41 {dimension_numbers = #tpu.dot_dimension_numbers<[1], [0], [0], [1], [0, 0, 1, 1], [], []>} : vector<8x8xf32>, vector<8x512xf32>, vector<8x512xf32> -> vector<8x512xf32>
    %65 = arith.addf %60, %64 : vector<8x512xf32>
    %c12 = arith.constant 12 : index
    %c0_42 = arith.constant 0 : index
    %c0_43 = arith.constant 0 : index
    %66 = vector.load %arg4[%c12, %c0_42, %c0_43] : memref<27x8x8xf32, #tpu.memory_space<vmem>>, vector<1x8x8xf32>
    %67 = vector.shape_cast %66 : vector<1x8x8xf32> to vector<8x8xf32>
    %68 = vector.extract_strided_slice %4 {offsets = [0, 86], sizes = [8, 512], strides = [1, 1]} : vector<8x1024xf32> to vector<8x512xf32>
    %cst_44 = arith.constant dense<0.000000e+00> : vector<8x512xf32>
    %69 = tpu.matmul %67, %68, %cst_44 {dimension_numbers = #tpu.dot_dimension_numbers<[1], [0], [0], [1], [0, 0, 1, 1], [], []>} : vector<8x8xf32>, vector<8x512xf32>, vector<8x512xf32> -> vector<8x512xf32>
    %70 = arith.addf %65, %69 : vector<8x512xf32>
    %c13 = arith.constant 13 : index
    %c0_45 = arith.constant 0 : index
    %c0_46 = arith.constant 0 : index
    %71 = vector.load %arg4[%c13, %c0_45, %c0_46] : memref<27x8x8xf32, #tpu.memory_space<vmem>>, vector<1x8x8xf32>
    %72 = vector.shape_cast %71 : vector<1x8x8xf32> to vector<8x8xf32>
    %73 = vector.extract_strided_slice %4 {offsets = [0, 88], sizes = [8, 512], strides = [1, 1]} : vector<8x1024xf32> to vector<8x512xf32>
    %cst_47 = arith.constant dense<0.000000e+00> : vector<8x512xf32>
    %74 = tpu.matmul %72, %73, %cst_47 {dimension_numbers = #tpu.dot_dimension_numbers<[1], [0], [0], [1], [0, 0, 1, 1], [], []>} : vector<8x8xf32>, vector<8x512xf32>, vector<8x512xf32> -> vector<8x512xf32>
    %75 = arith.addf %70, %74 : vector<8x512xf32>
    %c14 = arith.constant 14 : index
    %c0_48 = arith.constant 0 : index
    %c0_49 = arith.constant 0 : index
    %76 = vector.load %arg4[%c14, %c0_48, %c0_49] : memref<27x8x8xf32, #tpu.memory_space<vmem>>, vector<1x8x8xf32>
    %77 = vector.shape_cast %76 : vector<1x8x8xf32> to vector<8x8xf32>
    %78 = vector.extract_strided_slice %4 {offsets = [0, 90], sizes = [8, 512], strides = [1, 1]} : vector<8x1024xf32> to vector<8x512xf32>
    %cst_50 = arith.constant dense<0.000000e+00> : vector<8x512xf32>
    %79 = tpu.matmul %77, %78, %cst_50 {dimension_numbers = #tpu.dot_dimension_numbers<[1], [0], [0], [1], [0, 0, 1, 1], [], []>} : vector<8x8xf32>, vector<8x512xf32>, vector<8x512xf32> -> vector<8x512xf32>
    %80 = arith.addf %75, %79 : vector<8x512xf32>
    %c15 = arith.constant 15 : index
    %c0_51 = arith.constant 0 : index
    %c0_52 = arith.constant 0 : index
    %81 = vector.load %arg4[%c15, %c0_51, %c0_52] : memref<27x8x8xf32, #tpu.memory_space<vmem>>, vector<1x8x8xf32>
    %82 = vector.shape_cast %81 : vector<1x8x8xf32> to vector<8x8xf32>
    %83 = vector.extract_strided_slice %4 {offsets = [0, 130], sizes = [8, 512], strides = [1, 1]} : vector<8x1024xf32> to vector<8x512xf32>
    %cst_53 = arith.constant dense<0.000000e+00> : vector<8x512xf32>
    %84 = tpu.matmul %82, %83, %cst_53 {dimension_numbers = #tpu.dot_dimension_numbers<[1], [0], [0], [1], [0, 0, 1, 1], [], []>} : vector<8x8xf32>, vector<8x512xf32>, vector<8x512xf32> -> vector<8x512xf32>
    %85 = arith.addf %80, %84 : vector<8x512xf32>
    %c16 = arith.constant 16 : index
    %c0_54 = arith.constant 0 : index
    %c0_55 = arith.constant 0 : index
    %86 = vector.load %arg4[%c16, %c0_54, %c0_55] : memref<27x8x8xf32, #tpu.memory_space<vmem>>, vector<1x8x8xf32>
    %87 = vector.shape_cast %86 : vector<1x8x8xf32> to vector<8x8xf32>
    %88 = vector.extract_strided_slice %4 {offsets = [0, 132], sizes = [8, 512], strides = [1, 1]} : vector<8x1024xf32> to vector<8x512xf32>
    %cst_56 = arith.constant dense<0.000000e+00> : vector<8x512xf32>
    %89 = tpu.matmul %87, %88, %cst_56 {dimension_numbers = #tpu.dot_dimension_numbers<[1], [0], [0], [1], [0, 0, 1, 1], [], []>} : vector<8x8xf32>, vector<8x512xf32>, vector<8x512xf32> -> vector<8x512xf32>
    %90 = arith.addf %85, %89 : vector<8x512xf32>
    %c17 = arith.constant 17 : index
    %c0_57 = arith.constant 0 : index
    %c0_58 = arith.constant 0 : index
    %91 = vector.load %arg4[%c17, %c0_57, %c0_58] : memref<27x8x8xf32, #tpu.memory_space<vmem>>, vector<1x8x8xf32>
    %92 = vector.shape_cast %91 : vector<1x8x8xf32> to vector<8x8xf32>
    %93 = vector.extract_strided_slice %4 {offsets = [0, 134], sizes = [8, 512], strides = [1, 1]} : vector<8x1024xf32> to vector<8x512xf32>
    %cst_59 = arith.constant dense<0.000000e+00> : vector<8x512xf32>
    %94 = tpu.matmul %92, %93, %cst_59 {dimension_numbers = #tpu.dot_dimension_numbers<[1], [0], [0], [1], [0, 0, 1, 1], [], []>} : vector<8x8xf32>, vector<8x512xf32>, vector<8x512xf32> -> vector<8x512xf32>
    %95 = arith.addf %90, %94 : vector<8x512xf32>
    %c18 = arith.constant 18 : index
    %c0_60 = arith.constant 0 : index
    %c0_61 = arith.constant 0 : index
    %96 = vector.load %arg4[%c18, %c0_60, %c0_61] : memref<27x8x8xf32, #tpu.memory_space<vmem>>, vector<1x8x8xf32>
    %97 = vector.shape_cast %96 : vector<1x8x8xf32> to vector<8x8xf32>
    %98 = vector.extract_strided_slice %4 {offsets = [0, 19], sizes = [8, 512], strides = [1, 1]} : vector<8x1024xf32> to vector<8x512xf32>
    %cst_62 = arith.constant dense<0.000000e+00> : vector<8x512xf32>
    %99 = tpu.matmul %97, %98, %cst_62 {dimension_numbers = #tpu.dot_dimension_numbers<[1], [0], [0], [1], [0, 0, 1, 1], [], []>} : vector<8x8xf32>, vector<8x512xf32>, vector<8x512xf32> -> vector<8x512xf32>
    %100 = arith.addf %95, %99 : vector<8x512xf32>
    %c19 = arith.constant 19 : index
    %c0_63 = arith.constant 0 : index
    %c0_64 = arith.constant 0 : index
    %101 = vector.load %arg4[%c19, %c0_63, %c0_64] : memref<27x8x8xf32, #tpu.memory_space<vmem>>, vector<1x8x8xf32>
    %102 = vector.shape_cast %101 : vector<1x8x8xf32> to vector<8x8xf32>
    %103 = vector.extract_strided_slice %4 {offsets = [0, 22], sizes = [8, 512], strides = [1, 1]} : vector<8x1024xf32> to vector<8x512xf32>
    %cst_65 = arith.constant dense<0.000000e+00> : vector<8x512xf32>
    %104 = tpu.matmul %102, %103, %cst_65 {dimension_numbers = #tpu.dot_dimension_numbers<[1], [0], [0], [1], [0, 0, 1, 1], [], []>} : vector<8x8xf32>, vector<8x512xf32>, vector<8x512xf32> -> vector<8x512xf32>
    %105 = arith.addf %100, %104 : vector<8x512xf32>
    %c20 = arith.constant 20 : index
    %c0_66 = arith.constant 0 : index
    %c0_67 = arith.constant 0 : index
    %106 = vector.load %arg4[%c20, %c0_66, %c0_67] : memref<27x8x8xf32, #tpu.memory_space<vmem>>, vector<1x8x8xf32>
    %107 = vector.shape_cast %106 : vector<1x8x8xf32> to vector<8x8xf32>
    %108 = vector.extract_strided_slice %4 {offsets = [0, 25], sizes = [8, 512], strides = [1, 1]} : vector<8x1024xf32> to vector<8x512xf32>
    %cst_68 = arith.constant dense<0.000000e+00> : vector<8x512xf32>
    %109 = tpu.matmul %107, %108, %cst_68 {dimension_numbers = #tpu.dot_dimension_numbers<[1], [0], [0], [1], [0, 0, 1, 1], [], []>} : vector<8x8xf32>, vector<8x512xf32>, vector<8x512xf32> -> vector<8x512xf32>
    %110 = arith.addf %105, %109 : vector<8x512xf32>
    %c21 = arith.constant 21 : index
    %c0_69 = arith.constant 0 : index
    %c0_70 = arith.constant 0 : index
    %111 = vector.load %arg4[%c21, %c0_69, %c0_70] : memref<27x8x8xf32, #tpu.memory_space<vmem>>, vector<1x8x8xf32>
    %112 = vector.shape_cast %111 : vector<1x8x8xf32> to vector<8x8xf32>
    %113 = vector.extract_strided_slice %4 {offsets = [0, 85], sizes = [8, 512], strides = [1, 1]} : vector<8x1024xf32> to vector<8x512xf32>
    %cst_71 = arith.constant dense<0.000000e+00> : vector<8x512xf32>
    %114 = tpu.matmul %112, %113, %cst_71 {dimension_numbers = #tpu.dot_dimension_numbers<[1], [0], [0], [1], [0, 0, 1, 1], [], []>} : vector<8x8xf32>, vector<8x512xf32>, vector<8x512xf32> -> vector<8x512xf32>
    %115 = arith.addf %110, %114 : vector<8x512xf32>
    %c22 = arith.constant 22 : index
    %c0_72 = arith.constant 0 : index
    %c0_73 = arith.constant 0 : index
    %116 = vector.load %arg4[%c22, %c0_72, %c0_73] : memref<27x8x8xf32, #tpu.memory_space<vmem>>, vector<1x8x8xf32>
    %117 = vector.shape_cast %116 : vector<1x8x8xf32> to vector<8x8xf32>
    %118 = vector.extract_strided_slice %4 {offsets = [0, 88], sizes = [8, 512], strides = [1, 1]} : vector<8x1024xf32> to vector<8x512xf32>
    %cst_74 = arith.constant dense<0.000000e+00> : vector<8x512xf32>
    %119 = tpu.matmul %117, %118, %cst_74 {dimension_numbers = #tpu.dot_dimension_numbers<[1], [0], [0], [1], [0, 0, 1, 1], [], []>} : vector<8x8xf32>, vector<8x512xf32>, vector<8x512xf32> -> vector<8x512xf32>
    %120 = arith.addf %115, %119 : vector<8x512xf32>
    %c23 = arith.constant 23 : index
    %c0_75 = arith.constant 0 : index
    %c0_76 = arith.constant 0 : index
    %121 = vector.load %arg4[%c23, %c0_75, %c0_76] : memref<27x8x8xf32, #tpu.memory_space<vmem>>, vector<1x8x8xf32>
    %122 = vector.shape_cast %121 : vector<1x8x8xf32> to vector<8x8xf32>
    %123 = vector.extract_strided_slice %4 {offsets = [0, 91], sizes = [8, 512], strides = [1, 1]} : vector<8x1024xf32> to vector<8x512xf32>
    %cst_77 = arith.constant dense<0.000000e+00> : vector<8x512xf32>
    %124 = tpu.matmul %122, %123, %cst_77 {dimension_numbers = #tpu.dot_dimension_numbers<[1], [0], [0], [1], [0, 0, 1, 1], [], []>} : vector<8x8xf32>, vector<8x512xf32>, vector<8x512xf32> -> vector<8x512xf32>
    %125 = arith.addf %120, %124 : vector<8x512xf32>
    %c24 = arith.constant 24 : index
    %c0_78 = arith.constant 0 : index
    %c0_79 = arith.constant 0 : index
    %126 = vector.load %arg4[%c24, %c0_78, %c0_79] : memref<27x8x8xf32, #tpu.memory_space<vmem>>, vector<1x8x8xf32>
    %127 = vector.shape_cast %126 : vector<1x8x8xf32> to vector<8x8xf32>
    %128 = vector.extract_strided_slice %4 {offsets = [0, 151], sizes = [8, 512], strides = [1, 1]} : vector<8x1024xf32> to vector<8x512xf32>
    %cst_80 = arith.constant dense<0.000000e+00> : vector<8x512xf32>
    %129 = tpu.matmul %127, %128, %cst_80 {dimension_numbers = #tpu.dot_dimension_numbers<[1], [0], [0], [1], [0, 0, 1, 1], [], []>} : vector<8x8xf32>, vector<8x512xf32>, vector<8x512xf32> -> vector<8x512xf32>
    %130 = arith.addf %125, %129 : vector<8x512xf32>
    %c25 = arith.constant 25 : index
    %c0_81 = arith.constant 0 : index
    %c0_82 = arith.constant 0 : index
    %131 = vector.load %arg4[%c25, %c0_81, %c0_82] : memref<27x8x8xf32, #tpu.memory_space<vmem>>, vector<1x8x8xf32>
    %132 = vector.shape_cast %131 : vector<1x8x8xf32> to vector<8x8xf32>
    %133 = vector.extract_strided_slice %4 {offsets = [0, 154], sizes = [8, 512], strides = [1, 1]} : vector<8x1024xf32> to vector<8x512xf32>
    %cst_83 = arith.constant dense<0.000000e+00> : vector<8x512xf32>
    %134 = tpu.matmul %132, %133, %cst_83 {dimension_numbers = #tpu.dot_dimension_numbers<[1], [0], [0], [1], [0, 0, 1, 1], [], []>} : vector<8x8xf32>, vector<8x512xf32>, vector<8x512xf32> -> vector<8x512xf32>
    %135 = arith.addf %130, %134 : vector<8x512xf32>
    %c26 = arith.constant 26 : index
    %c0_84 = arith.constant 0 : index
    %c0_85 = arith.constant 0 : index
    %136 = vector.load %arg4[%c26, %c0_84, %c0_85] : memref<27x8x8xf32, #tpu.memory_space<vmem>>, vector<1x8x8xf32>
    %137 = vector.shape_cast %136 : vector<1x8x8xf32> to vector<8x8xf32>
    %138 = vector.extract_strided_slice %4 {offsets = [0, 157], sizes = [8, 512], strides = [1, 1]} : vector<8x1024xf32> to vector<8x512xf32>
    %cst_86 = arith.constant dense<0.000000e+00> : vector<8x512xf32>
    %139 = tpu.matmul %137, %138, %cst_86 {dimension_numbers = #tpu.dot_dimension_numbers<[1], [0], [0], [1], [0, 0, 1, 1], [], []>} : vector<8x8xf32>, vector<8x512xf32>, vector<8x512xf32> -> vector<8x512xf32>
    %140 = arith.addf %135, %139 : vector<8x512xf32>
    %c0_87 = arith.constant 0 : index
    %c0_88 = arith.constant 0 : index
    %141 = vector.load %arg5[%c0_87, %c0_88] : memref<8x1xf32, #tpu.memory_space<vmem>>, vector<8x1xf32>
    %142 = vector.broadcast %141 : vector<8x1xf32> to vector<8x512xf32>
    %143 = arith.addf %140, %142 : vector<8x512xf32>
    %c0_89 = arith.constant 0 : index
    %c0_90 = arith.constant 0 : index
    %c0_91 = arith.constant 0 : index
    %144 = vector.load %arg6[%c0_89, %c0_90, %c0_91] : memref<1x8x512xf32, #tpu.memory_space<vmem>>, vector<1x8x512xf32>
    %145 = vector.shape_cast %144 : vector<1x8x512xf32> to vector<8x512xf32>
    %146 = vector.shape_cast %143 : vector<8x512xf32> to vector<1x8x512xf32>
    tpu.vector_store %arg6[%c0_89, %c0_90, %c0_91], %146 {strides = array<i32>} : memref<1x8x512xf32, #tpu.memory_space<vmem>>, vector<1x8x512xf32>,
    return
  }
  func.func @transform_0(%arg0: i32, %arg1: i32) -> (i32, i32, i32) {
    %c0_i32 = arith.constant 0 : i32
    %0 = arith.addi %arg1, %c0_i32 : i32
    %c0_i32_0 = arith.constant 0 : i32
    %c0_i32_1 = arith.constant 0 : i32
    return %arg0, %c0_i32_0, %0 : i32, i32, i32
  }
  func.func @transform_1(%arg0: i32, %arg1: i32) -> (i32, i32, i32) {
    %c1_i32 = arith.constant 1 : i32
    %0 = arith.addi %arg1, %c1_i32 : i32
    %c0_i32 = arith.constant 0 : i32
    %c0_i32_0 = arith.constant 0 : i32
    return %arg0, %c0_i32, %0 : i32, i32, i32
  }
  func.func @transform_2(%arg0: i32, %arg1: i32) -> (i32, i32, i32) {
    %c0_i32 = arith.constant 0 : i32
    %c0_i32_0 = arith.constant 0 : i32
    %c0_i32_1 = arith.constant 0 : i32
    %c0_i32_2 = arith.constant 0 : i32
    return %c0_i32, %c0_i32_0, %c0_i32_1 : i32, i32, i32
  }
  func.func @transform_3(%arg0: i32, %arg1: i32) -> (i32, i32) {
    %c0_i32 = arith.constant 0 : i32
    %c0_i32_0 = arith.constant 0 : i32
    %c0_i32_1 = arith.constant 0 : i32
    return %c0_i32, %c0_i32_0 : i32, i32
  }
  func.func @transform_4(%arg0: i32, %arg1: i32) -> (i32, i32, i32) {
    %c0_i32 = arith.constant 0 : i32
    %c0_i32_0 = arith.constant 0 : i32
    return %arg0, %c0_i32, %arg1 : i32, i32, i32
  }
}

</mosaic_0001>

<bundles_post_ra>
// kernel: tpu_custom_call.1
= control target key start
LH: loop header
LB: loop body
LE: loop exit
PB: predicated region body
PF: predicated region fallthrough
CT: control target
= control target key end

     0   :  { %9 = vsyncpa [#allocation3], 0  ;;  %s5924_s0 = inlined_call_operand.vmem [shape: f32[2,8,1024], index: 0, kind: input, shape index: {}]   ;;  %s5925_s1 = inlined_call_operand.vmem [shape: f32[2,8,1024], index: 1, kind: input, shape index: {}]   ;;  %s5926_s2 = inlined_call_operand.vmem [shape: f32[27,8,8], index: 2, kind: input, shape index: {}]   ;;  %s5927_s3 = inlined_call_operand.vmem [shape: f32[8,1], index: 3, kind: input, shape index: {}]   ;;  %s5928_s4 = inlined_call_operand.hbm [shape: f32[2,8,512], index: 4, kind: output, shape index: {}]  }
   0x1   :  { %11 = vsyncpa [#allocation3 + $0x1], 0  ;;  %s5372_s15 = smov 0   ;;  %s5374_s16 = smov 0  }
   0x2   :  { %s5376_s17 = smov 0   ;;  %s5378_s18 = smov 0  }
   0x3   :  { %s5380_s19 = smov 0   ;;  %s5382_s20 = smov 0  }
   0x4 LB: > { %s4951_s21 = sadd.s32 4294967295, %s5317_s20   ;;  %s4952_s22 = sadd.s32 4294967294, %s5317_s20   ;;  %s5317_s20 = sphi %s5382_s20, %s17_s20   ;;  %s5313_s19 = sphi %s5380_s19, %s5935_s19   ;;  %s5309_s18 = sphi %s5378_s18, %s5934_s18   ;;  %s5305_s17 = sphi %s5376_s17, %s5933_s17   ;;  %s5301_s16 = sphi %s5374_s16, %s5932_s16   ;;  %s5297_s15 = sphi %s5372_s15, %s5931_s15  }
   0x5   : > { %s29_s23 = sadd.s32 1, %s5313_s19  ;;  %s138_s24 = sadd.s32 1, %s5305_s17 }
   0x6   : > { %p31_p0 = scmp.ge.s32.totalorder %s29_s23, 2  ;;  %p148_p1 = scmp.ne.s32.totalorder %s5305_s17, %s5301_s16 }
   0x7   : > { %p149_p2 = scmp.eq.s32.totalorder %s4951_s21, 1  ;;  %p154_p3 = scmp.ne.s32.totalorder %s5301_s16, %s5297_s15 }
   0x8   : > { %s5937_s23 = smov (%p31_p0, %s29_s23), 0  ;;  %p155_p5 = scmp.eq.s32.totalorder %s4952_s22, 1 }
   0x9   : > { %p5412_p4 = por %p149_p2, %p148_p1  ;;  %s133_s26 = ssub.s32 %s5313_s19, %s5937_s23 }
   0xa   : > { %p4955_p6 = scmp.ge.s32.totalorder %s5317_s20, 1  ;;  %p136_p7 = scmp.eq.s32.totalorder %s133_s26, 0 }
   0xb   : > { %p5419_p8 = por %p155_p5, %p154_p3  ;;  %p207_p9 = scmp.lt.s32.totalorder %s5317_s20, 3 }
   0xc   : > { %s5425_s28 = scalar_select %p136_p7, %s5305_s17, %s138_s24  }
   0xd   : > { %p208_p10 = pnand %p4955_p6, %p207_p9 }
   0xe   : > { %p248_p11 = scmp.lt.s32.totalorder (!%p208_p10), %s5309_s18, 1  ;;  %s5319_s9 = smov (!%p208_p10), 62   ;;  %v5321_v5 = vmov (!%p208_p10), 0.0   ;;  %vm294_vm0 = vcmask (!%p208_p10), 506880   ;;  %v4961_v15 = vld [vmem:[%s5926_s2 + $0x8] sm:$0xff] (!%p208_p10)  ;;  %vm303_vm1 = vcmask (!%p208_p10), 64512  }
   0xf   : > { %211 = sbr.rel (%p208_p10) target bundleno = 622 (0x26e), region = 36  ;;  %s5320_s13 = smov (!%p208_p10), 63   ;;  %371 = vmatprep.mubr.f32.mxu0 (!%p208_p10), %v5321_v5  ;;  %442 = vmatprep.mubr.f32.mxu1 (!%p208_p10), %v5321_v5  ;;  %vm459_vm2 = vcmask (!%p208_p10), 515072   ;;  %vm625_vm3 = vcmask (!%p208_p10), 498688   ;;  %v276_v24 = vld [vmem:[%s5926_s2] sm:$0xff] (!%p208_p10)  ;;  %v4966_v33 = vld [vmem:[%s5926_s2 + $0x10] sm:$0xff] (!%p208_p10) }
  0x10   : > { %s5322_s14 = smov (!%p208_p10), 61   ;;  %s5323_s21 = smov (!%p208_p10), 41   ;;  %vm795_vm4 = vcmask (!%p208_p10), 334848   ;;  %vm965_vm5 = vcmask (!%p208_p10), 326656   ;;  %v4969_v45 = vld [vmem:[%s5926_s2 + $0x18] sm:$0xff] (!%p208_p10)  ;;  %v4972_v54 = vld [vmem:[%s5926_s2 + $0x20] sm:$0xff] (!%p208_p10) }
  0x11   : > { %s5324_s22 = smov (!%p208_p10), 40   ;;  %s5325_s24 = smov (!%p208_p10), 39   ;;  %vm1135_vm6 = vcmask (!%p208_p10), 318464   ;;  %vm1305_vm7 = vcmask (!%p208_p10), 154624   ;;  %vm1475_vm8 = vcmask (!%p208_p10), 146432   ;;  %vm1645_vm9 = vcmask (!%p208_p10), 138240  }
  0x12   : > { %s5326_s26 = smov (!%p208_p10), 19   ;;  %s5329_s5 = smov (!%p208_p10), 86   ;;  %vm1815_vm10 = vcmask (!%p208_p10), 703488   ;;  %vm1985_vm11 = vcmask (!%p208_p10), 687104   ;;  %vm2155_vm12 = vcmask (!%p208_p10), 670720   ;;  %vm2325_vm13 = vcmask (!%p208_p10), 343040  }
  0x13   : > { %s5330_s6 = smov (!%p208_p10), 84   ;;  %s5333_s11 = smov (!%p208_p10), 38   ;;  %vm2646_vm14 = vcmask (!%p208_p10), 310272   ;;  %vm2817_vm15 = vcmask (!%p208_p10), 1031168  }
  0x14   : > { %s5338_s10 = smov (!%p208_p10), 106  }
  0x16   : > { %s249_s29 = scalar_select %p248_p11, %s5309_s18, 1 }
  0x18   : > { %s5046_s30 = sshll.u32 %s249_s29, 6  ;;  %s5327_s29 = smov 18  }
  0x19   : > { %s255_s7 = scalar_lea.vmem %s5924_s0, %s5046_s30  ;;  %s5048_s8 = sadd.s32 32, %s5046_s30 }
  0x1a   : > { %v5432_v0 = vld [vmem:[%s255_s7 + $0x18] sm:$0xff]  ;;  %v5434_v1 = vld [vmem:[%s255_s7 + $0x8] sm:$0xff]  ;;  %v5438_v2 = vld [vmem:[%s255_s7 + $0x10] sm:$0xff]  ;;  %s5443_s12 = scalar_lea.vmem %s5925_s1, %s5048_s8  ;;  %s5328_s30 = smov 17  }
  0x1b   : > { %290 = vrot.lane.b32.xlu1 %v5432_v0, %s5319_s9  ;;  %286 = vrot.lane.b32.xlu0 %v5434_v1, %s5319_s9  ;;  %v5448_v3 = vld [vmem:[%s5443_s12] sm:$0xff]  ;;  %s5332_s8 = smov 42   ;;  %v5551_v34 = vld [vmem:[%s5443_s12 + $0x8] sm:$0xff]  ;;  %s5335_s12 = smov 124  }
  0x1c   : > { %v5450_v4 = vld [vmem:[%s255_s7] sm:$0xff]  ;;  %s5331_s7 = smov 82  }
  0x1f   : > { %451 = vrot.lane.b32.xlu1 %v5434_v1, %s5320_s13  ;;  %288 = vrot.lane.b32.xlu0 %v5438_v2, %s5319_s9 }
  0x23   : > { %292 = vrot.lane.b32.xlu1 %v5448_v3, %s5319_s9  ;;  %284 = vrot.lane.b32.xlu0 %v5450_v4, %s5319_s9  ;;  %s5343_s9 = smov 102  }
  0x27   : > { %455 = vrot.lane.b32.xlu1 %v5432_v0, %s5320_s13  ;;  %453 = vrot.lane.b32.xlu0 %v5438_v2, %s5320_s13 }
  0x2b   : > { %449 = vrot.lane.b32.xlu1 %v5450_v4, %s5320_s13  ;;  %457 = vrot.lane.b32.xlu0 %v5448_v3, %s5320_s13  ;;  %s5345_s13 = smov 99  }
  0x2f   : > { %619 = vrot.lane.b32.xlu1 %v5438_v2, %s5322_s14  ;;  %617 = vrot.lane.b32.xlu0 %v5434_v1, %s5322_s14 }
  0x33   : > { %623 = vrot.lane.b32.xlu1 %v5448_v3, %s5322_s14  ;;  %621 = vrot.lane.b32.xlu0 %v5432_v0, %s5322_s14 }
  0x37   : > { %787 = vrot.lane.b32.xlu1 %v5434_v1, %s5323_s21  ;;  %615 = vrot.lane.b32.xlu0 %v5450_v4, %s5322_s14  ;;  %s5339_s14 = smov 103  }
  0x3b   : > { %791 = vrot.lane.b32.xlu1 %v5432_v0, %s5323_s21  ;;  %789 = vrot.lane.b32.xlu0 %v5438_v2, %s5323_s21 }
  0x3f   : > { %785 = vrot.lane.b32.xlu1 %v5450_v4, %s5323_s21  ;;  %793 = vrot.lane.b32.xlu0 %v5448_v3, %s5323_s21  ;;  %s5334_s21 = smov 126  }
  0x43   : > { %959 = vrot.lane.b32.xlu1 %v5438_v2, %s5324_s22  ;;  %957 = vrot.lane.b32.xlu0 %v5434_v1, %s5324_s22 }
  0x47   : > { %963 = vrot.lane.b32.xlu1 %v5448_v3, %s5324_s22  ;;  %961 = vrot.lane.b32.xlu0 %v5432_v0, %s5324_s22 }
  0x4b   : > { %1127 = vrot.lane.b32.xlu1 %v5434_v1, %s5325_s24  ;;  %955 = vrot.lane.b32.xlu0 %v5450_v4, %s5324_s22  ;;  %s5049_s22 = sshll.u32 %s5309_s18, 9 }
  0x4f   : > { %1131 = vrot.lane.b32.xlu1 %v5432_v0, %s5325_s24  ;;  %1129 = vrot.lane.b32.xlu0 %v5438_v2, %s5325_s24 }
  0x53   : > { %1125 = vrot.lane.b32.xlu1 %v5450_v4, %s5325_s24  ;;  %1133 = vrot.lane.b32.xlu0 %v5448_v3, %s5325_s24  ;;  %s5340_s24 = smov 43  }
  0x57   : > { %1299 = vrot.lane.b32.xlu1 %v5438_v2, %s5326_s26  ;;  %1297 = vrot.lane.b32.xlu0 %v5434_v1, %s5326_s26 }
  0x5b   : > { %1303 = vrot.lane.b32.xlu1 %v5448_v3, %s5326_s26  ;;  %1301 = vrot.lane.b32.xlu0 %v5432_v0, %s5326_s26 }
  0x5f   : > { %1467 = vrot.lane.b32.xlu1 %v5434_v1, %s5327_s29  ;;  %1295 = vrot.lane.b32.xlu0 %v5450_v4, %s5326_s26 }
  0x63   : > { %1471 = vrot.lane.b32.xlu1 %v5432_v0, %s5327_s29  ;;  %1469 = vrot.lane.b32.xlu0 %v5438_v2, %s5327_s29 }
  0x67   : > { %1465 = vrot.lane.b32.xlu1 %v5450_v4, %s5327_s29  ;;  %1473 = vrot.lane.b32.xlu0 %v5448_v3, %s5327_s29  ;;  %s5341_s29 = smov 37  }
  0x6b   : > { %1639 = vrot.lane.b32.xlu1 %v5438_v2, %s5328_s30  ;;  %1637 = vrot.lane.b32.xlu0 %v5434_v1, %s5328_s30 }
  0x6f   : > { %1643 = vrot.lane.b32.xlu1 %v5448_v3, %s5328_s30  ;;  %1641 = vrot.lane.b32.xlu0 %v5432_v0, %s5328_s30 }
  0x73   : > { %1807 = vrot.lane.b32.xlu1 %v5434_v1, %s5329_s5  ;;  %1635 = vrot.lane.b32.xlu0 %v5450_v4, %s5328_s30  ;;  %s5336_s30 = smov 122  }
  0x77   : > { %1811 = vrot.lane.b32.xlu1 %v5432_v0, %s5329_s5  ;;  %1809 = vrot.lane.b32.xlu0 %v5438_v2, %s5329_s5 }
  0x7b   : > { %1805 = vrot.lane.b32.xlu1 %v5450_v4, %s5329_s5  ;;  %1813 = vrot.lane.b32.xlu0 %v5448_v3, %s5329_s5 }
  0x7f   : > { %1979 = vrot.lane.b32.xlu1 %v5438_v2, %s5330_s6  ;;  %1977 = vrot.lane.b32.xlu0 %v5434_v1, %s5330_s6 }
  0x83   : > { %1983 = vrot.lane.b32.xlu1 %v5448_v3, %s5330_s6  ;;  %1981 = vrot.lane.b32.xlu0 %v5432_v0, %s5330_s6 }
  0x87   : > { %2147 = vrot.lane.b32.xlu1 %v5434_v1, %s5331_s7  ;;  %1975 = vrot.lane.b32.xlu0 %v5450_v4, %s5330_s6  ;;  %s5342_s6 = smov 105  }
  0x8b   : > { %2151 = vrot.lane.b32.xlu1 %v5432_v0, %s5331_s7  ;;  %2149 = vrot.lane.b32.xlu0 %v5438_v2, %s5331_s7 }
  0x8d   : > { %v291_v6 = vpop.permute.xlu1 %290  ;;  %v287_v7 = vpop.permute.xlu0 %286 }
  0x8f   : > { %2145 = vrot.lane.b32.xlu1 %v5450_v4, %s5331_s7  ;;  %2153 = vrot.lane.b32.xlu0 %v5448_v3, %s5331_s7  ;;  %s5337_s7 = smov 109  }
  0x91   : > { %v452_v8 = vpop.permute.xlu1 %451  ;;  %v289_v9 = vpop.permute.xlu0 %288 }
  0x92   : > { %v296_v10 = vsel %vm294_vm0, %v287_v7, %v289_v9  ;;  %v297_v16 = vsel %vm294_vm0, %v289_v9, %v291_v6 }
  0x93   : > { %307 = vmatprep.subr.mxu0 %v296_v10  ;;  %2319 = vrot.lane.b32.xlu1 %v5438_v2, %s5332_s8 }
  0x94   : > { %2317 = vrot.lane.b32.xlu0 %v5434_v1, %s5332_s8 }
  0x95   : > { %v293_v11 = vpop.permute.xlu1 %292  ;;  %v285_v12 = vpop.permute.xlu0 %284 }
  0x96   : > { %v298_v13 = vsel %vm294_vm0, %v291_v6, %v293_v11  ;;  %v295_v14 = vsel %vm294_vm0, %v285_v12, %v287_v7  ;;  %v4975_v7 = vld [vmem:[%s5926_s2 + $0x28] sm:$0xff]  ;;  %vm2987_vm0 = vcmask 1014784  }
  0x97   : > { %378 = vmatprep.subr.mxu1 %v298_v13  ;;  %2323 = vrot.lane.b32.xlu1 %v5448_v3, %s5332_s8 }
  0x98   : > { %2321 = vrot.lane.b32.xlu0 %v5432_v0, %s5332_s8  ;;  %308 = vmatpush1.msra.mxu0 %v295_v14 }
  0x99   : > { %379 = vmatpush1.msra.mxu1 %v297_v16  ;;  %v456_v17 = vpop.permute.xlu1 %455  ;;  %v454_v18 = vpop.permute.xlu0 %453  ;;  %4962 = vmatmul.mubr.msk.f32.vlgmr.msra.gmra.mrb[0].mxu0 %vm303_vm1, %v4961_v15  ;;  %v4978_v16 = vld [vmem:[%s5926_s2 + $0x30] sm:$0xff] }
  0x9a   : > { %v461_v19 = vsel %vm459_vm2, %v452_v8, %v454_v18  ;;  %4963 = vmatmul.mubr.msk.f32.vlgmr.msra.gmra.mrb[0].mxu1 %vm303_vm1, %v4961_v15  ;;  %535 = vmatprep.mubr.f32.mxu0 %v5321_v5  ;;  %v462_v25 = vsel %vm459_vm2, %v454_v18, %v456_v17 }
  0x9b   : > { %2638 = vrot.lane.b32.xlu1 %v5434_v1, %s5333_s11  ;;  %471 = vmatprep.subr.mxu0 %v461_v19 }
  0x9c   : > { %2315 = vrot.lane.b32.xlu0 %v5450_v4, %s5332_s8  ;;  %606 = vmatprep.mubr.f32.mxu1 %v5321_v5 }
  0x9d   : > { %v450_v20 = vpop.permute.xlu1 %449  ;;  %v458_v21 = vpop.permute.xlu0 %457 }
  0x9e   : > { %v460_v22 = vsel %vm459_vm2, %v450_v20, %v452_v8  ;;  %v463_v23 = vsel %vm459_vm2, %v456_v17, %v458_v21  ;;  %vm3157_vm2 = vcmask 998400  }
  0x9f   : > { %2642 = vrot.lane.b32.xlu1 %v5432_v0, %s5333_s11  ;;  %472 = vmatpush1.msra.mxu0 %v460_v22 }
  0xa0   : > { %2640 = vrot.lane.b32.xlu0 %v5438_v2, %s5333_s11  ;;  %542 = vmatprep.subr.mxu1 %v463_v23 }
  0xa1   : > { %543 = vmatpush1.msra.mxu1 %v462_v25  ;;  %v620_v26 = vpop.permute.xlu1 %619  ;;  %v618_v27 = vpop.permute.xlu0 %617  ;;  %4964 = vmatmul.mubr.msk.f32.vlgmr.msra.gmra.mrb[0].mxu0 %vm303_vm1, %v276_v24 }
  0xa2   : > { %v627_v28 = vsel %vm625_vm3, %v618_v27, %v620_v26  ;;  %4965 = vmatmul.mubr.msk.f32.vlgmr.msra.gmra.mrb[0].mxu1 %vm303_vm1, %v276_v24  ;;  %701 = vmatprep.mubr.f32.mxu0 %v5321_v5 }
  0xa3   : > { %2636 = vrot.lane.b32.xlu1 %v5450_v4, %s5333_s11  ;;  %637 = vmatprep.subr.mxu0 %v627_v28 }
  0xa4   : > { %2644 = vrot.lane.b32.xlu0 %v5448_v3, %s5333_s11  ;;  %772 = vmatprep.mubr.f32.mxu1 %v5321_v5 }
  0xa5   : > { %v624_v29 = vpop.permute.xlu1 %623  ;;  %v622_v30 = vpop.permute.xlu0 %621 }
  0xa6   : > { %v629_v31 = vsel %vm625_vm3, %v622_v30, %v624_v29  ;;  %v628_v32 = vsel %vm625_vm3, %v620_v26, %v622_v30 }
  0xa7   : > { %2811 = vrot.lane.b32.xlu1 %v5432_v0, %s5334_s21  ;;  %708 = vmatprep.subr.mxu1 %v629_v31 }
  0xa8   : > { %2809 = vrot.lane.b32.xlu0 %v5438_v2, %s5334_s21  ;;  %709 = vmatpush1.msra.mxu1 %v628_v32 }
  0xa9   : > { %v788_v35 = vpop.permute.xlu1 %787  ;;  %v616_v36 = vpop.permute.xlu0 %615 }
  0xaa   : > { %v626_v37 = vsel %vm625_vm3, %v616_v36, %v618_v27  ;;  %4968 = vmatmul.mubr.msk.f32.vlgmr.msra.gmra.mrb[0].mxu1 %vm303_vm1, %v4966_v33  ;;  %v4981_v27 = vld [vmem:[%s5926_s2 + $0x38] sm:$0xff]  ;;  %vm3327_vm3 = vcmask 891904  }
  0xab   : > { %2815 = vrot.lane.b32.xlu1 %v5551_v34, %s5334_s21  ;;  %638 = vmatpush1.msra.mxu0 %v626_v37  ;;  %v4984_v37 = vld [vmem:[%s5926_s2 + $0x40] sm:$0xff] }
  0xac   : > { %2813 = vrot.lane.b32.xlu0 %v5448_v3, %s5334_s21  ;;  %4967 = vmatmul.mubr.msk.f32.vlgmr.msra.gmra.mrb[0].mxu0 %vm303_vm1, %v4966_v33 }
  0xad   : > { %v792_v38 = vpop.permute.xlu1 %791  ;;  %v790_v39 = vpop.permute.xlu0 %789  ;;  %942 = vmatprep.mubr.f32.mxu1 %v5321_v5  ;;  %871 = vmatprep.mubr.f32.mxu0 %v5321_v5 }
  0xae   : > { %v797_v40 = vsel %vm795_vm4, %v788_v35, %v790_v39  ;;  %v798_v46 = vsel %vm795_vm4, %v790_v39, %v792_v38 }
  0xaf   : > { %2979 = vrot.lane.b32.xlu1 %v5438_v2, %s5335_s12  ;;  %807 = vmatprep.subr.mxu0 %v797_v40 }
  0xb0   : > { %2807 = vrot.lane.b32.xlu0 %v5434_v1, %s5334_s21 }
  0xb1   : > { %v786_v41 = vpop.permute.xlu1 %785  ;;  %v794_v42 = vpop.permute.xlu0 %793 }
  0xb2   : > { %v796_v43 = vsel %vm795_vm4, %v786_v41, %v788_v35  ;;  %v799_v44 = vsel %vm795_vm4, %v792_v38, %v794_v42  ;;  %vm3497_vm4 = vcmask 867328  }
  0xb3   : > { %2983 = vrot.lane.b32.xlu1 %v5448_v3, %s5335_s12  ;;  %808 = vmatpush1.msra.mxu0 %v796_v43 }
  0xb4   : > { %2981 = vrot.lane.b32.xlu0 %v5432_v0, %s5335_s12  ;;  %878 = vmatprep.subr.mxu1 %v799_v44 }
  0xb5   : > { %879 = vmatpush1.msra.mxu1 %v798_v46  ;;  %v960_v47 = vpop.permute.xlu1 %959  ;;  %v958_v48 = vpop.permute.xlu0 %957  ;;  %4970 = vmatmul.mubr.msk.f32.vlgmr.msra.gmra.mrb[0].mxu0 %vm303_vm1, %v4969_v45 }
  0xb6   : > { %v5573_v49 = vsel %vm965_vm5, %v958_v48, %v960_v47  ;;  %4971 = vmatmul.mubr.msk.f32.vlgmr.msra.gmra.mrb[0].mxu1 %vm303_vm1, %v4969_v45  ;;  %1041 = vmatprep.mubr.f32.mxu0 %v5321_v5 }
  0xb7   : > { %2977 = vrot.lane.b32.xlu1 %v5434_v1, %s5335_s12  ;;  %977 = vmatprep.subr.mxu0 %v5573_v49 }
  0xb8   : > { %2985 = vrot.lane.b32.xlu0 %v5551_v34, %s5335_s12  ;;  %1112 = vmatprep.mubr.f32.mxu1 %v5321_v5 }
  0xb9   : > { %v964_v50 = vpop.permute.xlu1 %963  ;;  %v962_v51 = vpop.permute.xlu0 %961 }
  0xba   : > { %v5582_v52 = vsel %vm965_vm5, %v962_v51, %v964_v50  ;;  %v5585_v53 = vsel %vm965_vm5, %v960_v47, %v962_v51 }
  0xbb   : > { %3151 = vrot.lane.b32.xlu1 %v5432_v0, %s5336_s30  ;;  %1048 = vmatprep.subr.mxu1 %v5582_v52 }
  0xbc   : > { %3149 = vrot.lane.b32.xlu0 %v5438_v2, %s5336_s30  ;;  %1049 = vmatpush1.msra.mxu1 %v5585_v53 }
  0xbd   : > { %v1128_v55 = vpop.permute.xlu1 %1127  ;;  %v956_v56 = vpop.permute.xlu0 %955 }
  0xbe   : > { %v5595_v57 = vsel %vm965_vm5, %v956_v56, %v958_v48  ;;  %4974 = vmatmul.mubr.msk.f32.vlgmr.msra.gmra.mrb[0].mxu1 %vm303_vm1, %v4972_v54  ;;  %v4987_v48 = vld [vmem:[%s5926_s2 + $0x48] sm:$0xff]  ;;  %vm3667_vm5 = vcmask 842752  }
  0xbf   : > { %3155 = vrot.lane.b32.xlu1 %v5551_v34, %s5336_s30  ;;  %978 = vmatpush1.msra.mxu0 %v5595_v57 }
  0xc0   : > { %3153 = vrot.lane.b32.xlu0 %v5448_v3, %s5336_s30  ;;  %4973 = vmatmul.mubr.msk.f32.vlgmr.msra.gmra.mrb[0].mxu0 %vm303_vm1, %v4972_v54 }
  0xc1   : > { %v1132_v58 = vpop.permute.xlu1 %1131  ;;  %v1130_v59 = vpop.permute.xlu0 %1129  ;;  %1282 = vmatprep.mubr.f32.mxu1 %v5321_v5  ;;  %1211 = vmatprep.mubr.f32.mxu0 %v5321_v5 }
  0xc2   : > { %v1137_v60 = vsel %vm1135_vm6, %v1128_v55, %v1130_v59  ;;  %v1138_v8 = vsel %vm1135_vm6, %v1130_v59, %v1132_v58 }
  0xc3   : > { %3319 = vrot.lane.b32.xlu1 %v5434_v1, %s5337_s7  ;;  %1147 = vmatprep.subr.mxu0 %v1137_v60 }
  0xc4   : > { %3147 = vrot.lane.b32.xlu0 %v5434_v1, %s5336_s30  ;;  %s5877_s30 = scalar_lea.hbm %s5928_s4, %s5049_s22 }
  0xc5   : > { %v1126_v61 = vpop.permute.xlu1 %1125  ;;  %v1134_v62 = vpop.permute.xlu0 %1133 }
  0xc6   : > { %v1136_v63 = vsel %vm1135_vm6, %v1126_v61, %v1128_v55  ;;  %v1139_v6 = vsel %vm1135_vm6, %v1132_v58, %v1134_v62  ;;  %v4990_v61 = vld [vmem:[%s5926_s2 + $0x50] sm:$0xff]  ;;  %vm3837_vm6 = vcmask 351232  }
  0xc7   : > { %3323 = vrot.lane.b32.xlu1 %v5432_v0, %s5337_s7  ;;  %1148 = vmatpush1.msra.mxu0 %v1136_v63 }
  0xc8   : > { %3321 = vrot.lane.b32.xlu0 %v5438_v2, %s5337_s7  ;;  %1218 = vmatprep.subr.mxu1 %v1139_v6 }
  0xc9   : > { %1219 = vmatpush1.msra.mxu1 %v1138_v8  ;;  %v1300_v9 = vpop.permute.xlu1 %1299  ;;  %v1298_v10 = vpop.permute.xlu0 %1297  ;;  %4976 = vmatmul.mubr.msk.f32.vlgmr.msra.gmra.mrb[0].mxu0 %vm303_vm1, %v4975_v7 }
  0xca   : > { %v1307_v11 = vsel %vm1305_vm7, %v1298_v10, %v1300_v9  ;;  %4977 = vmatmul.mubr.msk.f32.vlgmr.msra.gmra.mrb[0].mxu1 %vm303_vm1, %v4975_v7  ;;  %1381 = vmatprep.mubr.f32.mxu0 %v5321_v5 }
  0xcb   : > { %3317 = vrot.lane.b32.xlu1 %v5450_v4, %s5337_s7  ;;  %1317 = vmatprep.subr.mxu0 %v1307_v11 }
  0xcc   : > { %3325 = vrot.lane.b32.xlu0 %v5448_v3, %s5337_s7  ;;  %1452 = vmatprep.mubr.f32.mxu1 %v5321_v5 }
  0xcd   : > { %v1304_v12 = vpop.permute.xlu1 %1303  ;;  %v1302_v13 = vpop.permute.xlu0 %1301 }
  0xce   : > { %v1308_v14 = vsel %vm1305_vm7, %v1300_v9, %v1302_v13  ;;  %v1309_v15 = vsel %vm1305_vm7, %v1302_v13, %v1304_v12  ;;  %v4993_v13 = vld [vmem:[%s5926_s2 + $0x58] sm:$0xff] }
  0xcf   : > { %3491 = vrot.lane.b32.xlu1 %v5438_v2, %s5338_s10  ;;  %1388 = vmatprep.subr.mxu1 %v1309_v15 }
  0xd0   : > { %3489 = vrot.lane.b32.xlu0 %v5434_v1, %s5338_s10  ;;  %1389 = vmatpush1.msra.mxu1 %v1308_v14 }
  0xd1   : > { %v1468_v17 = vpop.permute.xlu1 %1467  ;;  %v1296_v18 = vpop.permute.xlu0 %1295 }
  0xd2   : > { %v1306_v19 = vsel %vm1305_vm7, %v1296_v18, %v1298_v10  ;;  %4980 = vmatmul.mubr.msk.f32.vlgmr.msra.gmra.mrb[0].mxu1 %vm303_vm1, %v4978_v16  ;;  %vm4158_vm7 = vcmask 302080  }
  0xd3   : > { %3495 = vrot.lane.b32.xlu1 %v5448_v3, %s5338_s10  ;;  %1318 = vmatpush1.msra.mxu0 %v1306_v19 }
  0xd4   : > { %3493 = vrot.lane.b32.xlu0 %v5432_v0, %s5338_s10  ;;  %4979 = vmatmul.mubr.msk.f32.vlgmr.msra.gmra.mrb[0].mxu0 %vm303_vm1, %v4978_v16 }
  0xd5   : > { %v1472_v20 = vpop.permute.xlu1 %1471  ;;  %v1470_v21 = vpop.permute.xlu0 %1469  ;;  %1622 = vmatprep.mubr.f32.mxu1 %v5321_v5  ;;  %1551 = vmatprep.mubr.f32.mxu0 %v5321_v5 }
  0xd6   : > { %v1477_v22 = vsel %vm1475_vm8, %v1468_v17, %v1470_v21  ;;  %v1478_v28 = vsel %vm1475_vm8, %v1470_v21, %v1472_v20 }
  0xd7   : > { %3659 = vrot.lane.b32.xlu1 %v5434_v1, %s5339_s14  ;;  %1487 = vmatprep.subr.mxu0 %v1477_v22 }
  0xd8   : > { %3487 = vrot.lane.b32.xlu0 %v5450_v4, %s5338_s10 }
  0xd9   : > { %v1466_v23 = vpop.permute.xlu1 %1465  ;;  %v1474_v24 = vpop.permute.xlu0 %1473 }
  0xda   : > { %v1476_v25 = vsel %vm1475_vm8, %v1466_v23, %v1468_v17  ;;  %v1479_v26 = vsel %vm1475_vm8, %v1472_v20, %v1474_v24  ;;  %v5344_v20 = vmov 0   ;;  %v4996_v23 = vld [vmem:[%s5926_s2 + $0x60] sm:$0xff]  ;;  %vm4328_vm8 = vcmask 859136  }
  0xdb   : > { %3663 = vrot.lane.b32.xlu1 %v5432_v0, %s5339_s14  ;;  %1488 = vmatpush1.msra.mxu0 %v1476_v25 }
  0xdc   : > { %3661 = vrot.lane.b32.xlu0 %v5438_v2, %s5339_s14  ;;  %1558 = vmatprep.subr.mxu1 %v1479_v26 }
  0xdd   : > { %1559 = vmatpush1.msra.mxu1 %v1478_v28  ;;  %v1640_v29 = vpop.permute.xlu1 %1639  ;;  %v1638_v30 = vpop.permute.xlu0 %1637  ;;  %4982 = vmatmul.mubr.msk.f32.vlgmr.msra.gmra.mrb[0].mxu0 %vm303_vm1, %v4981_v27 }
  0xde   : > { %v1647_v31 = vsel %vm1645_vm9, %v1638_v30, %v1640_v29  ;;  %4983 = vmatmul.mubr.msk.f32.vlgmr.msra.gmra.mrb[0].mxu1 %vm303_vm1, %v4981_v27  ;;  %1721 = vmatprep.mubr.f32.mxu0 %v5321_v5 }
  0xdf   : > { %3657 = vrot.lane.b32.xlu1 %v5450_v4, %s5339_s14  ;;  %1657 = vmatprep.subr.mxu0 %v1647_v31 }
  0xe0   : > { %3665 = vrot.lane.b32.xlu0 %v5448_v3, %s5339_s14  ;;  %1792 = vmatprep.mubr.f32.mxu1 %v5321_v5  ;;  %s244_s14 = sand.u32 1, %s5301_s16  }
  0xe1   : > { %v1644_v32 = vpop.permute.xlu1 %1643  ;;  %v1642_v33 = vpop.permute.xlu0 %1641  ;;  %5237 = vset.pattern.permute.xlu1 %v5344_v20  ;;  %5238 = vset.pattern.permute.xlu0 %v5344_v20  ;;  %s4956_s21 = sshll.u32 %s244_s14, 5  ;;  %s4841_s18 = scalar_lea.sflag [#allocation3], %s244_s14 }
  0xe2   : > { %v1648_v35 = vsel %vm1645_vm9, %v1640_v29, %v1642_v33  ;;  %v1649_v36 = vsel %vm1645_vm9, %v1642_v33, %v1644_v32 }
  0xe3   : > { %3831 = vrot.lane.b32.xlu1 %v5438_v2, %s5340_s24  ;;  %1728 = vmatprep.subr.mxu1 %v1649_v36  ;;  %v5002_v36 = vld [vmem:[%s5926_s2 + $0x70] sm:$0xff] }
  0xe4   : > { %3829 = vrot.lane.b32.xlu0 %v5434_v1, %s5340_s24  ;;  %1729 = vmatpush1.msra.mxu1 %v1648_v35 }
  0xe5   : > { %v1808_v38 = vpop.permute.xlu1 %1807  ;;  %v1636_v39 = vpop.permute.xlu0 %1635 }
  0xe6   : > { %v1646_v40 = vsel %vm1645_vm9, %v1636_v39, %v1638_v30  ;;  %4986 = vmatmul.mubr.msk.f32.vlgmr.msra.gmra.mrb[0].mxu1 %vm303_vm1, %v4984_v37  ;;  %vm4498_vm9 = vcmask 834560  }
  0xe7   : > { %3835 = vrot.lane.b32.xlu1 %v5448_v3, %s5340_s24  ;;  %1658 = vmatpush1.msra.mxu0 %v1646_v40 }
  0xe8   : > { %3833 = vrot.lane.b32.xlu0 %v5432_v0, %s5340_s24  ;;  %4985 = vmatmul.mubr.msk.f32.vlgmr.msra.gmra.mrb[0].mxu0 %vm303_vm1, %v4984_v37 }
  0xe9   : > { %v1812_v41 = vpop.permute.xlu1 %1811  ;;  %v1810_v42 = vpop.permute.xlu0 %1809  ;;  %1962 = vmatprep.mubr.f32.mxu1 %v5321_v5  ;;  %1891 = vmatprep.mubr.f32.mxu0 %v5321_v5 }
  0xea   : > { %v1817_v43 = vsel %vm1815_vm10, %v1808_v38, %v1810_v42  ;;  %v1818_v50 = vsel %vm1815_vm10, %v1810_v42, %v1812_v41 }
  0xeb   : > { %4150 = vrot.lane.b32.xlu1 %v5434_v1, %s5341_s29  ;;  %1827 = vmatprep.subr.mxu0 %v1817_v43 }
  0xec   : > { %3827 = vrot.lane.b32.xlu0 %v5450_v4, %s5340_s24  ;;  %s246_s24 = scalar_lea.vmem [#allocation2], %s4956_s21 }
  0xed   : > { %v1806_v44 = vpop.permute.xlu1 %1805  ;;  %v1814_v45 = vpop.permute.xlu0 %1813  ;;  %s4857_s12 = sshll.u32 %s246_s24, 4  ;;  %s5879_s12 = int_to_ptr.vmem [resolvable:$true] %s4857_s12 }
  0xee   : > { %v1816_v46 = vsel %vm1815_vm10, %v1806_v44, %v1808_v38  ;;  %v1819_v47 = vsel %vm1815_vm10, %v1812_v41, %v1814_v45  ;;  %v5005_v44 = vld [vmem:[%s5926_s2 + $0x78] sm:$0xff]  ;;  %vm4668_vm10 = vcmask 809984   ;;  %s5239_s5 = scalar_lea.vmem %s5879_s12, 512 }
  0xef   : > { %4154 = vrot.lane.b32.xlu1 %v5432_v0, %s5341_s29  ;;  %1828 = vmatpush1.msra.mxu0 %v1816_v46  ;;  %p5240_p12 = scmp.ne.s32.totalorder %s5879_s12, %s5239_s5 }
  0xf0   : > { %4152 = vrot.lane.b32.xlu0 %v5438_v2, %s5341_s29  ;;  %1898 = vmatprep.subr.mxu1 %v1819_v47 }
  0xf1   : > { %1899 = vmatpush1.msra.mxu1 %v1818_v50  ;;  %v1980_v51 = vpop.permute.xlu1 %1979  ;;  %v1978_v54 = vpop.permute.xlu0 %1977  ;;  %4988 = vmatmul.mubr.msk.f32.vlgmr.msra.gmra.mrb[0].mxu0 %vm303_vm1, %v4987_v48  ;;  %p5241_p13 = pnand %p5240_p12, %p5412_p4 }
  0xf2   : > { %v1987_v55 = vsel %vm1985_vm11, %v1978_v54, %v1980_v51  ;;  %4989 = vmatmul.mubr.msk.f32.vlgmr.msra.gmra.mrb[0].mxu1 %vm303_vm1, %v4987_v48  ;;  %2061 = vmatprep.mubr.f32.mxu0 %v5321_v5 }
  0xf3   : > { %4148 = vrot.lane.b32.xlu1 %v5450_v4, %s5341_s29  ;;  %1997 = vmatprep.subr.mxu0 %v1987_v55  ;;  %v5008_v55 = vld [vmem:[%s5926_s2 + $0x80] sm:$0xff]  ;;  %p5242_p0 = pneg %p5241_p13 }
  0xf4   : > { %4156 = vrot.lane.b32.xlu0 %v5448_v3, %s5341_s29  ;;  %2132 = vmatprep.mubr.f32.mxu1 %v5321_v5 }
  0xf5   : > { %v1984_v56 = vpop.permute.xlu1 %1983  ;;  %v1982_v58 = vpop.permute.xlu0 %1981 }
  0xf6   : > { %v1988_v59 = vsel %vm1985_vm11, %v1980_v51, %v1982_v58  ;;  %v1989_v60 = vsel %vm1985_vm11, %v1982_v58, %v1984_v56 }
  0xf7   : > { %4322 = vrot.lane.b32.xlu1 %v5432_v0, %s5342_s6  ;;  %2068 = vmatprep.subr.mxu1 %v1989_v60 }
  0xf8   : > { %4320 = vrot.lane.b32.xlu0 %v5438_v2, %s5342_s6  ;;  %2069 = vmatpush1.msra.mxu1 %v1988_v59 }
  0xf9   : > { %v2148_v4 = vpop.permute.xlu1 %2147  ;;  %v1976_v62 = vpop.permute.xlu0 %1975 }
  0xfa   : > { %v1986_v63 = vsel %vm1985_vm11, %v1976_v62, %v1978_v54  ;;  %4992 = vmatmul.mubr.msk.f32.vlgmr.msra.gmra.mrb[0].mxu1 %vm303_vm1, %v4990_v61 }
  0xfb   : > { %4326 = vrot.lane.b32.xlu1 %v5551_v34, %s5342_s6  ;;  %1998 = vmatpush1.msra.mxu0 %v1986_v63 }
  0xfc   : > { %4324 = vrot.lane.b32.xlu0 %v5448_v3, %s5342_s6  ;;  %4991 = vmatmul.mubr.msk.f32.vlgmr.msra.gmra.mrb[0].mxu0 %vm303_vm1, %v4990_v61 }
  0xfd   : > { %v2152_v6 = vpop.permute.xlu1 %2151  ;;  %v2150_v7 = vpop.permute.xlu0 %2149  ;;  %2302 = vmatprep.mubr.f32.mxu1 %v5321_v5  ;;  %2231 = vmatprep.mubr.f32.mxu0 %v5321_v5 }
  0xfe   : > { %v2157_v8 = vsel %vm2155_vm12, %v2148_v4, %v2150_v7  ;;  %v2158_v14 = vsel %vm2155_vm12, %v2150_v7, %v2152_v6 }
  0xff   : > { %4490 = vrot.lane.b32.xlu1 %v5438_v2, %s5343_s9  ;;  %2167 = vmatprep.subr.mxu0 %v2157_v8 }
 0x100   : > { %4318 = vrot.lane.b32.xlu0 %v5434_v1, %s5342_s6  ;;  %s5346_s6 = smov [#allocation2]  }
 0x101   : > { %v2146_v9 = vpop.permute.xlu1 %2145  ;;  %v2154_v10 = vpop.permute.xlu0 %2153  ;;  %s5243_s7 = sshll.u32 %s5346_s6, 4  ;;  %s5244_s7 = int_to_ptr.vmem [resolvable:$false] %s5243_s7 }
 0x102   : > { %v2156_v11 = vsel %vm2155_vm12, %v2146_v9, %v2148_v4  ;;  %v2159_v12 = vsel %vm2155_vm12, %v2152_v6, %v2154_v10  ;;  %v5011_v6 = vld [vmem:[%s5926_s2 + $0x88] sm:$0xff]  ;;  %s5245_s8 = scalar_lea.vmem %s5244_s7, 1024  ;;  %p5246_p1 = scmp.lt.s32.totalorder %s5879_s12, %s5244_s7 }
 0x103   : > { %4494 = vrot.lane.b32.xlu1 %v5448_v3, %s5343_s9  ;;  %2168 = vmatpush1.msra.mxu0 %v2156_v11  ;;  %p5247_p2 = scmp.lt.s32.totalorder %s5245_s8, %s5239_s5 }
 0x104   : > { %4492 = vrot.lane.b32.xlu0 %v5432_v0, %s5343_s9  ;;  %2238 = vmatprep.subr.mxu1 %v2159_v12 }
 0x105   : > { %2239 = vmatpush1.msra.mxu1 %v2158_v14  ;;  %v2320_v15 = vpop.permute.xlu1 %2319  ;;  %4994 = vmatmul.mubr.msk.f32.vlgmr.msra.gmra.mrb[0].mxu0 %vm303_vm1, %v4993_v13  ;;  %p5248_p3 = por %p5247_p2, %p5246_p1 }
 0x106   : > { %v2318_v16 = vpop.permute.xlu0 %2317  ;;  %4995 = vmatmul.mubr.msk.f32.vlgmr.msra.gmra.mrb[0].mxu1 %vm303_vm1, %v4993_v13  ;;  %2401 = vmatprep.mubr.f32.mxu0 %v5321_v5 }
 0x107   : > { %4488 = vrot.lane.b32.xlu1 %v5434_v1, %s5343_s9  ;;  %v2327_v17 = vsel %vm2325_vm13, %v2318_v16, %v2320_v15  ;;  %2472 = vmatprep.mubr.f32.mxu1 %v5321_v5  ;;  %p5249_p5 = pnand %p5248_p3, %p5242_p0 }
 0x108   : > { %4496 = vrot.lane.b32.xlu0 %v5551_v34, %s5343_s9  ;;  %2337 = vmatprep.subr.mxu0 %v2327_v17  ;;  %v5014_v17 = vld [vmem:[%s5926_s2 + $0x90] sm:$0xff] }
 0x109   : > { %v2324_v18 = vpop.permute.xlu1 %2323 }
 0x10a   : > { %v2322_v19 = vpop.permute.xlu0 %2321 }
 0x10b   : > { %v2328_v21 = vsel %vm2325_vm13, %v2320_v15, %v2322_v19  ;;  %4662 = vrot.lane.b32.xlu1 %v5432_v0, %s5345_s13  ;;  %v2329_v22 = vsel %vm2325_vm13, %v2322_v19, %v2324_v18  ;;  %v4826_v0 = vld [vmem:[%s5927_s3] sm:$0xff] }
 0x10c   : > { %4660 = vrot.lane.b32.xlu0 %v5438_v2, %s5345_s13  ;;  %2408 = vmatprep.subr.mxu1 %v2329_v22 }
 0x10d   : > { %2409 = vmatpush1.msra.mxu1 %v2328_v21  ;;  %v2639_v24 = vpop.permute.xlu1 %2638 }
 0x10e   : > { %2559 = vmatprep.subr.mxu1 %v5582_v52  ;;  %v2316_v25 = vpop.permute.xlu0 %2315  ;;  %4998 = vmatmul.mubr.msk.f32.vlgmr.msra.gmra.mrb[0].mxu1 %vm303_vm1, %v4996_v23 }
 0x10f   : > { %v2326_v26 = vsel %vm2325_vm13, %v2316_v25, %v2318_v16  ;;  %2560 = vmatpush1.msra.mxu1 %v5585_v53  ;;  %4666 = vrot.lane.b32.xlu1 %v5551_v34, %s5345_s13 }
 0x110   : > { %4664 = vrot.lane.b32.xlu0 %v5448_v3, %s5345_s13  ;;  %2338 = vmatpush1.msra.mxu0 %v2326_v26  ;;  %v4999_v3 = vld [vmem:[%s5926_s2 + $0x68] sm:$0xff]  ;;  %v5017_v26 = vld [vmem:[%s5926_s2 + $0x98] sm:$0xff] }
 0x111   : > { %4997 = vmatmul.mubr.msk.f32.vlgmr.msra.gmra.mrb[0].mxu0 %vm303_vm1, %v4996_v23  ;;  %2488 = vmatprep.subr.mxu0 %v5573_v49  ;;  %v2643_v2 = vpop.permute.xlu1 %2642 }
 0x112   : > { %2489 = vmatpush1.msra.mxu0 %v5595_v57  ;;  %v2641_v27 = vpop.permute.xlu0 %2640  ;;  %2552 = vmatprep.mubr.f32.mxu0 %v5321_v5 }
 0x113   : > { %v2648_v34 = vsel %vm2646_vm14, %v2639_v24, %v2641_v27  ;;  %2623 = vmatprep.mubr.f32.mxu1 %v5321_v5  ;;  %4829 = vperm.xlu1 %5237, %v4826_v0   ;;  %v2649_v32 = vsel %vm2646_vm14, %v2641_v27, %v2643_v2 }
 0x114   : > { %4658 = vrot.lane.b32.xlu0 %v5434_v1, %s5345_s13  ;;  %2658 = vmatprep.subr.mxu0 %v2648_v34 }
 0x115   : > { %v2637_v28 = vpop.permute.xlu1 %2636 }
 0x116   : > { %v2645_v29 = vpop.permute.xlu0 %2644  ;;  %5001 = vmatmul.mubr.msk.f32.vlgmr.msra.gmra.mrb[0].mxu1 %vm303_vm1, %v4999_v3  ;;  %v2647_v30 = vsel %vm2646_vm14, %v2637_v28, %v2639_v24 }
 0x117   : > { %v2650_v31 = vsel %vm2646_vm14, %v2643_v2, %v2645_v29  ;;  %2793 = vmatprep.mubr.f32.mxu1 %v5321_v5 }
 0x118   : > { %2729 = vmatprep.subr.mxu1 %v2650_v31 }
 0x119   : > { %5000 = vmatmul.mubr.msk.f32.vlgmr.msra.gmra.mrb[0].mxu0 %vm303_vm1, %v4999_v3  ;;  %2730 = vmatpush1.msra.mxu1 %v2649_v32  ;;  %v2812_v33 = vpop.permute.xlu1 %2811 }
 0x11a   : > { %2659 = vmatpush1.msra.mxu0 %v2647_v30  ;;  %v2810_v1 = vpop.permute.xlu0 %2809  ;;  %2722 = vmatprep.mubr.f32.mxu0 %v5321_v5 }
 0x11b   : > { %v2819_v35 = vsel %vm2817_vm15, %v2810_v1, %v2812_v33 }
 0x11c   : > { %2829 = vmatprep.subr.mxu0 %v2819_v35 }
 0x11d   : > { %v2816_v37 = vpop.permute.xlu1 %2815 }
 0x11e   : > { %v2814_v38 = vpop.permute.xlu0 %2813  ;;  %5004 = vmatmul.mubr.msk.f32.vlgmr.msra.gmra.mrb[0].mxu1 %vm303_vm1, %v5002_v36 }
 0x11f   : > { %v2820_v39 = vsel %vm2817_vm15, %v2812_v33, %v2814_v38  ;;  %v2821_v40 = vsel %vm2817_vm15, %v2814_v38, %v2816_v37  ;;  %2964 = vmatprep.mubr.f32.mxu1 %v5321_v5  ;;  %v5020_v33 = vld [vmem:[%s5926_s2 + $0xa0] sm:$0xff] }
 0x120   : > { %2900 = vmatprep.subr.mxu1 %v2821_v40 }
 0x121   : > { %2901 = vmatpush1.msra.mxu1 %v2820_v39  ;;  %v2980_v41 = vpop.permute.xlu1 %2979  ;;  %5003 = vmatmul.mubr.msk.f32.vlgmr.msra.gmra.mrb[0].mxu0 %vm303_vm1, %v5002_v36 }
 0x122   : > { %v2808_v42 = vpop.permute.xlu0 %2807  ;;  %2893 = vmatprep.mubr.f32.mxu0 %v5321_v5 }
 0x123   : > { %v2818_v43 = vsel %vm2817_vm15, %v2808_v42, %v2810_v1  ;;  %v5023_v42 = vld [vmem:[%s5926_s2 + $0xa8] sm:$0xff] }
 0x124   : > { %2830 = vmatpush1.msra.mxu0 %v2818_v43 }
 0x125   : > { %v2984_v45 = vpop.permute.xlu1 %2983 }
 0x126   : > { %v2982_v46 = vpop.permute.xlu0 %2981  ;;  %5007 = vmatmul.mubr.msk.f32.vlgmr.msra.gmra.mrb[0].mxu1 %vm303_vm1, %v5005_v44 }
 0x127   : > { %v2989_v47 = vsel %vm2987_vm0, %v2980_v41, %v2982_v46  ;;  %3134 = vmatprep.mubr.f32.mxu1 %v5321_v5  ;;  %v2990_v56 = vsel %vm2987_vm0, %v2982_v46, %v2984_v45 }
 0x128   : > { %2999 = vmatprep.subr.mxu0 %v2989_v47 }
 0x129   : > { %v2978_v48 = vpop.permute.xlu1 %2977  ;;  %5006 = vmatmul.mubr.msk.f32.vlgmr.msra.gmra.mrb[0].mxu0 %vm303_vm1, %v5005_v44 }
 0x12a   : > { %v2988_v50 = vsel %vm2987_vm0, %v2978_v48, %v2980_v41  ;;  %v2986_v51 = vpop.permute.xlu0 %2985  ;;  %3063 = vmatprep.mubr.f32.mxu0 %v5321_v5 }
 0x12b   : > { %3000 = vmatpush1.msra.mxu0 %v2988_v50  ;;  %v2991_v54 = vsel %vm2987_vm0, %v2984_v45, %v2986_v51 }
 0x12c   : > { %3070 = vmatprep.subr.mxu1 %v2991_v54 }
 0x12d   : > { %3071 = vmatpush1.msra.mxu1 %v2990_v56  ;;  %v3152_v58 = vpop.permute.xlu1 %3151 }
 0x12e   : > { %v3150_v59 = vpop.permute.xlu0 %3149  ;;  %5010 = vmatmul.mubr.msk.f32.vlgmr.msra.gmra.mrb[0].mxu1 %vm303_vm1, %v5008_v55 }
 0x12f   : > { %v3159_v60 = vsel %vm3157_vm2, %v3150_v59, %v3152_v58  ;;  %3304 = vmatprep.mubr.f32.mxu1 %v5321_v5 }
 0x130   : > { %3169 = vmatprep.subr.mxu0 %v3159_v60 }
 0x131   : > { %v3156_v61 = vpop.permute.xlu1 %3155  ;;  %5009 = vmatmul.mubr.msk.f32.vlgmr.msra.gmra.mrb[0].mxu0 %vm303_vm1, %v5008_v55 }
 0x132   : > { %v3154_v4 = vpop.permute.xlu0 %3153  ;;  %3233 = vmatprep.mubr.f32.mxu0 %v5321_v5 }
 0x133   : > { %v3160_v62 = vsel %vm3157_vm2, %v3152_v58, %v3154_v4  ;;  %v3161_v63 = vsel %vm3157_vm2, %v3154_v4, %v3156_v61  ;;  %v5029_v58 = vld [vmem:[%s5926_s2 + $0xb8] sm:$0xff] }
 0x134   : > { %3240 = vmatprep.subr.mxu1 %v3161_v63 }
 0x135   : > { %3241 = vmatpush1.msra.mxu1 %v3160_v62  ;;  %v3320_v7 = vpop.permute.xlu1 %3319 }
 0x136   : > { %v3148_v8 = vpop.permute.xlu0 %3147  ;;  %5013 = vmatmul.mubr.msk.f32.vlgmr.msra.gmra.mrb[0].mxu1 %vm303_vm1, %v5011_v6 }
 0x137   : > { %v3158_v9 = vsel %vm3157_vm2, %v3148_v8, %v3150_v59  ;;  %3474 = vmatprep.mubr.f32.mxu1 %v5321_v5 }
 0x138   : > { %3170 = vmatpush1.msra.mxu0 %v3158_v9 }
 0x139   : > { %v3324_v10 = vpop.permute.xlu1 %3323  ;;  %5012 = vmatmul.mubr.msk.f32.vlgmr.msra.gmra.mrb[0].mxu0 %vm303_vm1, %v5011_v6 }
 0x13a   : > { %v3322_v11 = vpop.permute.xlu0 %3321  ;;  %3403 = vmatprep.mubr.f32.mxu0 %v5321_v5 }
 0x13b   : > { %v3329_v12 = vsel %vm3327_vm3, %v3320_v7, %v3322_v11  ;;  %v3330_v18 = vsel %vm3327_vm3, %v3322_v11, %v3324_v10 }
 0x13c   : > { %3339 = vmatprep.subr.mxu0 %v3329_v12 }
 0x13d   : > { %v3318_v13 = vpop.permute.xlu1 %3317 }
 0x13e   : > { %v3328_v14 = vsel %vm3327_vm3, %v3318_v13, %v3320_v7  ;;  %v3326_v15 = vpop.permute.xlu0 %3325  ;;  %v5032_v7 = vld [vmem:[%s5926_s2 + $0xc0] sm:$0xff] }
 0x13f   : > { %3340 = vmatpush1.msra.mxu0 %v3328_v14  ;;  %v3331_v16 = vsel %vm3327_vm3, %v3324_v10, %v3326_v15  ;;  %v5035_v15 = vld [vmem:[%s5926_s2 + $0xc8] sm:$0xff] }
 0x140   : > { %3410 = vmatprep.subr.mxu1 %v3331_v16 }
 0x141   : > { %3411 = vmatpush1.msra.mxu1 %v3330_v18  ;;  %v3492_v19 = vpop.permute.xlu1 %3491  ;;  %5015 = vmatmul.mubr.msk.f32.vlgmr.msra.gmra.mrb[0].mxu0 %vm303_vm1, %v5014_v17 }
 0x142   : > { %v3490_v20 = vpop.permute.xlu0 %3489  ;;  %5016 = vmatmul.mubr.msk.f32.vlgmr.msra.gmra.mrb[0].mxu1 %vm303_vm1, %v5014_v17  ;;  %3573 = vmatprep.mubr.f32.mxu0 %v5321_v5 }
 0x143   : > { %v3499_v21 = vsel %vm3497_vm4, %v3490_v20, %v3492_v19  ;;  %3644 = vmatprep.mubr.f32.mxu1 %v5321_v5 }
 0x144   : > { %3509 = vmatprep.subr.mxu0 %v3499_v21 }
 0x145   : > { %v3496_v22 = vpop.permute.xlu1 %3495 }
 0x146   : > { %v3494_v23 = vpop.permute.xlu0 %3493 }
 0x147   : > { %v3500_v24 = vsel %vm3497_vm4, %v3492_v19, %v3494_v23  ;;  %v3501_v25 = vsel %vm3497_vm4, %v3494_v23, %v3496_v22 }
 0x148   : > { %3580 = vmatprep.subr.mxu1 %v3501_v25 }
 0x149   : > { %3581 = vmatpush1.msra.mxu1 %v3500_v24  ;;  %v3660_v0 = vpop.permute.xlu1 %3659  ;;  %v5038_v24 = vld [vmem:[%s5926_s2 + $0xd0] sm:$0xff] }
 0x14a   : > { %v3488_v2 = vpop.permute.xlu0 %3487  ;;  %5019 = vmatmul.mubr.msk.f32.vlgmr.msra.gmra.mrb[0].mxu1 %vm303_vm1, %v5017_v26 }
 0x14b   : > { %v3498_v27 = vsel %vm3497_vm4, %v3488_v2, %v3490_v20  ;;  %3814 = vmatprep.mubr.f32.mxu1 %v5321_v5 }
 0x14c   : > { %3510 = vmatpush1.msra.mxu0 %v3498_v27 }
 0x14d   : > { %v3664_v34 = vpop.permute.xlu1 %3663  ;;  %5018 = vmatmul.mubr.msk.f32.vlgmr.msra.gmra.mrb[0].mxu0 %vm303_vm1, %v5017_v26 }
 0x14e   : > { %v3662_v3 = vpop.permute.xlu0 %3661  ;;  %3743 = vmatprep.mubr.f32.mxu0 %v5321_v5 }
 0x14f   : > { %v3669_v28 = vsel %vm3667_vm5, %v3660_v0, %v3662_v3  ;;  %v3670_v1 = vsel %vm3667_vm5, %v3662_v3, %v3664_v34 }
 0x150   : > { %3679 = vmatprep.subr.mxu0 %v3669_v28 }
 0x151   : > { %v3658_v29 = vpop.permute.xlu1 %3657 }
 0x152   : > { %v3668_v30 = vsel %vm3667_vm5, %v3658_v29, %v3660_v0  ;;  %v3666_v31 = vpop.permute.xlu0 %3665 }
 0x153   : > { %3680 = vmatpush1.msra.mxu0 %v3668_v30  ;;  %v3671_v32 = vsel %vm3667_vm5, %v3664_v34, %v3666_v31 }
 0x154   : > { %3750 = vmatprep.subr.mxu1 %v3671_v32 }
 0x155   : > { %3751 = vmatpush1.msra.mxu1 %v3670_v1  ;;  %v3832_v35 = vpop.permute.xlu1 %3831  ;;  %5021 = vmatmul.mubr.msk.f32.vlgmr.msra.gmra.mrb[0].mxu0 %vm303_vm1, %v5020_v33 }
 0x156   : > { %5022 = vmatmul.mubr.msk.f32.vlgmr.msra.gmra.mrb[0].mxu1 %vm303_vm1, %v5020_v33  ;;  %v3830_v36 = vpop.permute.xlu0 %3829  ;;  %3913 = vmatprep.mubr.f32.mxu0 %v5321_v5 }
 0x157   : > { %v3839_v37 = vsel %vm3837_vm6, %v3830_v36, %v3832_v35  ;;  %3984 = vmatprep.mubr.f32.mxu1 %v5321_v5 }
 0x158   : > { %3849 = vmatprep.subr.mxu0 %v3839_v37 }
 0x159   : > { %v3836_v38 = vpop.permute.xlu1 %3835 }
 0x15a   : > { %v3834_v39 = vpop.permute.xlu0 %3833 }
 0x15b   : > { %v3840_v40 = vsel %vm3837_vm6, %v3832_v35, %v3834_v39  ;;  %v3841_v41 = vsel %vm3837_vm6, %v3834_v39, %v3836_v38 }
 0x15c   : > { %3920 = vmatprep.subr.mxu1 %v3841_v41 }
 0x15d   : > { %3921 = vmatpush1.msra.mxu1 %v3840_v40  ;;  %v4151_v43 = vpop.permute.xlu1 %4150 }
 0x15e   : > { %5025 = vmatmul.mubr.msk.f32.vlgmr.msra.gmra.mrb[0].mxu1 %vm303_vm1, %v5023_v42  ;;  %4071 = vmatprep.subr.mxu1 %v5582_v52  ;;  %v3828_v44 = vpop.permute.xlu0 %3827 }
 0x15f   : > { %v3838_v45 = vsel %vm3837_vm6, %v3828_v44, %v3830_v36  ;;  %4072 = vmatpush1.msra.mxu1 %v5585_v53  ;;  %4135 = vmatprep.mubr.f32.mxu1 %v5321_v5  ;;  %v5026_v53 = vld [vmem:[%s5926_s2 + $0xb0] sm:$0xff] }
 0x160   : > { %3850 = vmatpush1.msra.mxu0 %v3838_v45 }
 0x161   : > { %5024 = vmatmul.mubr.msk.f32.vlgmr.msra.gmra.mrb[0].mxu0 %vm303_vm1, %v5023_v42  ;;  %4000 = vmatprep.subr.mxu0 %v5573_v49  ;;  %v4155_v46 = vpop.permute.xlu1 %4154 }
 0x162   : > { %4001 = vmatpush1.msra.mxu0 %v5595_v57  ;;  %v4153_v47 = vpop.permute.xlu0 %4152  ;;  %4064 = vmatprep.mubr.f32.mxu0 %v5321_v5 }
 0x163   : > { %v4160_v52 = vsel %vm4158_vm7, %v4151_v43, %v4153_v47  ;;  %v4161_v57 = vsel %vm4158_vm7, %v4153_v47, %v4155_v46 }
 0x164   : > { %4170 = vmatprep.subr.mxu0 %v4160_v52 }
 0x165   : > { %v4149_v48 = vpop.permute.xlu1 %4148 }
 0x166   : > { %5028 = vmatmul.mubr.msk.f32.vlgmr.msra.gmra.mrb[0].mxu1 %vm303_vm1, %v5026_v53  ;;  %v4157_v50 = vpop.permute.xlu0 %4156  ;;  %v4159_v51 = vsel %vm4158_vm7, %v4149_v48, %v4151_v43 }
 0x167   : > { %v4162_v49 = vsel %vm4158_vm7, %v4155_v46, %v4157_v50  ;;  %4305 = vmatprep.mubr.f32.mxu1 %v5321_v5 }
 0x168   : > { %4241 = vmatprep.subr.mxu1 %v4162_v49 }
 0x169   : > { %5027 = vmatmul.mubr.msk.f32.vlgmr.msra.gmra.mrb[0].mxu0 %vm303_vm1, %v5026_v53  ;;  %4242 = vmatpush1.msra.mxu1 %v4161_v57  ;;  %v4323_v54 = vpop.permute.xlu1 %4322 }
 0x16a   : > { %4171 = vmatpush1.msra.mxu0 %v4159_v51  ;;  %v4321_v55 = vpop.permute.xlu0 %4320  ;;  %4234 = vmatprep.mubr.f32.mxu0 %v5321_v5 }
 0x16b   : > { %v4330_v56 = vsel %vm4328_vm8, %v4321_v55, %v4323_v54 }
 0x16c   : > { %4340 = vmatprep.subr.mxu0 %v4330_v56 }
 0x16d   : > { %v4327_v59 = vpop.permute.xlu1 %4326 }
 0x16e   : > { %5031 = vmatmul.mubr.msk.f32.vlgmr.msra.gmra.mrb[0].mxu1 %vm303_vm1, %v5029_v58  ;;  %v4325_v60 = vpop.permute.xlu0 %4324 }
 0x16f   : > { %v4331_v61 = vsel %vm4328_vm8, %v4323_v54, %v4325_v60  ;;  %v4332_v4 = vsel %vm4328_vm8, %v4325_v60, %v4327_v59  ;;  %4475 = vmatprep.mubr.f32.mxu1 %v5321_v5 }
 0x170   : > { %4411 = vmatprep.subr.mxu1 %v4332_v4 }
 0x171   : > { %5030 = vmatmul.mubr.msk.f32.vlgmr.msra.gmra.mrb[0].mxu0 %vm303_vm1, %v5029_v58  ;;  %4412 = vmatpush1.msra.mxu1 %v4331_v61  ;;  %v4491_v62 = vpop.permute.xlu1 %4490 }
 0x172   : > { %v4319_v63 = vpop.permute.xlu0 %4318  ;;  %4404 = vmatprep.mubr.f32.mxu0 %v5321_v5 }
 0x173   : > { %v4329_v6 = vsel %vm4328_vm8, %v4319_v63, %v4321_v55 }
 0x174   : > { %4341 = vmatpush1.msra.mxu0 %v4329_v6 }
 0x175   : > { %v4495_v8 = vpop.permute.xlu1 %4494 }
 0x176   : > { %5034 = vmatmul.mubr.msk.f32.vlgmr.msra.gmra.mrb[0].mxu1 %vm303_vm1, %v5032_v7  ;;  %v4493_v9 = vpop.permute.xlu0 %4492 }
 0x177   : > { %v4500_v10 = vsel %vm4498_vm9, %v4491_v62, %v4493_v9  ;;  %4645 = vmatprep.mubr.f32.mxu1 %v5321_v5  ;;  %v4501_v16 = vsel %vm4498_vm9, %v4493_v9, %v4495_v8 }
 0x178   : > { %4510 = vmatprep.subr.mxu0 %v4500_v10 }
 0x179   : > { %5033 = vmatmul.mubr.msk.f32.vlgmr.msra.gmra.mrb[0].mxu0 %vm303_vm1, %v5032_v7  ;;  %v4489_v11 = vpop.permute.xlu1 %4488 }
 0x17a   : > { %v4499_v12 = vsel %vm4498_vm9, %v4489_v11, %v4491_v62  ;;  %v4497_v13 = vpop.permute.xlu0 %4496  ;;  %4574 = vmatprep.mubr.f32.mxu0 %v5321_v5 }
 0x17b   : > { %4511 = vmatpush1.msra.mxu0 %v4499_v12  ;;  %v4502_v14 = vsel %vm4498_vm9, %v4495_v8, %v4497_v13 }
 0x17c   : > { %4581 = vmatprep.subr.mxu1 %v4502_v14 }
 0x17d   : > { %4582 = vmatpush1.msra.mxu1 %v4501_v16  ;;  %v4663_v17 = vpop.permute.xlu1 %4662 }
 0x17e   : > { %5037 = vmatmul.mubr.msk.f32.vlgmr.msra.gmra.mrb[0].mxu1 %vm303_vm1, %v5035_v15  ;;  %v4661_v18 = vpop.permute.xlu0 %4660 }
 0x17f   : > { %v4670_v19 = vsel %vm4668_vm10, %v4661_v18, %v4663_v17  ;;  %4815 = vmatprep.mubr.f32.mxu1 %v5321_v5 }
 0x180   : > { %4680 = vmatprep.subr.mxu0 %v4670_v19 }
 0x181   : > { %5036 = vmatmul.mubr.msk.f32.vlgmr.msra.gmra.mrb[0].mxu0 %vm303_vm1, %v5035_v15  ;;  %v4667_v20 = vpop.permute.xlu1 %4666 }
 0x182   : > { %v4665_v21 = vpop.permute.xlu0 %4664  ;;  %4744 = vmatprep.mubr.f32.mxu0 %v5321_v5 }
 0x183   : > { %v4671_v22 = vsel %vm4668_vm10, %v4663_v17, %v4665_v21  ;;  %v4672_v23 = vsel %vm4668_vm10, %v4665_v21, %v4667_v20 }
 0x184   : > { %4751 = vmatprep.subr.mxu1 %v4672_v23 }
 0x185   : > { %4752 = vmatpush1.msra.mxu1 %v4671_v22 }
 0x186   : > { %5040 = vmatmul.mubr.msk.f32.vlgmr.msra.gmra.mrb[0].mxu1 %vm303_vm1, %v5038_v24  ;;  %v4659_v25 = vpop.permute.xlu0 %4658 }
 0x187   : > { %v4669_v26 = vsel %vm4668_vm10, %v4659_v25, %v4661_v18 }
 0x188   : > { %4681 = vmatpush1.msra.mxu0 %v4669_v26 }
 0x189   : > { %5039 = vmatmul.mubr.msk.f32.vlgmr.msra.gmra.mrb[0].mxu0 %vm303_vm1, %v5038_v24 }
 0x192   : > { %v4830_v5 = vpop.permute.xlu1 %4829 }
 0x259   : > { %v4817_v0 = vpop.f32.mrb[0].mxu1 }
 0x25a   : > { %v4834_v2 = vadd.f32 %v4830_v5, %v4817_v0  ;;  %v4819_v27 = vpop.f32.mrb[1].mxu1 }
 0x25b   : > { %v4835_v34 = vadd.f32 %v4830_v5, %v4819_v27 }
 0x25c   : > { %4838 = vst [vmem:[%s246_s24 + $0x10] sm:$0xff] %v4834_v2  ;;  %v4746_v3 = vpop.f32.mrb[0].mxu0 }
 0x25d   : > { %4839 = vst [vmem:[%s246_s24 + $0x18] sm:$0xff] %v4835_v34  ;;  %v4832_v28 = vadd.f32 %v4830_v5, %v4746_v3  ;;  %v4748_v29 = vpop.f32.mrb[1].mxu0 }
 0x25e   : > { %v4833_v30 = vadd.f32 %v4830_v5, %v4748_v29 }
 0x25f   : > { %4836 = vst [vmem:[%s246_s24] sm:$0xff] %v4832_v28 }
 0x260   : > { %4837 = vst [vmem:[%s246_s24 + $0x8] sm:$0xff] %v4833_v30 }
 0x261   : > { %5252 = shalt.err (!%p5249_p5)
}
 0x262   : > { %s5253_s9 = scalar_lea.hbm %s5877_s30, 512  ;;  %s5257_s13 = scalar_lea.hbm %s5928_s4, 1024 }
 0x263   : > { %p5254_p6 = scmp.ne.s32.totalorder %s5877_s30, %s5253_s9  ;;  %p5258_p10 = scmp.lt.u32.totalorder %s5877_s30, %s5928_s4 }
 0x264   : > { %p5259_p11 = scmp.lt.u32.totalorder %s5257_s13, %s5253_s9  ;;  %p5261_p13 = scmp.lt.u32.totalorder %s5253_s9, %s5877_s30 }
 0x265   : > { %p5255_p7 = pnand %p5254_p6, %p5412_p4 }
 0x266   : > { %p5260_p12 = por %p5259_p11, %p5258_p10 }
 0x267   : > { %p5256_p9 = pneg %p5255_p7 }
 0x268   : > { %p5262_p0 = por %p5261_p13, %p5260_p12 }
 0x26a   : > { %p5263_p1 = pnand %p5262_p0, %p5256_p9 }
 0x26c   : > { %5266 = shalt.err (!%p5263_p1)
}
 0x26d   : > { %5155 = dma.vmem_to_hbm [thread:$0]  (%p5412_p4), %s5879_s12, 512, %s5877_s30, %s4841_s18  }
 0x26e PF: > { %p5161_p2 = scmp.ge.s32.totalorder %s5317_s20, 2  ;;  %s4869_s22 = sand.u32 1, %s5297_s15  }
 0x26f   : > { %s4870_s24 = scalar_lea.sflag [#allocation3], %s4869_s22 }
 0x270   : > { %p5158_p3 = pnand %p5161_p2, %p5419_p8 }
 0x272   : > { %5292 = dma.done.wait (!%p5158_p3), %s4870_s24, 512  }
 0x273   : > { %5294 = vsyncadd (!%p5158_p3), %s4870_s24, 4294966784  ;;  %s17_s20 = sadd.s32 1, %s5317_s20   ;;  %s5931_s15 = smov %s5301_s16 }
 0x274   : > { %p14_p5 = scmp.ge.s32.totalorder %s17_s20, 4   ;;  %s5932_s16 = smov %s5305_s17 }
 0x275   : > { %s5933_s17 = smov %s5425_s28  ;;  %s5934_s18 = smov %s5313_s19 }
 0x276   : > { %s5935_s19 = smov %s5937_s23  ;;  %16 = sbr.rel (!%p14_p5) target bundleno = 4 (0x4), region = 100 }
 0x27d   :  { %4875 = vsyncpa [#allocation3], 1 }
 0x27e   :  { %4877 = vsyncpa [#allocation3 + $0x1], 1 }

// kernel: tpu_custom_call.1
= control target key start
LH: loop header
LB: loop body
LE: loop exit
PB: predicated region body
PF: predicated region fallthrough
CT: control target
= control target key end

     0   :  { %9 = vsyncpa [#allocation3], 0  ;;  %s5924_s0 = inlined_call_operand.vmem [shape: f32[2,8,1024], index: 0, kind: input, shape index: {}]   ;;  %s5925_s1 = inlined_call_operand.vmem [shape: f32[2,8,1024], index: 1, kind: input, shape index: {}]   ;;  %s5926_s2 = inlined_call_operand.vmem [shape: f32[27,8,8], index: 2, kind: input, shape index: {}]   ;;  %s5927_s3 = inlined_call_operand.vmem [shape: f32[8,1], index: 3, kind: input, shape index: {}]   ;;  %s5928_s4 = inlined_call_operand.hbm [shape: f32[2,8,512], index: 4, kind: output, shape index: {}]  }
   0x1   :  { %11 = vsyncpa [#allocation3 + $0x1], 0  ;;  %s5372_s15 = smov 0   ;;  %s5374_s16 = smov 0  }
   0x2   :  { %s5376_s17 = smov 0   ;;  %s5378_s18 = smov 0  }
   0x3   :  { %s5380_s19 = smov 0   ;;  %s5382_s20 = smov 0  }
   0x4 LB: > { %s4951_s21 = sadd.s32 4294967295, %s5317_s20   ;;  %s4952_s22 = sadd.s32 4294967294, %s5317_s20   ;;  %s5317_s20 = sphi %s5382_s20, %s17_s20   ;;  %s5313_s19 = sphi %s5380_s19, %s5935_s19   ;;  %s5309_s18 = sphi %s5378_s18, %s5934_s18   ;;  %s5305_s17 = sphi %s5376_s17, %s5933_s17   ;;  %s5301_s16 = sphi %s5374_s16, %s5932_s16   ;;  %s5297_s15 = sphi %s5372_s15, %s5931_s15  }
   0x5   : > { %s29_s23 = sadd.s32 1, %s5313_s19  ;;  %s138_s24 = sadd.s32 1, %s5305_s17 }
   0x6   : > { %p31_p0 = scmp.ge.s32.totalorder %s29_s23, 2  ;;  %p148_p1 = scmp.ne.s32.totalorder %s5305_s17, %s5301_s16 }
   0x7   : > { %p149_p2 = scmp.eq.s32.totalorder %s4951_s21, 1  ;;  %p154_p3 = scmp.ne.s32.totalorder %s5301_s16, %s5297_s15 }
   0x8   : > { %s5937_s23 = smov (%p31_p0, %s29_s23), 0  ;;  %p155_p5 = scmp.eq.s32.totalorder %s4952_s22, 1 }
   0x9   : > { %p5412_p4 = por %p149_p2, %p148_p1  ;;  %s133_s26 = ssub.s32 %s5313_s19, %s5937_s23 }
   0xa   : > { %p4955_p6 = scmp.ge.s32.totalorder %s5317_s20, 1  ;;  %p136_p7 = scmp.eq.s32.totalorder %s133_s26, 0 }
   0xb   : > { %p5419_p8 = por %p155_p5, %p154_p3  ;;  %p207_p9 = scmp.lt.s32.totalorder %s5317_s20, 3 }
   0xc   : > { %s5425_s28 = scalar_select %p136_p7, %s5305_s17, %s138_s24  }
   0xd   : > { %p208_p10 = pnand %p4955_p6, %p207_p9 }
   0xe   : > { %p248_p11 = scmp.lt.s32.totalorder (!%p208_p10), %s5309_s18, 1  ;;  %s5319_s9 = smov (!%p208_p10), 62   ;;  %v5321_v5 = vmov (!%p208_p10), 0.0   ;;  %vm294_vm0 = vcmask (!%p208_p10), 506880   ;;  %v4961_v15 = vld [vmem:[%s5926_s2 + $0x8] sm:$0xff] (!%p208_p10)  ;;  %vm303_vm1 = vcmask (!%p208_p10), 64512  }
   0xf   : > { %211 = sbr.rel (%p208_p10) target bundleno = 622 (0x26e), region = 36  ;;  %s5320_s13 = smov (!%p208_p10), 63   ;;  %371 = vmatprep.mubr.f32.mxu0 (!%p208_p10), %v5321_v5  ;;  %442 = vmatprep.mubr.f32.mxu1 (!%p208_p10), %v5321_v5  ;;  %vm459_vm2 = vcmask (!%p208_p10), 515072   ;;  %vm625_vm3 = vcmask (!%p208_p10), 498688   ;;  %v276_v24 = vld [vmem:[%s5926_s2] sm:$0xff] (!%p208_p10)  ;;  %v4966_v33 = vld [vmem:[%s5926_s2 + $0x10] sm:$0xff] (!%p208_p10) }
  0x10   : > { %s5322_s14 = smov (!%p208_p10), 61   ;;  %s5323_s21 = smov (!%p208_p10), 41   ;;  %vm795_vm4 = vcmask (!%p208_p10), 334848   ;;  %vm965_vm5 = vcmask (!%p208_p10), 326656   ;;  %v4969_v45 = vld [vmem:[%s5926_s2 + $0x18] sm:$0xff] (!%p208_p10)  ;;  %v4972_v54 = vld [vmem:[%s5926_s2 + $0x20] sm:$0xff] (!%p208_p10) }
  0x11   : > { %s5324_s22 = smov (!%p208_p10), 40   ;;  %s5325_s24 = smov (!%p208_p10), 39   ;;  %vm1135_vm6 = vcmask (!%p208_p10), 318464   ;;  %vm1305_vm7 = vcmask (!%p208_p10), 154624   ;;  %vm1475_vm8 = vcmask (!%p208_p10), 146432   ;;  %vm1645_vm9 = vcmask (!%p208_p10), 138240  }
  0x12   : > { %s5326_s26 = smov (!%p208_p10), 19   ;;  %s5329_s5 = smov (!%p208_p10), 86   ;;  %vm1815_vm10 = vcmask (!%p208_p10), 703488   ;;  %vm1985_vm11 = vcmask (!%p208_p10), 687104   ;;  %vm2155_vm12 = vcmask (!%p208_p10), 670720   ;;  %vm2325_vm13 = vcmask (!%p208_p10), 343040  }
  0x13   : > { %s5330_s6 = smov (!%p208_p10), 84   ;;  %s5333_s11 = smov (!%p208_p10), 38   ;;  %vm2646_vm14 = vcmask (!%p208_p10), 310272   ;;  %vm2817_vm15 = vcmask (!%p208_p10), 1031168  }
  0x14   : > { %s5338_s10 = smov (!%p208_p10), 106  }
  0x16   : > { %s249_s29 = scalar_select %p248_p11, %s5309_s18, 1 }
  0x18   : > { %s5046_s30 = sshll.u32 %s249_s29, 6  ;;  %s5327_s29 = smov 18  }
  0x19   : > { %s255_s7 = scalar_lea.vmem %s5924_s0, %s5046_s30  ;;  %s5048_s8 = sadd.s32 32, %s5046_s30 }
  0x1a   : > { %v5432_v0 = vld [vmem:[%s255_s7 + $0x18] sm:$0xff]  ;;  %v5434_v1 = vld [vmem:[%s255_s7 + $0x8] sm:$0xff]  ;;  %v5438_v2 = vld [vmem:[%s255_s7 + $0x10] sm:$0xff]  ;;  %s5443_s12 = scalar_lea.vmem %s5925_s1, %s5048_s8  ;;  %s5328_s30 = smov 17  }
  0x1b   : > { %290 = vrot.lane.b32.xlu1 %v5432_v0, %s5319_s9  ;;  %286 = vrot.lane.b32.xlu0 %v5434_v1, %s5319_s9  ;;  %v5448_v3 = vld [vmem:[%s5443_s12] sm:$0xff]  ;;  %s5332_s8 = smov 42   ;;  %v5551_v34 = vld [vmem:[%s5443_s12 + $0x8] sm:$0xff]  ;;  %s5335_s12 = smov 124  }
  0x1c   : > { %v5450_v4 = vld [vmem:[%s255_s7] sm:$0xff]  ;;  %s5331_s7 = smov 82  }
  0x1f   : > { %451 = vrot.lane.b32.xlu1 %v5434_v1, %s5320_s13  ;;  %288 = vrot.lane.b32.xlu0 %v5438_v2, %s5319_s9 }
  0x23   : > { %292 = vrot.lane.b32.xlu1 %v5448_v3, %s5319_s9  ;;  %284 = vrot.lane.b32.xlu0 %v5450_v4, %s5319_s9  ;;  %s5343_s9 = smov 102  }
  0x27   : > { %455 = vrot.lane.b32.xlu1 %v5432_v0, %s5320_s13  ;;  %453 = vrot.lane.b32.xlu0 %v5438_v2, %s5320_s13 }
  0x2b   : > { %449 = vrot.lane.b32.xlu1 %v5450_v4, %s5320_s13  ;;  %457 = vrot.lane.b32.xlu0 %v5448_v3, %s5320_s13  ;;  %s5345_s13 = smov 99  }
  0x2f   : > { %619 = vrot.lane.b32.xlu1 %v5438_v2, %s5322_s14  ;;  %617 = vrot.lane.b32.xlu0 %v5434_v1, %s5322_s14 }
  0x33   : > { %623 = vrot.lane.b32.xlu1 %v5448_v3, %s5322_s14  ;;  %621 = vrot.lane.b32.xlu0 %v5432_v0, %s5322_s14 }
  0x37   : > { %787 = vrot.lane.b32.xlu1 %v5434_v1, %s5323_s21  ;;  %615 = vrot.lane.b32.xlu0 %v5450_v4, %s5322_s14  ;;  %s5339_s14 = smov 103  }
  0x3b   : > { %791 = vrot.lane.b32.xlu1 %v5432_v0, %s5323_s21  ;;  %789 = vrot.lane.b32.xlu0 %v5438_v2, %s5323_s21 }
  0x3f   : > { %785 = vrot.lane.b32.xlu1 %v5450_v4, %s5323_s21  ;;  %793 = vrot.lane.b32.xlu0 %v5448_v3, %s5323_s21  ;;  %s5334_s21 = smov 126  }
  0x43   : > { %959 = vrot.lane.b32.xlu1 %v5438_v2, %s5324_s22  ;;  %957 = vrot.lane.b32.xlu0 %v5434_v1, %s5324_s22 }
  0x47   : > { %963 = vrot.lane.b32.xlu1 %v5448_v3, %s5324_s22  ;;  %961 = vrot.lane.b32.xlu0 %v5432_v0, %s5324_s22 }
  0x4b   : > { %1127 = vrot.lane.b32.xlu1 %v5434_v1, %s5325_s24  ;;  %955 = vrot.lane.b32.xlu0 %v5450_v4, %s5324_s22  ;;  %s5049_s22 = sshll.u32 %s5309_s18, 9 }
  0x4f   : > { %1131 = vrot.lane.b32.xlu1 %v5432_v0, %s5325_s24  ;;  %1129 = vrot.lane.b32.xlu0 %v5438_v2, %s5325_s24 }
  0x53   : > { %1125 = vrot.lane.b32.xlu1 %v5450_v4, %s5325_s24  ;;  %1133 = vrot.lane.b32.xlu0 %v5448_v3, %s5325_s24  ;;  %s5340_s24 = smov 43  }
  0x57   : > { %1299 = vrot.lane.b32.xlu1 %v5438_v2, %s5326_s26  ;;  %1297 = vrot.lane.b32.xlu0 %v5434_v1, %s5326_s26 }
  0x5b   : > { %1303 = vrot.lane.b32.xlu1 %v5448_v3, %s5326_s26  ;;  %1301 = vrot.lane.b32.xlu0 %v5432_v0, %s5326_s26 }
  0x5f   : > { %1467 = vrot.lane.b32.xlu1 %v5434_v1, %s5327_s29  ;;  %1295 = vrot.lane.b32.xlu0 %v5450_v4, %s5326_s26 }
  0x63   : > { %1471 = vrot.lane.b32.xlu1 %v5432_v0, %s5327_s29  ;;  %1469 = vrot.lane.b32.xlu0 %v5438_v2, %s5327_s29 }
  0x67   : > { %1465 = vrot.lane.b32.xlu1 %v5450_v4, %s5327_s29  ;;  %1473 = vrot.lane.b32.xlu0 %v5448_v3, %s5327_s29  ;;  %s5341_s29 = smov 37  }
  0x6b   : > { %1639 = vrot.lane.b32.xlu1 %v5438_v2, %s5328_s30  ;;  %1637 = vrot.lane.b32.xlu0 %v5434_v1, %s5328_s30 }
  0x6f   : > { %1643 = vrot.lane.b32.xlu1 %v5448_v3, %s5328_s30  ;;  %1641 = vrot.lane.b32.xlu0 %v5432_v0, %s5328_s30 }
  0x73   : > { %1807 = vrot.lane.b32.xlu1 %v5434_v1, %s5329_s5  ;;  %1635 = vrot.lane.b32.xlu0 %v5450_v4, %s5328_s30  ;;  %s5336_s30 = smov 122  }
  0x77   : > { %1811 = vrot.lane.b32.xlu1 %v5432_v0, %s5329_s5  ;;  %1809 = vrot.lane.b32.xlu0 %v5438_v2, %s5329_s5 }
  0x7b   : > { %1805 = vrot.lane.b32.xlu1 %v5450_v4, %s5329_s5  ;;  %1813 = vrot.lane.b32.xlu0 %v5448_v3, %s5329_s5 }
  0x7f   : > { %1979 = vrot.lane.b32.xlu1 %v5438_v2, %s5330_s6  ;;  %1977 = vrot.lane.b32.xlu0 %v5434_v1, %s5330_s6 }
  0x83   : > { %1983 = vrot.lane.b32.xlu1 %v5448_v3, %s5330_s6  ;;  %1981 = vrot.lane.b32.xlu0 %v5432_v0, %s5330_s6 }
  0x87   : > { %2147 = vrot.lane.b32.xlu1 %v5434_v1, %s5331_s7  ;;  %1975 = vrot.lane.b32.xlu0 %v5450_v4, %s5330_s6  ;;  %s5342_s6 = smov 105  }
  0x8b   : > { %2151 = vrot.lane.b32.xlu1 %v5432_v0, %s5331_s7  ;;  %2149 = vrot.lane.b32.xlu0 %v5438_v2, %s5331_s7 }
  0x8d   : > { %v291_v6 = vpop.permute.xlu1 %290  ;;  %v287_v7 = vpop.permute.xlu0 %286 }
  0x8f   : > { %2145 = vrot.lane.b32.xlu1 %v5450_v4, %s5331_s7  ;;  %2153 = vrot.lane.b32.xlu0 %v5448_v3, %s5331_s7  ;;  %s5337_s7 = smov 109  }
  0x91   : > { %v452_v8 = vpop.permute.xlu1 %451  ;;  %v289_v9 = vpop.permute.xlu0 %288 }
  0x92   : > { %v296_v10 = vsel %vm294_vm0, %v287_v7, %v289_v9  ;;  %v297_v16 = vsel %vm294_vm0, %v289_v9, %v291_v6 }
  0x93   : > { %307 = vmatprep.subr.mxu0 %v296_v10  ;;  %2319 = vrot.lane.b32.xlu1 %v5438_v2, %s5332_s8 }
  0x94   : > { %2317 = vrot.lane.b32.xlu0 %v5434_v1, %s5332_s8 }
  0x95   : > { %v293_v11 = vpop.permute.xlu1 %292  ;;  %v285_v12 = vpop.permute.xlu0 %284 }
  0x96   : > { %v298_v13 = vsel %vm294_vm0, %v291_v6, %v293_v11  ;;  %v295_v14 = vsel %vm294_vm0, %v285_v12, %v287_v7  ;;  %v4975_v7 = vld [vmem:[%s5926_s2 + $0x28] sm:$0xff]  ;;  %vm2987_vm0 = vcmask 1014784  }
  0x97   : > { %378 = vmatprep.subr.mxu1 %v298_v13  ;;  %2323 = vrot.lane.b32.xlu1 %v5448_v3, %s5332_s8 }
  0x98   : > { %2321 = vrot.lane.b32.xlu0 %v5432_v0, %s5332_s8  ;;  %308 = vmatpush1.msra.mxu0 %v295_v14 }
  0x99   : > { %379 = vmatpush1.msra.mxu1 %v297_v16  ;;  %v456_v17 = vpop.permute.xlu1 %455  ;;  %v454_v18 = vpop.permute.xlu0 %453  ;;  %4962 = vmatmul.mubr.msk.f32.vlgmr.msra.gmra.mrb[0].mxu0 %vm303_vm1, %v4961_v15  ;;  %v4978_v16 = vld [vmem:[%s5926_s2 + $0x30] sm:$0xff] }
  0x9a   : > { %v461_v19 = vsel %vm459_vm2, %v452_v8, %v454_v18  ;;  %4963 = vmatmul.mubr.msk.f32.vlgmr.msra.gmra.mrb[0].mxu1 %vm303_vm1, %v4961_v15  ;;  %535 = vmatprep.mubr.f32.mxu0 %v5321_v5  ;;  %v462_v25 = vsel %vm459_vm2, %v454_v18, %v456_v17 }
  0x9b   : > { %2638 = vrot.lane.b32.xlu1 %v5434_v1, %s5333_s11  ;;  %471 = vmatprep.subr.mxu0 %v461_v19 }
  0x9c   : > { %2315 = vrot.lane.b32.xlu0 %v5450_v4, %s5332_s8  ;;  %606 = vmatprep.mubr.f32.mxu1 %v5321_v5 }
  0x9d   : > { %v450_v20 = vpop.permute.xlu1 %449  ;;  %v458_v21 = vpop.permute.xlu0 %457 }
  0x9e   : > { %v460_v22 = vsel %vm459_vm2, %v450_v20, %v452_v8  ;;  %v463_v23 = vsel %vm459_vm2, %v456_v17, %v458_v21  ;;  %vm3157_vm2 = vcmask 998400  }
  0x9f   : > { %2642 = vrot.lane.b32.xlu1 %v5432_v0, %s5333_s11  ;;  %472 = vmatpush1.msra.mxu0 %v460_v22 }
  0xa0   : > { %2640 = vrot.lane.b32.xlu0 %v5438_v2, %s5333_s11  ;;  %542 = vmatprep.subr.mxu1 %v463_v23 }
  0xa1   : > { %543 = vmatpush1.msra.mxu1 %v462_v25  ;;  %v620_v26 = vpop.permute.xlu1 %619  ;;  %v618_v27 = vpop.permute.xlu0 %617  ;;  %4964 = vmatmul.mubr.msk.f32.vlgmr.msra.gmra.mrb[0].mxu0 %vm303_vm1, %v276_v24 }
  0xa2   : > { %v627_v28 = vsel %vm625_vm3, %v618_v27, %v620_v26  ;;  %4965 = vmatmul.mubr.msk.f32.vlgmr.msra.gmra.mrb[0].mxu1 %vm303_vm1, %v276_v24  ;;  %701 = vmatprep.mubr.f32.mxu0 %v5321_v5 }
  0xa3   : > { %2636 = vrot.lane.b32.xlu1 %v5450_v4, %s5333_s11  ;;  %637 = vmatprep.subr.mxu0 %v627_v28 }
  0xa4   : > { %2644 = vrot.lane.b32.xlu0 %v5448_v3, %s5333_s11  ;;  %772 = vmatprep.mubr.f32.mxu1 %v5321_v5 }
  0xa5   : > { %v624_v29 = vpop.permute.xlu1 %623  ;;  %v622_v30 = vpop.permute.xlu0 %621 }
  0xa6   : > { %v629_v31 = vsel %vm625_vm3, %v622_v30, %v624_v29  ;;  %v628_v32 = vsel %vm625_vm3, %v620_v26, %v622_v30 }
  0xa7   : > { %2811 = vrot.lane.b32.xlu1 %v5432_v0, %s5334_s21  ;;  %708 = vmatprep.subr.mxu1 %v629_v31 }
  0xa8   : > { %2809 = vrot.lane.b32.xlu0 %v5438_v2, %s5334_s21  ;;  %709 = vmatpush1.msra.mxu1 %v628_v32 }
  0xa9   : > { %v788_v35 = vpop.permute.xlu1 %787  ;;  %v616_v36 = vpop.permute.xlu0 %615 }
  0xaa   : > { %v626_v37 = vsel %vm625_vm3, %v616_v36, %v618_v27  ;;  %4968 = vmatmul.mubr.msk.f32.vlgmr.msra.gmra.mrb[0].mxu1 %vm303_vm1, %v4966_v33  ;;  %v4981_v27 = vld [vmem:[%s5926_s2 + $0x38] sm:$0xff]  ;;  %vm3327_vm3 = vcmask 891904  }
  0xab   : > { %2815 = vrot.lane.b32.xlu1 %v5551_v34, %s5334_s21  ;;  %638 = vmatpush1.msra.mxu0 %v626_v37  ;;  %v4984_v37 = vld [vmem:[%s5926_s2 + $0x40] sm:$0xff] }
  0xac   : > { %2813 = vrot.lane.b32.xlu0 %v5448_v3, %s5334_s21  ;;  %4967 = vmatmul.mubr.msk.f32.vlgmr.msra.gmra.mrb[0].mxu0 %vm303_vm1, %v4966_v33 }
  0xad   : > { %v792_v38 = vpop.permute.xlu1 %791  ;;  %v790_v39 = vpop.permute.xlu0 %789  ;;  %942 = vmatprep.mubr.f32.mxu1 %v5321_v5  ;;  %871 = vmatprep.mubr.f32.mxu0 %v5321_v5 }
  0xae   : > { %v797_v40 = vsel %vm795_vm4, %v788_v35, %v790_v39  ;;  %v798_v46 = vsel %vm795_vm4, %v790_v39, %v792_v38 }
  0xaf   : > { %2979 = vrot.lane.b32.xlu1 %v5438_v2, %s5335_s12  ;;  %807 = vmatprep.subr.mxu0 %v797_v40 }
  0xb0   : > { %2807 = vrot.lane.b32.xlu0 %v5434_v1, %s5334_s21 }
  0xb1   : > { %v786_v41 = vpop.permute.xlu1 %785  ;;  %v794_v42 = vpop.permute.xlu0 %793 }
  0xb2   : > { %v796_v43 = vsel %vm795_vm4, %v786_v41, %v788_v35  ;;  %v799_v44 = vsel %vm795_vm4, %v792_v38, %v794_v42  ;;  %vm3497_vm4 = vcmask 867328  }
  0xb3   : > { %2983 = vrot.lane.b32.xlu1 %v5448_v3, %s5335_s12  ;;  %808 = vmatpush1.msra.mxu0 %v796_v43 }
  0xb4   : > { %2981 = vrot.lane.b32.xlu0 %v5432_v0, %s5335_s12  ;;  %878 = vmatprep.subr.mxu1 %v799_v44 }
  0xb5   : > { %879 = vmatpush1.msra.mxu1 %v798_v46  ;;  %v960_v47 = vpop.permute.xlu1 %959  ;;  %v958_v48 = vpop.permute.xlu0 %957  ;;  %4970 = vmatmul.mubr.msk.f32.vlgmr.msra.gmra.mrb[0].mxu0 %vm303_vm1, %v4969_v45 }
  0xb6   : > { %v5573_v49 = vsel %vm965_vm5, %v958_v48, %v960_v47  ;;  %4971 = vmatmul.mubr.msk.f32.vlgmr.msra.gmra.mrb[0].mxu1 %vm303_vm1, %v4969_v45  ;;  %1041 = vmatprep.mubr.f32.mxu0 %v5321_v5 }
  0xb7   : > { %2977 = vrot.lane.b32.xlu1 %v5434_v1, %s5335_s12  ;;  %977 = vmatprep.subr.mxu0 %v5573_v49 }
  0xb8   : > { %2985 = vrot.lane.b32.xlu0 %v5551_v34, %s5335_s12  ;;  %1112 = vmatprep.mubr.f32.mxu1 %v5321_v5 }
  0xb9   : > { %v964_v50 = vpop.permute.xlu1 %963  ;;  %v962_v51 = vpop.permute.xlu0 %961 }
  0xba   : > { %v5582_v52 = vsel %vm965_vm5, %v962_v51, %v964_v50  ;;  %v5585_v53 = vsel %vm965_vm5, %v960_v47, %v962_v51 }
  0xbb   : > { %3151 = vrot.lane.b32.xlu1 %v5432_v0, %s5336_s30  ;;  %1048 = vmatprep.subr.mxu1 %v5582_v52 }
  0xbc   : > { %3149 = vrot.lane.b32.xlu0 %v5438_v2, %s5336_s30  ;;  %1049 = vmatpush1.msra.mxu1 %v5585_v53 }
  0xbd   : > { %v1128_v55 = vpop.permute.xlu1 %1127  ;;  %v956_v56 = vpop.permute.xlu0 %955 }
  0xbe   : > { %v5595_v57 = vsel %vm965_vm5, %v956_v56, %v958_v48  ;;  %4974 = vmatmul.mubr.msk.f32.vlgmr.msra.gmra.mrb[0].mxu1 %vm303_vm1, %v4972_v54  ;;  %v4987_v48 = vld [vmem:[%s5926_s2 + $0x48] sm:$0xff]  ;;  %vm3667_vm5 = vcmask 842752  }
  0xbf   : > { %3155 = vrot.lane.b32.xlu1 %v5551_v34, %s5336_s30  ;;  %978 = vmatpush1.msra.mxu0 %v5595_v57 }
  0xc0   : > { %3153 = vrot.lane.b32.xlu0 %v5448_v3, %s5336_s30  ;;  %4973 = vmatmul.mubr.msk.f32.vlgmr.msra.gmra.mrb[0].mxu0 %vm303_vm1, %v4972_v54 }
  0xc1   : > { %v1132_v58 = vpop.permute.xlu1 %1131  ;;  %v1130_v59 = vpop.permute.xlu0 %1129  ;;  %1282 = vmatprep.mubr.f32.mxu1 %v5321_v5  ;;  %1211 = vmatprep.mubr.f32.mxu0 %v5321_v5 }
  0xc2   : > { %v1137_v60 = vsel %vm1135_vm6, %v1128_v55, %v1130_v59  ;;  %v1138_v8 = vsel %vm1135_vm6, %v1130_v59, %v1132_v58 }
  0xc3   : > { %3319 = vrot.lane.b32.xlu1 %v5434_v1, %s5337_s7  ;;  %1147 = vmatprep.subr.mxu0 %v1137_v60 }
  0xc4   : > { %3147 = vrot.lane.b32.xlu0 %v5434_v1, %s5336_s30  ;;  %s5877_s30 = scalar_lea.hbm %s5928_s4, %s5049_s22 }
  0xc5   : > { %v1126_v61 = vpop.permute.xlu1 %1125  ;;  %v1134_v62 = vpop.permute.xlu0 %1133 }
  0xc6   : > { %v1136_v63 = vsel %vm1135_vm6, %v1126_v61, %v1128_v55  ;;  %v1139_v6 = vsel %vm1135_vm6, %v1132_v58, %v1134_v62  ;;  %v4990_v61 = vld [vmem:[%s5926_s2 + $0x50] sm:$0xff]  ;;  %vm3837_vm6 = vcmask 351232  }
  0xc7   : > { %3323 = vrot.lane.b32.xlu1 %v5432_v0, %s5337_s7  ;;  %1148 = vmatpush1.msra.mxu0 %v1136_v63 }
  0xc8   : > { %3321 = vrot.lane.b32.xlu0 %v5438_v2, %s5337_s7  ;;  %1218 = vmatprep.subr.mxu1 %v1139_v6 }
  0xc9   : > { %1219 = vmatpush1.msra.mxu1 %v1138_v8  ;;  %v1300_v9 = vpop.permute.xlu1 %1299  ;;  %v1298_v10 = vpop.permute.xlu0 %1297  ;;  %4976 = vmatmul.mubr.msk.f32.vlgmr.msra.gmra.mrb[0].mxu0 %vm303_vm1, %v4975_v7 }
  0xca   : > { %v1307_v11 = vsel %vm1305_vm7, %v1298_v10, %v1300_v9  ;;  %4977 = vmatmul.mubr.msk.f32.vlgmr.msra.gmra.mrb[0].mxu1 %vm303_vm1, %v4975_v7  ;;  %1381 = vmatprep.mubr.f32.mxu0 %v5321_v5 }
  0xcb   : > { %3317 = vrot.lane.b32.xlu1 %v5450_v4, %s5337_s7  ;;  %1317 = vmatprep.subr.mxu0 %v1307_v11 }
  0xcc   : > { %3325 = vrot.lane.b32.xlu0 %v5448_v3, %s5337_s7  ;;  %1452 = vmatprep.mubr.f32.mxu1 %v5321_v5 }
  0xcd   : > { %v1304_v12 = vpop.permute.xlu1 %1303  ;;  %v1302_v13 = vpop.permute.xlu0 %1301 }
  0xce   : > { %v1308_v14 = vsel %vm1305_vm7, %v1300_v9, %v1302_v13  ;;  %v1309_v15 = vsel %vm1305_vm7, %v1302_v13, %v1304_v12  ;;  %v4993_v13 = vld [vmem:[%s5926_s2 + $0x58] sm:$0xff] }
  0xcf   : > { %3491 = vrot.lane.b32.xlu1 %v5438_v2, %s5338_s10  ;;  %1388 = vmatprep.subr.mxu1 %v1309_v15 }
  0xd0   : > { %3489 = vrot.lane.b32.xlu0 %v5434_v1, %s5338_s10  ;;  %1389 = vmatpush1.msra.mxu1 %v1308_v14 }
  0xd1   : > { %v1468_v17 = vpop.permute.xlu1 %1467  ;;  %v1296_v18 = vpop.permute.xlu0 %1295 }
  0xd2   : > { %v1306_v19 = vsel %vm1305_vm7, %v1296_v18, %v1298_v10  ;;  %4980 = vmatmul.mubr.msk.f32.vlgmr.msra.gmra.mrb[0].mxu1 %vm303_vm1, %v4978_v16  ;;  %vm4158_vm7 = vcmask 302080  }
  0xd3   : > { %3495 = vrot.lane.b32.xlu1 %v5448_v3, %s5338_s10  ;;  %1318 = vmatpush1.msra.mxu0 %v1306_v19 }
  0xd4   : > { %3493 = vrot.lane.b32.xlu0 %v5432_v0, %s5338_s10  ;;  %4979 = vmatmul.mubr.msk.f32.vlgmr.msra.gmra.mrb[0].mxu0 %vm303_vm1, %v4978_v16 }
  0xd5   : > { %v1472_v20 = vpop.permute.xlu1 %1471  ;;  %v1470_v21 = vpop.permute.xlu0 %1469  ;;  %1622 = vmatprep.mubr.f32.mxu1 %v5321_v5  ;;  %1551 = vmatprep.mubr.f32.mxu0 %v5321_v5 }
  0xd6   : > { %v1477_v22 = vsel %vm1475_vm8, %v1468_v17, %v1470_v21  ;;  %v1478_v28 = vsel %vm1475_vm8, %v1470_v21, %v1472_v20 }
  0xd7   : > { %3659 = vrot.lane.b32.xlu1 %v5434_v1, %s5339_s14  ;;  %1487 = vmatprep.subr.mxu0 %v1477_v22 }
  0xd8   : > { %3487 = vrot.lane.b32.xlu0 %v5450_v4, %s5338_s10 }
  0xd9   : > { %v1466_v23 = vpop.permute.xlu1 %1465  ;;  %v1474_v24 = vpop.permute.xlu0 %1473 }
  0xda   : > { %v1476_v25 = vsel %vm1475_vm8, %v1466_v23, %v1468_v17  ;;  %v1479_v26 = vsel %vm1475_vm8, %v1472_v20, %v1474_v24  ;;  %v5344_v20 = vmov 0   ;;  %v4996_v23 = vld [vmem:[%s5926_s2 + $0x60] sm:$0xff]  ;;  %vm4328_vm8 = vcmask 859136  }
  0xdb   : > { %3663 = vrot.lane.b32.xlu1 %v5432_v0, %s5339_s14  ;;  %1488 = vmatpush1.msra.mxu0 %v1476_v25 }
  0xdc   : > { %3661 = vrot.lane.b32.xlu0 %v5438_v2, %s5339_s14  ;;  %1558 = vmatprep.subr.mxu1 %v1479_v26 }
  0xdd   : > { %1559 = vmatpush1.msra.mxu1 %v1478_v28  ;;  %v1640_v29 = vpop.permute.xlu1 %1639  ;;  %v1638_v30 = vpop.permute.xlu0 %1637  ;;  %4982 = vmatmul.mubr.msk.f32.vlgmr.msra.gmra.mrb[0].mxu0 %vm303_vm1, %v4981_v27 }
  0xde   : > { %v1647_v31 = vsel %vm1645_vm9, %v1638_v30, %v1640_v29  ;;  %4983 = vmatmul.mubr.msk.f32.vlgmr.msra.gmra.mrb[0].mxu1 %vm303_vm1, %v4981_v27  ;;  %1721 = vmatprep.mubr.f32.mxu0 %v5321_v5 }
  0xdf   : > { %3657 = vrot.lane.b32.xlu1 %v5450_v4, %s5339_s14  ;;  %1657 = vmatprep.subr.mxu0 %v1647_v31 }
  0xe0   : > { %3665 = vrot.lane.b32.xlu0 %v5448_v3, %s5339_s14  ;;  %1792 = vmatprep.mubr.f32.mxu1 %v5321_v5  ;;  %s244_s14 = sand.u32 1, %s5301_s16  }
  0xe1   : > { %v1644_v32 = vpop.permute.xlu1 %1643  ;;  %v1642_v33 = vpop.permute.xlu0 %1641  ;;  %5237 = vset.pattern.permute.xlu1 %v5344_v20  ;;  %5238 = vset.pattern.permute.xlu0 %v5344_v20  ;;  %s4956_s21 = sshll.u32 %s244_s14, 5  ;;  %s4841_s18 = scalar_lea.sflag [#allocation3], %s244_s14 }
  0xe2   : > { %v1648_v35 = vsel %vm1645_vm9, %v1640_v29, %v1642_v33  ;;  %v1649_v36 = vsel %vm1645_vm9, %v1642_v33, %v1644_v32 }
  0xe3   : > { %3831 = vrot.lane.b32.xlu1 %v5438_v2, %s5340_s24  ;;  %1728 = vmatprep.subr.mxu1 %v1649_v36  ;;  %v5002_v36 = vld [vmem:[%s5926_s2 + $0x70] sm:$0xff] }
  0xe4   : > { %3829 = vrot.lane.b32.xlu0 %v5434_v1, %s5340_s24  ;;  %1729 = vmatpush1.msra.mxu1 %v1648_v35 }
  0xe5   : > { %v1808_v38 = vpop.permute.xlu1 %1807  ;;  %v1636_v39 = vpop.permute.xlu0 %1635 }
  0xe6   : > { %v1646_v40 = vsel %vm1645_vm9, %v1636_v39, %v1638_v30  ;;  %4986 = vmatmul.mubr.msk.f32.vlgmr.msra.gmra.mrb[0].mxu1 %vm303_vm1, %v4984_v37  ;;  %vm4498_vm9 = vcmask 834560  }
  0xe7   : > { %3835 = vrot.lane.b32.xlu1 %v5448_v3, %s5340_s24  ;;  %1658 = vmatpush1.msra.mxu0 %v1646_v40 }
  0xe8   : > { %3833 = vrot.lane.b32.xlu0 %v5432_v0, %s5340_s24  ;;  %4985 = vmatmul.mubr.msk.f32.vlgmr.msra.gmra.mrb[0].mxu0 %vm303_vm1, %v4984_v37 }
  0xe9   : > { %v1812_v41 = vpop.permute.xlu1 %1811  ;;  %v1810_v42 = vpop.permute.xlu0 %1809  ;;  %1962 = vmatprep.mubr.f32.mxu1 %v5321_v5  ;;  %1891 = vmatprep.mubr.f32.mxu0 %v5321_v5 }
  0xea   : > { %v1817_v43 = vsel %vm1815_vm10, %v1808_v38, %v1810_v42  ;;  %v1818_v50 = vsel %vm1815_vm10, %v1810_v42, %v1812_v41 }
  0xeb   : > { %4150 = vrot.lane.b32.xlu1 %v5434_v1, %s5341_s29  ;;  %1827 = vmatprep.subr.mxu0 %v1817_v43 }
  0xec   : > { %3827 = vrot.lane.b32.xlu0 %v5450_v4, %s5340_s24  ;;  %s246_s24 = scalar_lea.vmem [#allocation2], %s4956_s21 }
  0xed   : > { %v1806_v44 = vpop.permute.xlu1 %1805  ;;  %v1814_v45 = vpop.permute.xlu0 %1813  ;;  %s4857_s12 = sshll.u32 %s246_s24, 4  ;;  %s5879_s12 = int_to_ptr.vmem [resolvable:$true] %s4857_s12 }
  0xee   : > { %v1816_v46 = vsel %vm1815_vm10, %v1806_v44, %v1808_v38  ;;  %v1819_v47 = vsel %vm1815_vm10, %v1812_v41, %v1814_v45  ;;  %v5005_v44 = vld [vmem:[%s5926_s2 + $0x78] sm:$0xff]  ;;  %vm4668_vm10 = vcmask 809984   ;;  %s5239_s5 = scalar_lea.vmem %s5879_s12, 512 }
  0xef   : > { %4154 = vrot.lane.b32.xlu1 %v5432_v0, %s5341_s29  ;;  %1828 = vmatpush1.msra.mxu0 %v1816_v46  ;;  %p5240_p12 = scmp.ne.s32.totalorder %s5879_s12, %s5239_s5 }
  0xf0   : > { %4152 = vrot.lane.b32.xlu0 %v5438_v2, %s5341_s29  ;;  %1898 = vmatprep.subr.mxu1 %v1819_v47 }
  0xf1   : > { %1899 = vmatpush1.msra.mxu1 %v1818_v50  ;;  %v1980_v51 = vpop.permute.xlu1 %1979  ;;  %v1978_v54 = vpop.permute.xlu0 %1977  ;;  %4988 = vmatmul.mubr.msk.f32.vlgmr.msra.gmra.mrb[0].mxu0 %vm303_vm1, %v4987_v48  ;;  %p5241_p13 = pnand %p5240_p12, %p5412_p4 }
  0xf2   : > { %v1987_v55 = vsel %vm1985_vm11, %v1978_v54, %v1980_v51  ;;  %4989 = vmatmul.mubr.msk.f32.vlgmr.msra.gmra.mrb[0].mxu1 %vm303_vm1, %v4987_v48  ;;  %2061 = vmatprep.mubr.f32.mxu0 %v5321_v5 }
  0xf3   : > { %4148 = vrot.lane.b32.xlu1 %v5450_v4, %s5341_s29  ;;  %1997 = vmatprep.subr.mxu0 %v1987_v55  ;;  %v5008_v55 = vld [vmem:[%s5926_s2 + $0x80] sm:$0xff]  ;;  %p5242_p0 = pneg %p5241_p13 }
  0xf4   : > { %4156 = vrot.lane.b32.xlu0 %v5448_v3, %s5341_s29  ;;  %2132 = vmatprep.mubr.f32.mxu1 %v5321_v5 }
  0xf5   : > { %v1984_v56 = vpop.permute.xlu1 %1983  ;;  %v1982_v58 = vpop.permute.xlu0 %1981 }
  0xf6   : > { %v1988_v59 = vsel %vm1985_vm11, %v1980_v51, %v1982_v58  ;;  %v1989_v60 = vsel %vm1985_vm11, %v1982_v58, %v1984_v56 }
  0xf7   : > { %4322 = vrot.lane.b32.xlu1 %v5432_v0, %s5342_s6  ;;  %2068 = vmatprep.subr.mxu1 %v1989_v60 }
  0xf8   : > { %4320 = vrot.lane.b32.xlu0 %v5438_v2, %s5342_s6  ;;  %2069 = vmatpush1.msra.mxu1 %v1988_v59 }
  0xf9   : > { %v2148_v4 = vpop.permute.xlu1 %2147  ;;  %v1976_v62 = vpop.permute.xlu0 %1975 }
  0xfa   : > { %v1986_v63 = vsel %vm1985_vm11, %v1976_v62, %v1978_v54  ;;  %4992 = vmatmul.mubr.msk.f32.vlgmr.msra.gmra.mrb[0].mxu1 %vm303_vm1, %v4990_v61 }
  0xfb   : > { %4326 = vrot.lane.b32.xlu1 %v5551_v34, %s5342_s6  ;;  %1998 = vmatpush1.msra.mxu0 %v1986_v63 }
  0xfc   : > { %4324 = vrot.lane.b32.xlu0 %v5448_v3, %s5342_s6  ;;  %4991 = vmatmul.mubr.msk.f32.vlgmr.msra.gmra.mrb[0].mxu0 %vm303_vm1, %v4990_v61 }
  0xfd   : > { %v2152_v6 = vpop.permute.xlu1 %2151  ;;  %v2150_v7 = vpop.permute.xlu0 %2149  ;;  %2302 = vmatprep.mubr.f32.mxu1 %v5321_v5  ;;  %2231 = vmatprep.mubr.f32.mxu0 %v5321_v5 }
  0xfe   : > { %v2157_v8 = vsel %vm2155_vm12, %v2148_v4, %v2150_v7  ;;  %v2158_v14 = vsel %vm2155_vm12, %v2150_v7, %v2152_v6 }
  0xff   : > { %4490 = vrot.lane.b32.xlu1 %v5438_v2, %s5343_s9  ;;  %2167 = vmatprep.subr.mxu0 %v2157_v8 }
 0x100   : > { %4318 = vrot.lane.b32.xlu0 %v5434_v1, %s5342_s6  ;;  %s5346_s6 = smov [#allocation2]  }
 0x101   : > { %v2146_v9 = vpop.permute.xlu1 %2145  ;;  %v2154_v10 = vpop.permute.xlu0 %2153  ;;  %s5243_s7 = sshll.u32 %s5346_s6, 4  ;;  %s5244_s7 = int_to_ptr.vmem [resolvable:$false] %s5243_s7 }
 0x102   : > { %v2156_v11 = vsel %vm2155_vm12, %v2146_v9, %v2148_v4  ;;  %v2159_v12 = vsel %vm2155_vm12, %v2152_v6, %v2154_v10  ;;  %v5011_v6 = vld [vmem:[%s5926_s2 + $0x88] sm:$0xff]  ;;  %s5245_s8 = scalar_lea.vmem %s5244_s7, 1024  ;;  %p5246_p1 = scmp.lt.s32.totalorder %s5879_s12, %s5244_s7 }
 0x103   : > { %4494 = vrot.lane.b32.xlu1 %v5448_v3, %s5343_s9  ;;  %2168 = vmatpush1.msra.mxu0 %v2156_v11  ;;  %p5247_p2 = scmp.lt.s32.totalorder %s5245_s8, %s5239_s5 }
 0x104   : > { %4492 = vrot.lane.b32.xlu0 %v5432_v0, %s5343_s9  ;;  %2238 = vmatprep.subr.mxu1 %v2159_v12 }
 0x105   : > { %2239 = vmatpush1.msra.mxu1 %v2158_v14  ;;  %v2320_v15 = vpop.permute.xlu1 %2319  ;;  %4994 = vmatmul.mubr.msk.f32.vlgmr.msra.gmra.mrb[0].mxu0 %vm303_vm1, %v4993_v13  ;;  %p5248_p3 = por %p5247_p2, %p5246_p1 }
 0x106   : > { %v2318_v16 = vpop.permute.xlu0 %2317  ;;  %4995 = vmatmul.mubr.msk.f32.vlgmr.msra.gmra.mrb[0].mxu1 %vm303_vm1, %v4993_v13  ;;  %2401 = vmatprep.mubr.f32.mxu0 %v5321_v5 }
 0x107   : > { %4488 = vrot.lane.b32.xlu1 %v5434_v1, %s5343_s9  ;;  %v2327_v17 = vsel %vm2325_vm13, %v2318_v16, %v2320_v15  ;;  %2472 = vmatprep.mubr.f32.mxu1 %v5321_v5  ;;  %p5249_p5 = pnand %p5248_p3, %p5242_p0 }
 0x108   : > { %4496 = vrot.lane.b32.xlu0 %v5551_v34, %s5343_s9  ;;  %2337 = vmatprep.subr.mxu0 %v2327_v17  ;;  %v5014_v17 = vld [vmem:[%s5926_s2 + $0x90] sm:$0xff] }
 0x109   : > { %v2324_v18 = vpop.permute.xlu1 %2323 }
 0x10a   : > { %v2322_v19 = vpop.permute.xlu0 %2321 }
 0x10b   : > { %v2328_v21 = vsel %vm2325_vm13, %v2320_v15, %v2322_v19  ;;  %4662 = vrot.lane.b32.xlu1 %v5432_v0, %s5345_s13  ;;  %v2329_v22 = vsel %vm2325_vm13, %v2322_v19, %v2324_v18  ;;  %v4826_v0 = vld [vmem:[%s5927_s3] sm:$0xff] }
 0x10c   : > { %4660 = vrot.lane.b32.xlu0 %v5438_v2, %s5345_s13  ;;  %2408 = vmatprep.subr.mxu1 %v2329_v22 }
 0x10d   : > { %2409 = vmatpush1.msra.mxu1 %v2328_v21  ;;  %v2639_v24 = vpop.permute.xlu1 %2638 }
 0x10e   : > { %2559 = vmatprep.subr.mxu1 %v5582_v52  ;;  %v2316_v25 = vpop.permute.xlu0 %2315  ;;  %4998 = vmatmul.mubr.msk.f32.vlgmr.msra.gmra.mrb[0].mxu1 %vm303_vm1, %v4996_v23 }
 0x10f   : > { %v2326_v26 = vsel %vm2325_vm13, %v2316_v25, %v2318_v16  ;;  %2560 = vmatpush1.msra.mxu1 %v5585_v53  ;;  %4666 = vrot.lane.b32.xlu1 %v5551_v34, %s5345_s13 }
 0x110   : > { %4664 = vrot.lane.b32.xlu0 %v5448_v3, %s5345_s13  ;;  %2338 = vmatpush1.msra.mxu0 %v2326_v26  ;;  %v4999_v3 = vld [vmem:[%s5926_s2 + $0x68] sm:$0xff]  ;;  %v5017_v26 = vld [vmem:[%s5926_s2 + $0x98] sm:$0xff] }
 0x111   : > { %4997 = vmatmul.mubr.msk.f32.vlgmr.msra.gmra.mrb[0].mxu0 %vm303_vm1, %v4996_v23  ;;  %2488 = vmatprep.subr.mxu0 %v5573_v49  ;;  %v2643_v2 = vpop.permute.xlu1 %2642 }
 0x112   : > { %2489 = vmatpush1.msra.mxu0 %v5595_v57  ;;  %v2641_v27 = vpop.permute.xlu0 %2640  ;;  %2552 = vmatprep.mubr.f32.mxu0 %v5321_v5 }
 0x113   : > { %v2648_v34 = vsel %vm2646_vm14, %v2639_v24, %v2641_v27  ;;  %2623 = vmatprep.mubr.f32.mxu1 %v5321_v5  ;;  %4829 = vperm.xlu1 %5237, %v4826_v0   ;;  %v2649_v32 = vsel %vm2646_vm14, %v2641_v27, %v2643_v2 }
 0x114   : > { %4658 = vrot.lane.b32.xlu0 %v5434_v1, %s5345_s13  ;;  %2658 = vmatprep.subr.mxu0 %v2648_v34 }
 0x115   : > { %v2637_v28 = vpop.permute.xlu1 %2636 }
 0x116   : > { %v2645_v29 = vpop.permute.xlu0 %2644  ;;  %5001 = vmatmul.mubr.msk.f32.vlgmr.msra.gmra.mrb[0].mxu1 %vm303_vm1, %v4999_v3  ;;  %v2647_v30 = vsel %vm2646_vm14, %v2637_v28, %v2639_v24 }
 0x117   : > { %v2650_v31 = vsel %vm2646_vm14, %v2643_v2, %v2645_v29  ;;  %2793 = vmatprep.mubr.f32.mxu1 %v5321_v5 }
 0x118   : > { %2729 = vmatprep.subr.mxu1 %v2650_v31 }
 0x119   : > { %5000 = vmatmul.mubr.msk.f32.vlgmr.msra.gmra.mrb[0].mxu0 %vm303_vm1, %v4999_v3  ;;  %2730 = vmatpush1.msra.mxu1 %v2649_v32  ;;  %v2812_v33 = vpop.permute.xlu1 %2811 }
 0x11a   : > { %2659 = vmatpush1.msra.mxu0 %v2647_v30  ;;  %v2810_v1 = vpop.permute.xlu0 %2809  ;;  %2722 = vmatprep.mubr.f32.mxu0 %v5321_v5 }
 0x11b   : > { %v2819_v35 = vsel %vm2817_vm15, %v2810_v1, %v2812_v33 }
 0x11c   : > { %2829 = vmatprep.subr.mxu0 %v2819_v35 }
 0x11d   : > { %v2816_v37 = vpop.permute.xlu1 %2815 }
 0x11e   : > { %v2814_v38 = vpop.permute.xlu0 %2813  ;;  %5004 = vmatmul.mubr.msk.f32.vlgmr.msra.gmra.mrb[0].mxu1 %vm303_vm1, %v5002_v36 }
 0x11f   : > { %v2820_v39 = vsel %vm2817_vm15, %v2812_v33, %v2814_v38  ;;  %v2821_v40 = vsel %vm2817_vm15, %v2814_v38, %v2816_v37  ;;  %2964 = vmatprep.mubr.f32.mxu1 %v5321_v5  ;;  %v5020_v33 = vld [vmem:[%s5926_s2 + $0xa0] sm:$0xff] }
 0x120   : > { %2900 = vmatprep.subr.mxu1 %v2821_v40 }
 0x121   : > { %2901 = vmatpush1.msra.mxu1 %v2820_v39  ;;  %v2980_v41 = vpop.permute.xlu1 %2979  ;;  %5003 = vmatmul.mubr.msk.f32.vlgmr.msra.gmra.mrb[0].mxu0 %vm303_vm1, %v5002_v36 }
 0x122   : > { %v2808_v42 = vpop.permute.xlu0 %2807  ;;  %2893 = vmatprep.mubr.f32.mxu0 %v5321_v5 }
 0x123   : > { %v2818_v43 = vsel %vm2817_vm15, %v2808_v42, %v2810_v1  ;;  %v5023_v42 = vld [vmem:[%s5926_s2 + $0xa8] sm:$0xff] }
 0x124   : > { %2830 = vmatpush1.msra.mxu0 %v2818_v43 }
 0x125   : > { %v2984_v45 = vpop.permute.xlu1 %2983 }
 0x126   : > { %v2982_v46 = vpop.permute.xlu0 %2981  ;;  %5007 = vmatmul.mubr.msk.f32.vlgmr.msra.gmra.mrb[0].mxu1 %vm303_vm1, %v5005_v44 }
 0x127   : > { %v2989_v47 = vsel %vm2987_vm0, %v2980_v41, %v2982_v46  ;;  %3134 = vmatprep.mubr.f32.mxu1 %v5321_v5  ;;  %v2990_v56 = vsel %vm2987_vm0, %v2982_v46, %v2984_v45 }
 0x128   : > { %2999 = vmatprep.subr.mxu0 %v2989_v47 }
 0x129   : > { %v2978_v48 = vpop.permute.xlu1 %2977  ;;  %5006 = vmatmul.mubr.msk.f32.vlgmr.msra.gmra.mrb[0].mxu0 %vm303_vm1, %v5005_v44 }
 0x12a   : > { %v2988_v50 = vsel %vm2987_vm0, %v2978_v48, %v2980_v41  ;;  %v2986_v51 = vpop.permute.xlu0 %2985  ;;  %3063 = vmatprep.mubr.f32.mxu0 %v5321_v5 }
 0x12b   : > { %3000 = vmatpush1.msra.mxu0 %v2988_v50  ;;  %v2991_v54 = vsel %vm2987_vm0, %v2984_v45, %v2986_v51 }
 0x12c   : > { %3070 = vmatprep.subr.mxu1 %v2991_v54 }
 0x12d   : > { %3071 = vmatpush1.msra.mxu1 %v2990_v56  ;;  %v3152_v58 = vpop.permute.xlu1 %3151 }
 0x12e   : > { %v3150_v59 = vpop.permute.xlu0 %3149  ;;  %5010 = vmatmul.mubr.msk.f32.vlgmr.msra.gmra.mrb[0].mxu1 %vm303_vm1, %v5008_v55 }
 0x12f   : > { %v3159_v60 = vsel %vm3157_vm2, %v3150_v59, %v3152_v58  ;;  %3304 = vmatprep.mubr.f32.mxu1 %v5321_v5 }
 0x130   : > { %3169 = vmatprep.subr.mxu0 %v3159_v60 }
 0x131   : > { %v3156_v61 = vpop.permute.xlu1 %3155  ;;  %5009 = vmatmul.mubr.msk.f32.vlgmr.msra.gmra.mrb[0].mxu0 %vm303_vm1, %v5008_v55 }
 0x132   : > { %v3154_v4 = vpop.permute.xlu0 %3153  ;;  %3233 = vmatprep.mubr.f32.mxu0 %v5321_v5 }
 0x133   : > { %v3160_v62 = vsel %vm3157_vm2, %v3152_v58, %v3154_v4  ;;  %v3161_v63 = vsel %vm3157_vm2, %v3154_v4, %v3156_v61  ;;  %v5029_v58 = vld [vmem:[%s5926_s2 + $0xb8] sm:$0xff] }
 0x134   : > { %3240 = vmatprep.subr.mxu1 %v3161_v63 }
 0x135   : > { %3241 = vmatpush1.msra.mxu1 %v3160_v62  ;;  %v3320_v7 = vpop.permute.xlu1 %3319 }
 0x136   : > { %v3148_v8 = vpop.permute.xlu0 %3147  ;;  %5013 = vmatmul.mubr.msk.f32.vlgmr.msra.gmra.mrb[0].mxu1 %vm303_vm1, %v5011_v6 }
 0x137   : > { %v3158_v9 = vsel %vm3157_vm2, %v3148_v8, %v3150_v59  ;;  %3474 = vmatprep.mubr.f32.mxu1 %v5321_v5 }
 0x138   : > { %3170 = vmatpush1.msra.mxu0 %v3158_v9 }
 0x139   : > { %v3324_v10 = vpop.permute.xlu1 %3323  ;;  %5012 = vmatmul.mubr.msk.f32.vlgmr.msra.gmra.mrb[0].mxu0 %vm303_vm1, %v5011_v6 }
 0x13a   : > { %v3322_v11 = vpop.permute.xlu0 %3321  ;;  %3403 = vmatprep.mubr.f32.mxu0 %v5321_v5 }
 0x13b   : > { %v3329_v12 = vsel %vm3327_vm3, %v3320_v7, %v3322_v11  ;;  %v3330_v18 = vsel %vm3327_vm3, %v3322_v11, %v3324_v10 }
 0x13c   : > { %3339 = vmatprep.subr.mxu0 %v3329_v12 }
 0x13d   : > { %v3318_v13 = vpop.permute.xlu1 %3317 }
 0x13e   : > { %v3328_v14 = vsel %vm3327_vm3, %v3318_v13, %v3320_v7  ;;  %v3326_v15 = vpop.permute.xlu0 %3325  ;;  %v5032_v7 = vld [vmem:[%s5926_s2 + $0xc0] sm:$0xff] }
 0x13f   : > { %3340 = vmatpush1.msra.mxu0 %v3328_v14  ;;  %v3331_v16 = vsel %vm3327_vm3, %v3324_v10, %v3326_v15  ;;  %v5035_v15 = vld [vmem:[%s5926_s2 + $0xc8] sm:$0xff] }
 0x140   : > { %3410 = vmatprep.subr.mxu1 %v3331_v16 }
 0x141   : > { %3411 = vmatpush1.msra.mxu1 %v3330_v18  ;;  %v3492_v19 = vpop.permute.xlu1 %3491  ;;  %5015 = vmatmul.mubr.msk.f32.vlgmr.msra.gmra.mrb[0].mxu0 %vm303_vm1, %v5014_v17 }
 0x142   : > { %v3490_v20 = vpop.permute.xlu0 %3489  ;;  %5016 = vmatmul.mubr.msk.f32.vlgmr.msra.gmra.mrb[0].mxu1 %vm303_vm1, %v5014_v17  ;;  %3573 = vmatprep.mubr.f32.mxu0 %v5321_v5 }
 0x143   : > { %v3499_v21 = vsel %vm3497_vm4, %v3490_v20, %v3492_v19  ;;  %3644 = vmatprep.mubr.f32.mxu1 %v5321_v5 }
 0x144   : > { %3509 = vmatprep.subr.mxu0 %v3499_v21 }
 0x145   : > { %v3496_v22 = vpop.permute.xlu1 %3495 }
 0x146   : > { %v3494_v23 = vpop.permute.xlu0 %3493 }
 0x147   : > { %v3500_v24 = vsel %vm3497_vm4, %v3492_v19, %v3494_v23  ;;  %v3501_v25 = vsel %vm3497_vm4, %v3494_v23, %v3496_v22 }
 0x148   : > { %3580 = vmatprep.subr.mxu1 %v3501_v25 }
 0x149   : > { %3581 = vmatpush1.msra.mxu1 %v3500_v24  ;;  %v3660_v0 = vpop.permute.xlu1 %3659  ;;  %v5038_v24 = vld [vmem:[%s5926_s2 + $0xd0] sm:$0xff] }
 0x14a   : > { %v3488_v2 = vpop.permute.xlu0 %3487  ;;  %5019 = vmatmul.mubr.msk.f32.vlgmr.msra.gmra.mrb[0].mxu1 %vm303_vm1, %v5017_v26 }
 0x14b   : > { %v3498_v27 = vsel %vm3497_vm4, %v3488_v2, %v3490_v20  ;;  %3814 = vmatprep.mubr.f32.mxu1 %v5321_v5 }
 0x14c   : > { %3510 = vmatpush1.msra.mxu0 %v3498_v27 }
 0x14d   : > { %v3664_v34 = vpop.permute.xlu1 %3663  ;;  %5018 = vmatmul.mubr.msk.f32.vlgmr.msra.gmra.mrb[0].mxu0 %vm303_vm1, %v5017_v26 }
 0x14e   : > { %v3662_v3 = vpop.permute.xlu0 %3661  ;;  %3743 = vmatprep.mubr.f32.mxu0 %v5321_v5 }
 0x14f   : > { %v3669_v28 = vsel %vm3667_vm5, %v3660_v0, %v3662_v3  ;;  %v3670_v1 = vsel %vm3667_vm5, %v3662_v3, %v3664_v34 }
 0x150   : > { %3679 = vmatprep.subr.mxu0 %v3669_v28 }
 0x151   : > { %v3658_v29 = vpop.permute.xlu1 %3657 }
 0x152   : > { %v3668_v30 = vsel %vm3667_vm5, %v3658_v29, %v3660_v0  ;;  %v3666_v31 = vpop.permute.xlu0 %3665 }
 0x153   : > { %3680 = vmatpush1.msra.mxu0 %v3668_v30  ;;  %v3671_v32 = vsel %vm3667_vm5, %v3664_v34, %v3666_v31 }
 0x154   : > { %3750 = vmatprep.subr.mxu1 %v3671_v32 }
 0x155   : > { %3751 = vmatpush1.msra.mxu1 %v3670_v1  ;;  %v3832_v35 = vpop.permute.xlu1 %3831  ;;  %5021 = vmatmul.mubr.msk.f32.vlgmr.msra.gmra.mrb[0].mxu0 %vm303_vm1, %v5020_v33 }
 0x156   : > { %5022 = vmatmul.mubr.msk.f32.vlgmr.msra.gmra.mrb[0].mxu1 %vm303_vm1, %v5020_v33  ;;  %v3830_v36 = vpop.permute.xlu0 %3829  ;;  %3913 = vmatprep.mubr.f32.mxu0 %v5321_v5 }
 0x157   : > { %v3839_v37 = vsel %vm3837_vm6, %v3830_v36, %v3832_v35  ;;  %3984 = vmatprep.mubr.f32.mxu1 %v5321_v5 }
 0x158   : > { %3849 = vmatprep.subr.mxu0 %v3839_v37 }
 0x159   : > { %v3836_v38 = vpop.permute.xlu1 %3835 }
 0x15a   : > { %v3834_v39 = vpop.permute.xlu0 %3833 }
 0x15b   : > { %v3840_v40 = vsel %vm3837_vm6, %v3832_v35, %v3834_v39  ;;  %v3841_v41 = vsel %vm3837_vm6, %v3834_v39, %v3836_v38 }
 0x15c   : > { %3920 = vmatprep.subr.mxu1 %v3841_v41 }
 0x15d   : > { %3921 = vmatpush1.msra.mxu1 %v3840_v40  ;;  %v4151_v43 = vpop.permute.xlu1 %4150 }
 0x15e   : > { %5025 = vmatmul.mubr.msk.f32.vlgmr.msra.gmra.mrb[0].mxu1 %vm303_vm1, %v5023_v42  ;;  %4071 = vmatprep.subr.mxu1 %v5582_v52  ;;  %v3828_v44 = vpop.permute.xlu0 %3827 }
 0x15f   : > { %v3838_v45 = vsel %vm3837_vm6, %v3828_v44, %v3830_v36  ;;  %4072 = vmatpush1.msra.mxu1 %v5585_v53  ;;  %4135 = vmatprep.mubr.f32.mxu1 %v5321_v5  ;;  %v5026_v53 = vld [vmem:[%s5926_s2 + $0xb0] sm:$0xff] }
 0x160   : > { %3850 = vmatpush1.msra.mxu0 %v3838_v45 }
 0x161   : > { %5024 = vmatmul.mubr.msk.f32.vlgmr.msra.gmra.mrb[0].mxu0 %vm303_vm1, %v5023_v42  ;;  %4000 = vmatprep.subr.mxu0 %v5573_v49  ;;  %v4155_v46 = vpop.permute.xlu1 %4154 }
 0x162   : > { %4001 = vmatpush1.msra.mxu0 %v5595_v57  ;;  %v4153_v47 = vpop.permute.xlu0 %4152  ;;  %4064 = vmatprep.mubr.f32.mxu0 %v5321_v5 }
 0x163   : > { %v4160_v52 = vsel %vm4158_vm7, %v4151_v43, %v4153_v47  ;;  %v4161_v57 = vsel %vm4158_vm7, %v4153_v47, %v4155_v46 }
 0x164   : > { %4170 = vmatprep.subr.mxu0 %v4160_v52 }
 0x165   : > { %v4149_v48 = vpop.permute.xlu1 %4148 }
 0x166   : > { %5028 = vmatmul.mubr.msk.f32.vlgmr.msra.gmra.mrb[0].mxu1 %vm303_vm1, %v5026_v53  ;;  %v4157_v50 = vpop.permute.xlu0 %4156  ;;  %v4159_v51 = vsel %vm4158_vm7, %v4149_v48, %v4151_v43 }
 0x167   : > { %v4162_v49 = vsel %vm4158_vm7, %v4155_v46, %v4157_v50  ;;  %4305 = vmatprep.mubr.f32.mxu1 %v5321_v5 }
 0x168   : > { %4241 = vmatprep.subr.mxu1 %v4162_v49 }
 0x169   : > { %5027 = vmatmul.mubr.msk.f32.vlgmr.msra.gmra.mrb[0].mxu0 %vm303_vm1, %v5026_v53  ;;  %4242 = vmatpush1.msra.mxu1 %v4161_v57  ;;  %v4323_v54 = vpop.permute.xlu1 %4322 }
 0x16a   : > { %4171 = vmatpush1.msra.mxu0 %v4159_v51  ;;  %v4321_v55 = vpop.permute.xlu0 %4320  ;;  %4234 = vmatprep.mubr.f32.mxu0 %v5321_v5 }
 0x16b   : > { %v4330_v56 = vsel %vm4328_vm8, %v4321_v55, %v4323_v54 }
 0x16c   : > { %4340 = vmatprep.subr.mxu0 %v4330_v56 }
 0x16d   : > { %v4327_v59 = vpop.permute.xlu1 %4326 }
 0x16e   : > { %5031 = vmatmul.mubr.msk.f32.vlgmr.msra.gmra.mrb[0].mxu1 %vm303_vm1, %v5029_v58  ;;  %v4325_v60 = vpop.permute.xlu0 %4324 }
 0x16f   : > { %v4331_v61 = vsel %vm4328_vm8, %v4323_v54, %v4325_v60  ;;  %v4332_v4 = vsel %vm4328_vm8, %v4325_v60, %v4327_v59  ;;  %4475 = vmatprep.mubr.f32.mxu1 %v5321_v5 }
 0x170   : > { %4411 = vmatprep.subr.mxu1 %v4332_v4 }
 0x171   : > { %5030 = vmatmul.mubr.msk.f32.vlgmr.msra.gmra.mrb[0].mxu0 %vm303_vm1, %v5029_v58  ;;  %4412 = vmatpush1.msra.mxu1 %v4331_v61  ;;  %v4491_v62 = vpop.permute.xlu1 %4490 }
 0x172   : > { %v4319_v63 = vpop.permute.xlu0 %4318  ;;  %4404 = vmatprep.mubr.f32.mxu0 %v5321_v5 }
 0x173   : > { %v4329_v6 = vsel %vm4328_vm8, %v4319_v63, %v4321_v55 }
 0x174   : > { %4341 = vmatpush1.msra.mxu0 %v4329_v6 }
 0x175   : > { %v4495_v8 = vpop.permute.xlu1 %4494 }
 0x176   : > { %5034 = vmatmul.mubr.msk.f32.vlgmr.msra.gmra.mrb[0].mxu1 %vm303_vm1, %v5032_v7  ;;  %v4493_v9 = vpop.permute.xlu0 %4492 }
 0x177   : > { %v4500_v10 = vsel %vm4498_vm9, %v4491_v62, %v4493_v9  ;;  %4645 = vmatprep.mubr.f32.mxu1 %v5321_v5  ;;  %v4501_v16 = vsel %vm4498_vm9, %v4493_v9, %v4495_v8 }
 0x178   : > { %4510 = vmatprep.subr.mxu0 %v4500_v10 }
 0x179   : > { %5033 = vmatmul.mubr.msk.f32.vlgmr.msra.gmra.mrb[0].mxu0 %vm303_vm1, %v5032_v7  ;;  %v4489_v11 = vpop.permute.xlu1 %4488 }
 0x17a   : > { %v4499_v12 = vsel %vm4498_vm9, %v4489_v11, %v4491_v62  ;;  %v4497_v13 = vpop.permute.xlu0 %4496  ;;  %4574 = vmatprep.mubr.f32.mxu0 %v5321_v5 }
 0x17b   : > { %4511 = vmatpush1.msra.mxu0 %v4499_v12  ;;  %v4502_v14 = vsel %vm4498_vm9, %v4495_v8, %v4497_v13 }
 0x17c   : > { %4581 = vmatprep.subr.mxu1 %v4502_v14 }
 0x17d   : > { %4582 = vmatpush1.msra.mxu1 %v4501_v16  ;;  %v4663_v17 = vpop.permute.xlu1 %4662 }
 0x17e   : > { %5037 = vmatmul.mubr.msk.f32.vlgmr.msra.gmra.mrb[0].mxu1 %vm303_vm1, %v5035_v15  ;;  %v4661_v18 = vpop.permute.xlu0 %4660 }
 0x17f   : > { %v4670_v19 = vsel %vm4668_vm10, %v4661_v18, %v4663_v17  ;;  %4815 = vmatprep.mubr.f32.mxu1 %v5321_v5 }
 0x180   : > { %4680 = vmatprep.subr.mxu0 %v4670_v19 }
 0x181   : > { %5036 = vmatmul.mubr.msk.f32.vlgmr.msra.gmra.mrb[0].mxu0 %vm303_vm1, %v5035_v15  ;;  %v4667_v20 = vpop.permute.xlu1 %4666 }
 0x182   : > { %v4665_v21 = vpop.permute.xlu0 %4664  ;;  %4744 = vmatprep.mubr.f32.mxu0 %v5321_v5 }
 0x183   : > { %v4671_v22 = vsel %vm4668_vm10, %v4663_v17, %v4665_v21  ;;  %v4672_v23 = vsel %vm4668_vm10, %v4665_v21, %v4667_v20 }
 0x184   : > { %4751 = vmatprep.subr.mxu1 %v4672_v23 }
 0x185   : > { %4752 = vmatpush1.msra.mxu1 %v4671_v22 }
 0x186   : > { %5040 = vmatmul.mubr.msk.f32.vlgmr.msra.gmra.mrb[0].mxu1 %vm303_vm1, %v5038_v24  ;;  %v4659_v25 = vpop.permute.xlu0 %4658 }
 0x187   : > { %v4669_v26 = vsel %vm4668_vm10, %v4659_v25, %v4661_v18 }
 0x188   : > { %4681 = vmatpush1.msra.mxu0 %v4669_v26 }
 0x189   : > { %5039 = vmatmul.mubr.msk.f32.vlgmr.msra.gmra.mrb[0].mxu0 %vm303_vm1, %v5038_v24 }
 0x192   : > { %v4830_v5 = vpop.permute.xlu1 %4829 }
 0x259   : > { %v4817_v0 = vpop.f32.mrb[0].mxu1 }
 0x25a   : > { %v4834_v2 = vadd.f32 %v4830_v5, %v4817_v0  ;;  %v4819_v27 = vpop.f32.mrb[1].mxu1 }
 0x25b   : > { %v4835_v34 = vadd.f32 %v4830_v5, %v4819_v27 }
 0x25c   : > { %4838 = vst [vmem:[%s246_s24 + $0x10] sm:$0xff] %v4834_v2  ;;  %v4746_v3 = vpop.f32.mrb[0].mxu0 }
 0x25d   : > { %4839 = vst [vmem:[%s246_s24 + $0x18] sm:$0xff] %v4835_v34  ;;  %v4832_v28 = vadd.f32 %v4830_v5, %v4746_v3  ;;  %v4748_v29 = vpop.f32.mrb[1].mxu0 }
 0x25e   : > { %v4833_v30 = vadd.f32 %v4830_v5, %v4748_v29 }
 0x25f   : > { %4836 = vst [vmem:[%s246_s24] sm:$0xff] %v4832_v28 }
 0x260   : > { %4837 = vst [vmem:[%s246_s24 + $0x8] sm:$0xff] %v4833_v30 }
 0x261   : > { %5252 = shalt.err (!%p5249_p5)
}
 0x262   : > { %s5253_s9 = scalar_lea.hbm %s5877_s30, 512  ;;  %s5257_s13 = scalar_lea.hbm %s5928_s4, 1024 }
 0x263   : > { %p5254_p6 = scmp.ne.s32.totalorder %s5877_s30, %s5253_s9  ;;  %p5258_p10 = scmp.lt.u32.totalorder %s5877_s30, %s5928_s4 }
 0x264   : > { %p5259_p11 = scmp.lt.u32.totalorder %s5257_s13, %s5253_s9  ;;  %p5261_p13 = scmp.lt.u32.totalorder %s5253_s9, %s5877_s30 }
 0x265   : > { %p5255_p7 = pnand %p5254_p6, %p5412_p4 }
 0x266   : > { %p5260_p12 = por %p5259_p11, %p5258_p10 }
 0x267   : > { %p5256_p9 = pneg %p5255_p7 }
 0x268   : > { %p5262_p0 = por %p5261_p13, %p5260_p12 }
 0x26a   : > { %p5263_p1 = pnand %p5262_p0, %p5256_p9 }
 0x26c   : > { %5266 = shalt.err (!%p5263_p1)
}
 0x26d   : > { %5155 = dma.vmem_to_hbm [thread:$0]  (%p5412_p4), %s5879_s12, 512, %s5877_s30, %s4841_s18  }
 0x26e PF: > { %p5161_p2 = scmp.ge.s32.totalorder %s5317_s20, 2  ;;  %s4869_s22 = sand.u32 1, %s5297_s15  }
 0x26f   : > { %s4870_s24 = scalar_lea.sflag [#allocation3], %s4869_s22 }
 0x270   : > { %p5158_p3 = pnand %p5161_p2, %p5419_p8 }
 0x272   : > { %5292 = dma.done.wait (!%p5158_p3), %s4870_s24, 512  }
 0x273   : > { %5294 = vsyncadd (!%p5158_p3), %s4870_s24, 4294966784  ;;  %s17_s20 = sadd.s32 1, %s5317_s20   ;;  %s5931_s15 = smov %s5301_s16 }
 0x274   : > { %p14_p5 = scmp.ge.s32.totalorder %s17_s20, 4   ;;  %s5932_s16 = smov %s5305_s17 }
 0x275   : > { %s5933_s17 = smov %s5425_s28  ;;  %s5934_s18 = smov %s5313_s19 }
 0x276   : > { %s5935_s19 = smov %s5937_s23  ;;  %16 = sbr.rel (!%p14_p5) target bundleno = 4 (0x4), region = 100 }
 0x27d   :  { %4875 = vsyncpa [#allocation3], 1 }
 0x27e   :  { %4877 = vsyncpa [#allocation3 + $0x1], 1 }

</bundles_post_ra>
